<compile_context>
chip_gen: v7x
topology: tpu7x:2x2x1
jax: 0.10.0
libtpu: 0.0.40
codegen_flags: <defaults>
</compile_context>

<pallas_src>
import math
import jax
import jax.numpy as jnp
from jax import lax
from jax.experimental import pallas as pl
from jax.experimental.pallas import tpu as pltpu

# ---- problem sizes (small, consistent with the module's forward) ----
B, C, HS, WS = 2, 4, 16, 16       # latents: (B, C, 16, 16)
HW = HS * WS                      # 256 noise latents (lane axis)
SEQ = 8                           # prompt tokens
DIM = 32                          # cross-attention hidden dim
CLIP = 64                         # CLIP embedding dim
NUM_ID_TOKENS = 4                 # faceid tokens from image_proj_model
M = 2                             # max facial objects
PATCH = 4                         # patches per facial crop
HEADS = 2
DH = DIM // HEADS
T = SEQ + NUM_ID_TOKENS           # 12 real context tokens after concat
T_PAD = 16                        # padded to an 8-sublane boundary
FACIAL_WEIGHT = 0.01
MASK_LOSS_PROB = 0.5


# ---------------- the single fused kernel ----------------

def _consistent_id_kernel(
    # SMEM scalar operands
    tscale_ref, valid_ref,
    # VMEM tensor operands
    fid_ref, img_ref, mfe_ref, prompt_ref, tokmask_ref,
    x_ref, text_ref, idx_ref, idxmask_ref, seg_ref, tgt_ref, mask_ref,
    # VMEM weights
    wfid_ref, wimg_ref, bid_ref, wfe1_ref, bfe1_ref, wfe2_ref, bfe2_ref,
    wq_ref, bq_ref, wkv_ref, bkv_ref, wo_ref, bo_ref,
    # outputs
    pred_ref, floss_ref, mse_ref):
    scale = 1.0 / math.sqrt(DH)

    # ---- hoisted loop invariants (JAX does not CSE broadcast/iota) ----
    zero_row = jnp.zeros((1, DIM), jnp.float32)
    zero_idblk = jnp.zeros((T_PAD - SEQ, DIM), jnp.float32)
    zero_chw = jnp.zeros((C, HW), jnp.float32)
    rows_idblk = lax.broadcasted_iota(jnp.int32, (T_PAD - SEQ, 1), 0)
    iota_mt = lax.broadcasted_iota(jnp.int32, (M, T_PAD), 1)
    row_ids = lax.broadcasted_iota(jnp.int32, (T_PAD, 1), 0)
    neg_pad = jnp.where(row_ids < T, 0.0, -1e30).astype(jnp.float32)

    # ---- conditioning: id-token projection + FacialEncoder MLP (batched) ----
    img_pooled = jnp.mean(img_ref[...], axis=1)                  # (B, CLIP)
    fid = fid_ref[...]                                           # (B, CLIP)
    # fused id-token projection: one matmul pair -> (B, NUM_ID_TOKENS*DIM)
    id_all = (jnp.dot(fid, wfid_ref[...], preferred_element_type=jnp.float32)
              + jnp.dot(img_pooled, wimg_ref[...],
                        preferred_element_type=jnp.float32)
              + bid_ref[...])

    feats = jnp.mean(mfe_ref[...], axis=1)                       # (B*M, CLIP)
    hdn = jax.nn.gelu(
        jnp.dot(feats, wfe1_ref[...],
                preferred_element_type=jnp.float32) + bfe1_ref[...])
    proj = jnp.dot(hdn, wfe2_ref[...],
                   preferred_element_type=jnp.float32) + bfe2_ref[...]  # (B*M, DIM)

    # assemble the padded context (B*T_PAD, DIM) entirely in registers:
    # 8-row aligned concats only; id-token rows placed with iota selects.
    ctx_parts = []
    for b in range(B):                                           # B = 2, unrolled
        num = zero_row
        den = 1e-5
        for m in range(M):
            v = valid_ref[b, m]                                  # SMEM scalar
            num = num + v * proj[b * M + m:b * M + m + 1, :]
            den = den + v
        pooled = num / den                                       # (1, DIM)

        seq_b = prompt_ref[b] + tokmask_ref[:, b:b + 1] * pooled  # (SEQ, DIM)
        id_blk = zero_idblk
        for j in range(NUM_ID_TOKENS):                           # 4, unrolled selects
            id_blk = jnp.where(rows_idblk == j,
                               id_all[b:b + 1, j * DIM:(j + 1) * DIM], id_blk)
        # pad rows carry 0.1*text too; harmless (their scores are masked to -inf)
        ctx_parts.append(jnp.concatenate([seq_b, id_blk], axis=0)
                         + 0.1 * text_ref[b:b + 1, :])           # (T_PAD, DIM)
    ctx_all = jnp.concatenate(ctx_parts, axis=0)                 # (B*T_PAD, DIM)

    # fused K/V projection for all batches / tokens in one matmul
    kv_all = jnp.dot(ctx_all, wkv_ref[...],
                     preferred_element_type=jnp.float32) + bkv_ref[...]  # (B*T_PAD, 2*DIM)

    # ---- "UNet" cross-attention + facial loss + mask/MSE epilogue ----
    total = jnp.zeros((1, 1), jnp.float32)
    sse = jnp.zeros((1, 1), jnp.float32)
    for b in range(B):                                           # B = 2, unrolled
        x_b = x_ref[b]                                           # (C, HW), lane-dense
        # Q projection directly in lane-dense (DIM, HW) orientation
        q_b = lax.dot_general(wq_ref[...], x_b, (((0,), (0,)), ((), ())),
                              preferred_element_type=jnp.float32) + bq_ref[...]
        kv_b = kv_all[b * T_PAD:(b + 1) * T_PAD, :]              # aligned slice
        k_b = kv_b[:, :DIM]                                      # (T_PAD, DIM)
        v_b = kv_b[:, DIM:]                                      # (T_PAD, DIM)

        # facial-loss per-batch invariants (hoisted out of the head loop)
        idx_col = idx_ref[:, b:b + 1]                            # (M, 1) int32
        onehot = (iota_mt == idx_col).astype(jnp.float32)        # (M, T_PAD)
        seg_b = seg_ref[b]                                       # (M, HW)
        bg = 1.0 - seg_b
        bg_sum = jnp.sum(bg, axis=1, keepdims=True) + 1e-5       # (M, 1)
        obj_sum = jnp.sum(seg_b, axis=1, keepdims=True) + 1e-5
        maskcol = idxmask_ref[:, b:b + 1]                        # (M, 1)
        cnt = jnp.sum(maskcol, keepdims=True) + 1e-5             # (1, 1)

        out_c = zero_chw
        for h in range(HEADS):                                   # HEADS = 2, unrolled
            hsl = slice(h * DH, (h + 1) * DH)
            q_h = q_b[hsl, :]                                    # (DH, HW)
            k_h = k_b[:, hsl]                                    # (T_PAD, DH)
            v_h = v_b[:, hsl]                                    # (T_PAD, DH)
            # scores with HW on the lane axis; softmax over tokens (axis 0)
            s = lax.dot_general(k_h, q_h, (((1,), (0,)), ((), ())),
                                preferred_element_type=jnp.float32) * scale
            s = s + neg_pad
            s = s - jnp.max(s, axis=0, keepdims=True)
            e = jnp.exp(s)
            p = e * (1.0 / jnp.sum(e, axis=0, keepdims=True))    # (T_PAD, HW)
            oh = lax.dot_general(v_h, p, (((0,), (0,)), ((), ())),
                                 preferred_element_type=jnp.float32)  # (DH, HW)
            # per-head output projection, accumulated lane-dense as (C, HW)
            out_c = out_c + lax.dot_general(
                wo_ref[hsl, :], oh, (((0,), (0,)), ((), ())),
                preferred_element_type=jnp.float32)

            # BalancedL1Loss (normalize=True) on the gathered attention probs;
            # a[m, :] = p[facial_token_idx[b, m], :] (lane-dense gather via onehot)
            a = lax.dot_general(onehot, p, (((1,), (0,)), ((), ())),
                                preferred_element_type=jnp.float32)   # (M, HW)
            a = a / (jnp.max(a, axis=1, keepdims=True) + 1e-5)
            loss_m = (jnp.sum(a * bg, axis=1, keepdims=True) / bg_sum
                      - jnp.sum(a * seg_b, axis=1, keepdims=True) / obj_sum)
            total = total + jnp.sum(loss_m * maskcol, keepdims=True) / cnt

        # timestep-scaled residual + projected attention output, (C, HW)
        out_b = x_b * tscale_ref[b, 0] + out_c + bo_ref[...]

        # background masking + MSE contribution (fused epilogue)
        msk = mask_ref[b]                                        # (1, HW)
        pred_b = out_b * msk
        d = pred_b - tgt_ref[b] * msk
        sse = sse + jnp.sum(d * d)
        pred_ref[b] = pred_b

    floss_ref[...] = total / float(B * HEADS)
    mse_ref[...] = sse / float(B * C * HW)


def consistent_id_fused_call(p, tscale, valid_mask, faceid_embeds, image_embeds,
                             multi_facial_embeds, prompt_embeds,
                             facial_token_masks, noisy_latents, text_embeds,
                             facial_token_idxs, facial_token_idx_masks,
                             segmaps, target, bg_mask):
    vmem = pl.BlockSpec(memory_space=pltpu.MemorySpace.VMEM)
    smem = pl.BlockSpec(memory_space=pltpu.MemorySpace.SMEM)
    pred, floss, mse = pl.pallas_call(
        _consistent_id_kernel,
        out_shape=(jax.ShapeDtypeStruct((B, C, HW), jnp.float32),
                   jax.ShapeDtypeStruct((1, 1), jnp.float32),
                   jax.ShapeDtypeStruct((1, 1), jnp.float32)),
        in_specs=[smem, smem] + [vmem] * 25,
        out_specs=(vmem, vmem, vmem),
    )(tscale, valid_mask,
      faceid_embeds, image_embeds,
      multi_facial_embeds.reshape(B * M, PATCH, CLIP),
      prompt_embeds,
      facial_token_masks.T,                     # (SEQ, B) for column reads
      noisy_latents.reshape(B, C, HW),
      text_embeds,
      facial_token_idxs.T.astype(jnp.int32),    # (M, B)
      facial_token_idx_masks.T,                 # (M, B)
      segmaps, target, bg_mask,
      p["W_fid"], p["W_img"], p["b_id"],
      p["W_fe1"], p["b_fe1"], p["W_fe2"], p["b_fe2"],
      p["Wq"], p["bq_col"], p["Wkv"], p["bkv"], p["Wo"], p["bo_col"])
    return pred, floss[0, 0], mse[0, 0]


# ---------------- host-side glue ----------------

def prepare_params(raw):
    """One-time host-side weight fusion / bias reshaping."""
    p = dict(raw)
    p["b_id"] = raw["b_id"].reshape(1, -1)
    p["b_fe1"] = raw["b_fe1"].reshape(1, -1)
    p["b_fe2"] = raw["b_fe2"].reshape(1, -1)
    p["bq_col"] = raw["bq"].reshape(-1, 1)                          # (DIM, 1)
    p["Wkv"] = jnp.concatenate([raw["Wk"], raw["Wv"]], axis=1)      # (DIM, 2*DIM)
    p["bkv"] = jnp.concatenate([raw["bk"], raw["bv"]]).reshape(1, -1)
    p["bo_col"] = raw["bo"].reshape(-1, 1)                          # (C, 1)
    return p


def prep_segmaps(facial_masks):
    seg = facial_masks
    if seg.shape[-2] != HS or seg.shape[-1] != WS:
        # TODO(synk): PyTorch uses antialiased bilinear interpolate for segmaps.
        seg = jax.image.resize(seg, (B, M, HS, WS), method="bilinear")
    return seg.reshape(B, M, HW)


def consistent_id_forward(params, noisy_latents, timesteps, prompt_embeds,
                          image_embeds, faceid_embeds, unet_added_cond_kwargs,
                          multi_facial_embeds, facial_token_masks,
                          valid_facial_token_idx_mask, noise, batch,
                          parsing_mask_lists, facial_masks, facial_token_idxs,
                          facial_token_idx_masks, mask_loss_coin):
    # timestep conditioning scalar (host-side; scalar per batch row)
    tscale = (jnp.cos(0.001 * timesteps.astype(jnp.float32))
              + 0.01 * jnp.mean(unet_added_cond_kwargs["time_ids"], axis=-1)
              ).reshape(B, 1)
    segmaps = prep_segmaps(facial_masks)

    # mirrors `torch.rand(1) < self.mask_loss_prob` (host-side coin flip);
    # mask is ALWAYS passed so the kernel call is identical either way.
    use_mask = mask_loss_coin < MASK_LOSS_PROB
    if use_mask:
        mask_list = [m["WithoutBackground"][None] for m in parsing_mask_lists]
        mask_stacked = jnp.concatenate(mask_list, axis=0)        # (B, 1, h, w)
        # TODO(synk): jax.image.resize bilinear is not antialiased like F.interpolate.
        bg_mask = jax.image.resize(mask_stacked, (B, 1, HS, WS),
                                   method="bilinear").reshape(B, 1, HW)
    else:
        bg_mask = jnp.ones((B, 1, HW), jnp.float32)

    pred, facial_loss, mse = consistent_id_fused_call(
        params, tscale, valid_facial_token_idx_mask, faceid_embeds,
        image_embeds, multi_facial_embeds, prompt_embeds, facial_token_masks,
        noisy_latents, unet_added_cond_kwargs["text_embeds"],
        facial_token_idxs, facial_token_idx_masks, segmaps,
        noise.reshape(B, C, HW), bg_mask)

    loss_dict = {"background_loss": jnp.float32(0.0)}
    if use_mask:
        # with masked pred/target, background_loss == predict_loss in the reference
        loss_dict["background_loss"] = mse
    loss_dict["predict_loss"] = mse
    loss_dict["facial_loss"] = FACIAL_WEIGHT * facial_loss
    return pred.reshape(B, C, HS, WS), loss_dict


# ---------------- main ----------------

if __name__ == "__main__":
    key = jax.random.PRNGKey(0)
    ks = jax.random.split(key, 32)

    def init(k, shape, scale=0.02):
        return scale * jax.random.normal(k, shape, jnp.float32)

    raw_params = {
        "W_fid": init(ks[0], (CLIP, NUM_ID_TOKENS * DIM)),
        "W_img": init(ks[1], (CLIP, NUM_ID_TOKENS * DIM)),
        "b_id": jnp.zeros((NUM_ID_TOKENS * DIM,), jnp.float32),
        "W_fe1": init(ks[2], (CLIP, DIM)), "b_fe1": jnp.zeros((DIM,), jnp.float32),
        "W_fe2": init(ks[3], (DIM, DIM)), "b_fe2": jnp.zeros((DIM,), jnp.float32),
        "Wq": init(ks[4], (C, DIM)), "bq": jnp.zeros((DIM,), jnp.float32),
        "Wk": init(ks[5], (DIM, DIM)), "bk": jnp.zeros((DIM,), jnp.float32),
        "Wv": init(ks[6], (DIM, DIM)), "bv": jnp.zeros((DIM,), jnp.float32),
        "Wo": init(ks[7], (DIM, C)), "bo": jnp.zeros((C,), jnp.float32),
    }
    params = prepare_params(raw_params)

    noisy_latents = jax.random.normal(ks[8], (B, C, HS, WS), jnp.float32)
    timesteps = jnp.array([10, 500], jnp.int32)
    prompt_embeds = jax.random.normal(ks[9], (B, SEQ, DIM), jnp.float32)
    image_embeds = jax.random.normal(ks[10], (B, 4, CLIP), jnp.float32)
    faceid_embeds = jax.random.normal(ks[11], (B, CLIP), jnp.float32)
    unet_added_cond_kwargs = {
        "text_embeds": jax.random.normal(ks[12], (B, DIM), jnp.float32),
        "time_ids": jax.random.normal(ks[13], (B, 6), jnp.float32),
    }
    multi_facial_embeds = jax.random.normal(ks[14], (B, M, PATCH, CLIP), jnp.float32)
    facial_token_masks = (jax.random.uniform(ks[15], (B, SEQ)) < 0.25
                          ).astype(jnp.float32)
    valid_facial_token_idx_mask = (jax.random.uniform(ks[16], (B, M)) < 0.8
                                   ).astype(jnp.float32)
    noise = jax.random.normal(ks[17], (B, C, HS, WS), jnp.float32)
    batch = None  # unused by the forward pass
    parsing_mask_lists = [
        {"WithoutBackground":
            (jax.random.uniform(ks[18 + i], (1, 32, 32)) > 0.3).astype(jnp.float32)}
        for i in range(B)
    ]
    facial_masks = (jax.random.uniform(ks[20], (B, M, HS, WS)) > 0.5
                    ).astype(jnp.float32)
    facial_token_idxs = jax.random.randint(ks[21], (B, M), 0, T).astype(jnp.int32)
    facial_token_idx_masks = (jax.random.uniform(ks[22], (B, M)) < 0.9
                              ).astype(jnp.float32)

    # deterministic stand-in for the host-side `torch.rand(1)` coin flip
    mask_loss_coin = float(jax.random.uniform(jax.random.PRNGKey(123), ()))

    pred, loss_dict = consistent_id_forward(
        params, noisy_latents, timesteps, prompt_embeds, image_embeds,
        faceid_embeds, unet_added_cond_kwargs, multi_facial_embeds,
        facial_token_masks, valid_facial_token_idx_mask, noise, batch,
        parsing_mask_lists, facial_masks, facial_token_idxs,
        facial_token_idx_masks, mask_loss_coin)

    jax.block_until_ready((pred, loss_dict))
    print("KERNEL_OK")
</pallas_src>

<mosaic_0001>
module attributes {stable_mosaic.version = 11 : i64} {
  func.func @_consistent_id_kernel(%arg0: memref<2x1xf32, #tpu.memory_space<smem>>, %arg1: memref<2x2xf32, #tpu.memory_space<smem>>, %arg2: memref<2x64xf32, #tpu.memory_space<vmem>>, %arg3: memref<2x4x64xf32, #tpu.memory_space<vmem>>, %arg4: memref<4x4x64xf32, #tpu.memory_space<vmem>>, %arg5: memref<2x8x32xf32, #tpu.memory_space<vmem>>, %arg6: memref<8x2xf32, #tpu.memory_space<vmem>>, %arg7: memref<2x4x256xf32, #tpu.memory_space<vmem>>, %arg8: memref<2x32xf32, #tpu.memory_space<vmem>>, %arg9: memref<2x2xi32, #tpu.memory_space<vmem>>, %arg10: memref<2x2xf32, #tpu.memory_space<vmem>>, %arg11: memref<2x2x256xf32, #tpu.memory_space<vmem>>, %arg12: memref<2x4x256xf32, #tpu.memory_space<vmem>>, %arg13: memref<2x1x256xf32, #tpu.memory_space<vmem>>, %arg14: memref<64x128xf32, #tpu.memory_space<vmem>>, %arg15: memref<64x128xf32, #tpu.memory_space<vmem>>, %arg16: memref<1x128xf32, #tpu.memory_space<vmem>>, %arg17: memref<64x32xf32, #tpu.memory_space<vmem>>, %arg18: memref<1x32xf32, #tpu.memory_space<vmem>>, %arg19: memref<32x32xf32, #tpu.memory_space<vmem>>, %arg20: memref<1x32xf32, #tpu.memory_space<vmem>>, %arg21: memref<4x32xf32, #tpu.memory_space<vmem>>, %arg22: memref<32x1xf32, #tpu.memory_space<vmem>>, %arg23: memref<32x64xf32, #tpu.memory_space<vmem>>, %arg24: memref<1x64xf32, #tpu.memory_space<vmem>>, %arg25: memref<32x4xf32, #tpu.memory_space<vmem>>, %arg26: memref<4x1xf32, #tpu.memory_space<vmem>>, %arg27: memref<2x4x256xf32, #tpu.memory_space<vmem>>, %arg28: memref<1x1xf32, #tpu.memory_space<vmem>>, %arg29: memref<1x1xf32, #tpu.memory_space<vmem>>) attributes {dimension_semantics = [], scalar_prefetch = 0 : i64, scratch_operands = 0 : i64, tpu.core_type = #tpu.core_type<tc>} {
    %cst = arith.constant 0.000000e+00 : f32
    %0 = vector.broadcast %cst : f32 to vector<1x32xf32>
    %cst_0 = arith.constant 0.000000e+00 : f32
    %1 = vector.broadcast %cst_0 : f32 to vector<8x32xf32>
    %cst_1 = arith.constant 0.000000e+00 : f32
    %2 = vector.broadcast %cst_1 : f32 to vector<4x256xf32>
    %3 = tpu.iota {dimensions = array<i32: 0>} : vector<8x1xi32>
    %4 = tpu.iota {dimensions = array<i32: 1>} : vector<2x16xi32>
    %5 = tpu.iota {dimensions = array<i32: 0>} : vector<16x1xi32>
    %c12_i32 = arith.constant 12 : i32
    %6 = vector.broadcast %c12_i32 : i32 to vector<16x1xi32>
    %7 = arith.cmpi slt, %5, %6 : vector<16x1xi32>
    %cst_2 = arith.constant 0.000000e+00 : f32
    %cst_3 = arith.constant -1.000000e+30 : f32
    %8 = vector.broadcast %cst_2 : f32 to vector<16x1xf32>
    %9 = vector.broadcast %cst_3 : f32 to vector<16x1xf32>
    %10 = arith.select %7, %8, %9 : vector<16x1xi1>, vector<16x1xf32>
    %c0 = arith.constant 0 : index
    %c0_4 = arith.constant 0 : index
    %c0_5 = arith.constant 0 : index
    %11 = vector.load %arg3[%c0, %c0_4, %c0_5] : memref<2x4x64xf32, #tpu.memory_space<vmem>>, vector<2x4x64xf32>
    %cst_6 = arith.constant dense<0.000000e+00> : vector<2x64xf32>
    %12 = vector.multi_reduction <add>, %11, %cst_6 [1] : vector<2x4x64xf32> to vector<2x64xf32>
    %cst_7 = arith.constant 4.000000e+00 : f32
    %13 = vector.broadcast %cst_7 : f32 to vector<2x64xf32>
    %14 = arith.divf %12, %13 : vector<2x64xf32>
    %c0_8 = arith.constant 0 : index
    %c0_9 = arith.constant 0 : index
    %15 = vector.load %arg2[%c0_8, %c0_9] : memref<2x64xf32, #tpu.memory_space<vmem>>, vector<2x64xf32>
    %c0_10 = arith.constant 0 : index
    %c0_11 = arith.constant 0 : index
    %16 = vector.load %arg14[%c0_10, %c0_11] : memref<64x128xf32, #tpu.memory_space<vmem>>, vector<64x128xf32>
    %cst_12 = arith.constant dense<0.000000e+00> : vector<2x128xf32>
    %17 = tpu.matmul %15, %16, %cst_12 {dimension_numbers = #tpu.dot_dimension_numbers<[1], [0], [0], [1], [0, 0, 1, 1], [], []>} : vector<2x64xf32>, vector<64x128xf32>, vector<2x128xf32> -> vector<2x128xf32>
    %c0_13 = arith.constant 0 : index
    %c0_14 = arith.constant 0 : index
    %18 = vector.load %arg15[%c0_13, %c0_14] : memref<64x128xf32, #tpu.memory_space<vmem>>, vector<64x128xf32>
    %cst_15 = arith.constant dense<0.000000e+00> : vector<2x128xf32>
    %19 = tpu.matmul %14, %18, %cst_15 {dimension_numbers = #tpu.dot_dimension_numbers<[1], [0], [0], [1], [0, 0, 1, 1], [], []>} : vector<2x64xf32>, vector<64x128xf32>, vector<2x128xf32> -> vector<2x128xf32>
    %20 = arith.addf %17, %19 : vector<2x128xf32>
    %c0_16 = arith.constant 0 : index
    %c0_17 = arith.constant 0 : index
    %21 = vector.load %arg16[%c0_16, %c0_17] : memref<1x128xf32, #tpu.memory_space<vmem>>, vector<1x128xf32>
    %22 = vector.broadcast %21 : vector<1x128xf32> to vector<2x128xf32>
    %23 = arith.addf %20, %22 : vector<2x128xf32>
    %c0_18 = arith.constant 0 : index
    %c0_19 = arith.constant 0 : index
    %c0_20 = arith.constant 0 : index
    %24 = vector.load %arg4[%c0_18, %c0_19, %c0_20] : memref<4x4x64xf32, #tpu.memory_space<vmem>>, vector<4x4x64xf32>
    %cst_21 = arith.constant dense<0.000000e+00> : vector<4x64xf32>
    %25 = vector.multi_reduction <add>, %24, %cst_21 [1] : vector<4x4x64xf32> to vector<4x64xf32>
    %cst_22 = arith.constant 4.000000e+00 : f32
    %26 = vector.broadcast %cst_22 : f32 to vector<4x64xf32>
    %27 = arith.divf %25, %26 : vector<4x64xf32>
    %c0_23 = arith.constant 0 : index
    %c0_24 = arith.constant 0 : index
    %28 = vector.load %arg17[%c0_23, %c0_24] : memref<64x32xf32, #tpu.memory_space<vmem>>, vector<64x32xf32>
    %cst_25 = arith.constant dense<0.000000e+00> : vector<4x32xf32>
    %29 = tpu.matmul %27, %28, %cst_25 {dimension_numbers = #tpu.dot_dimension_numbers<[1], [0], [0], [1], [0, 0, 1, 1], [], []>} : vector<4x64xf32>, vector<64x32xf32>, vector<4x32xf32> -> vector<4x32xf32>
    %c0_26 = arith.constant 0 : index
    %c0_27 = arith.constant 0 : index
    %30 = vector.load %arg18[%c0_26, %c0_27] : memref<1x32xf32, #tpu.memory_space<vmem>>, vector<1x32xf32>
    %31 = vector.broadcast %30 : vector<1x32xf32> to vector<4x32xf32>
    %32 = arith.addf %29, %31 : vector<4x32xf32>
    %33 = arith.mulf %32, %32 : vector<4x32xf32>
    %34 = arith.mulf %32, %33 : vector<4x32xf32>
    %cst_28 = arith.constant 4.471500e-02 : f32
    %35 = vector.broadcast %cst_28 : f32 to vector<4x32xf32>
    %36 = arith.mulf %35, %34 : vector<4x32xf32>
    %37 = arith.addf %32, %36 : vector<4x32xf32>
    %cst_29 = arith.constant 0.797884583 : f32
    %38 = vector.broadcast %cst_29 : f32 to vector<4x32xf32>
    %39 = arith.mulf %38, %37 : vector<4x32xf32>
    %40 = math.tanh %39 : vector<4x32xf32>
    %cst_30 = arith.constant 1.000000e+00 : f32
    %41 = vector.broadcast %cst_30 : f32 to vector<4x32xf32>
    %42 = arith.addf %41, %40 : vector<4x32xf32>
    %cst_31 = arith.constant 5.000000e-01 : f32
    %43 = vector.broadcast %cst_31 : f32 to vector<4x32xf32>
    %44 = arith.mulf %43, %42 : vector<4x32xf32>
    %45 = arith.mulf %32, %44 : vector<4x32xf32>
    %c0_32 = arith.constant 0 : index
    %c0_33 = arith.constant 0 : index
    %46 = vector.load %arg19[%c0_32, %c0_33] : memref<32x32xf32, #tpu.memory_space<vmem>>, vector<32x32xf32>
    %cst_34 = arith.constant dense<0.000000e+00> : vector<4x32xf32>
    %47 = tpu.matmul %45, %46, %cst_34 {dimension_numbers = #tpu.dot_dimension_numbers<[1], [0], [0], [1], [0, 0, 1, 1], [], []>} : vector<4x32xf32>, vector<32x32xf32>, vector<4x32xf32> -> vector<4x32xf32>
    %c0_35 = arith.constant 0 : index
    %c0_36 = arith.constant 0 : index
    %48 = vector.load %arg20[%c0_35, %c0_36] : memref<1x32xf32, #tpu.memory_space<vmem>>, vector<1x32xf32>
    %49 = vector.broadcast %48 : vector<1x32xf32> to vector<4x32xf32>
    %50 = arith.addf %47, %49 : vector<4x32xf32>
    %c0_37 = arith.constant 0 : index
    %c0_38 = arith.constant 0 : index
    %51 = memref.load %arg1[%c0_37, %c0_38] : memref<2x2xf32, #tpu.memory_space<smem>>
    %52 = vector.extract_strided_slice %50 {offsets = [0, 0], sizes = [1, 32], strides = [1, 1]} : vector<4x32xf32> to vector<1x32xf32>
    %53 = vector.broadcast %51 : f32 to vector<1x32xf32>
    %54 = arith.mulf %53, %52 : vector<1x32xf32>
    %55 = arith.addf %0, %54 : vector<1x32xf32>
    %cst_39 = arith.constant 9.99999974E-6 : f32
    %56 = arith.addf %cst_39, %51 : f32
    %c0_40 = arith.constant 0 : index
    %c1 = arith.constant 1 : index
    %57 = memref.load %arg1[%c0_40, %c1] : memref<2x2xf32, #tpu.memory_space<smem>>
    %58 = vector.extract_strided_slice %50 {offsets = [1, 0], sizes = [1, 32], strides = [1, 1]} : vector<4x32xf32> to vector<1x32xf32>
    %59 = vector.broadcast %57 : f32 to vector<1x32xf32>
    %60 = arith.mulf %59, %58 : vector<1x32xf32>
    %61 = arith.addf %55, %60 : vector<1x32xf32>
    %62 = arith.addf %56, %57 : f32
    %63 = vector.broadcast %62 : f32 to vector<1x32xf32>
    %64 = arith.divf %61, %63 : vector<1x32xf32>
    %c0_41 = arith.constant 0 : index
    %c0_42 = arith.constant 0 : index
    %c0_43 = arith.constant 0 : index
    %65 = vector.load %arg5[%c0_41, %c0_42, %c0_43] : memref<2x8x32xf32, #tpu.memory_space<vmem>>, vector<1x8x32xf32>
    %66 = vector.shape_cast %65 : vector<1x8x32xf32> to vector<8x32xf32>
    %c0_44 = arith.constant 0 : index
    %c0_45 = arith.constant 0 : index
    %67 = vector.load %arg6[%c0_44, %c0_45] : memref<8x2xf32, #tpu.memory_space<vmem>>, vector<8x1xf32>
    %68 = vector.broadcast %67 : vector<8x1xf32> to vector<8x32xf32>
    %69 = vector.broadcast %64 : vector<1x32xf32> to vector<8x32xf32>
    %70 = arith.mulf %68, %69 : vector<8x32xf32>
    %71 = arith.addf %66, %70 : vector<8x32xf32>
    %c0_i32 = arith.constant 0 : i32
    %72 = vector.broadcast %c0_i32 : i32 to vector<8x1xi32>
    %73 = arith.cmpi eq, %3, %72 : vector<8x1xi32>
    %74 = vector.extract_strided_slice %23 {offsets = [0, 0], sizes = [1, 32], strides = [1, 1]} : vector<2x128xf32> to vector<1x32xf32>
    %75 = vector.shape_cast %73 : vector<8x1xi1> to vector<8x1xi1>
    %76 = vector.broadcast %75 : vector<8x1xi1> to vector<8x32xi1>
    %77 = vector.shape_cast %74 : vector<1x32xf32> to vector<1x32xf32>
    %78 = vector.broadcast %77 : vector<1x32xf32> to vector<8x32xf32>
    %79 = arith.select %76, %78, %1 : vector<8x32xi1>, vector<8x32xf32>
    %c1_i32 = arith.constant 1 : i32
    %80 = vector.broadcast %c1_i32 : i32 to vector<8x1xi32>
    %81 = arith.cmpi eq, %3, %80 : vector<8x1xi32>
    %82 = vector.extract_strided_slice %23 {offsets = [0, 32], sizes = [1, 32], strides = [1, 1]} : vector<2x128xf32> to vector<1x32xf32>
    %83 = vector.shape_cast %81 : vector<8x1xi1> to vector<8x1xi1>
    %84 = vector.broadcast %83 : vector<8x1xi1> to vector<8x32xi1>
    %85 = vector.shape_cast %82 : vector<1x32xf32> to vector<1x32xf32>
    %86 = vector.broadcast %85 : vector<1x32xf32> to vector<8x32xf32>
    %87 = arith.select %84, %86, %79 : vector<8x32xi1>, vector<8x32xf32>
    %c2_i32 = arith.constant 2 : i32
    %88 = vector.broadcast %c2_i32 : i32 to vector<8x1xi32>
    %89 = arith.cmpi eq, %3, %88 : vector<8x1xi32>
    %90 = vector.extract_strided_slice %23 {offsets = [0, 64], sizes = [1, 32], strides = [1, 1]} : vector<2x128xf32> to vector<1x32xf32>
    %91 = vector.shape_cast %89 : vector<8x1xi1> to vector<8x1xi1>
    %92 = vector.broadcast %91 : vector<8x1xi1> to vector<8x32xi1>
    %93 = vector.shape_cast %90 : vector<1x32xf32> to vector<1x32xf32>
    %94 = vector.broadcast %93 : vector<1x32xf32> to vector<8x32xf32>
    %95 = arith.select %92, %94, %87 : vector<8x32xi1>, vector<8x32xf32>
    %c3_i32 = arith.constant 3 : i32
    %96 = vector.broadcast %c3_i32 : i32 to vector<8x1xi32>
    %97 = arith.cmpi eq, %3, %96 : vector<8x1xi32>
    %98 = vector.extract_strided_slice %23 {offsets = [0, 96], sizes = [1, 32], strides = [1, 1]} : vector<2x128xf32> to vector<1x32xf32>
    %99 = vector.shape_cast %97 : vector<8x1xi1> to vector<8x1xi1>
    %100 = vector.broadcast %99 : vector<8x1xi1> to vector<8x32xi1>
    %101 = vector.shape_cast %98 : vector<1x32xf32> to vector<1x32xf32>
    %102 = vector.broadcast %101 : vector<1x32xf32> to vector<8x32xf32>
    %103 = arith.select %100, %102, %95 : vector<8x32xi1>, vector<8x32xf32>
    %104 = tpu.concatenate %71, %103 in 0 : vector<8x32xf32>, vector<8x32xf32> -> vector<16x32xf32>
    %c0_46 = arith.constant 0 : index
    %c0_47 = arith.constant 0 : index
    %105 = vector.load %arg8[%c0_46, %c0_47] : memref<2x32xf32, #tpu.memory_space<vmem>>, vector<1x32xf32>
    %cst_48 = arith.constant 1.000000e-01 : f32
    %106 = vector.broadcast %cst_48 : f32 to vector<1x32xf32>
    %107 = arith.mulf %106, %105 : vector<1x32xf32>
    %108 = vector.broadcast %107 : vector<1x32xf32> to vector<16x32xf32>
    %109 = arith.addf %104, %108 : vector<16x32xf32>
    %c1_49 = arith.constant 1 : index
    %c0_50 = arith.constant 0 : index
    %110 = memref.load %arg1[%c1_49, %c0_50] : memref<2x2xf32, #tpu.memory_space<smem>>
    %111 = vector.extract_strided_slice %50 {offsets = [2, 0], sizes = [1, 32], strides = [1, 1]} : vector<4x32xf32> to vector<1x32xf32>
    %112 = vector.broadcast %110 : f32 to vector<1x32xf32>
    %113 = arith.mulf %112, %111 : vector<1x32xf32>
    %114 = arith.addf %0, %113 : vector<1x32xf32>
    %cst_51 = arith.constant 9.99999974E-6 : f32
    %115 = arith.addf %cst_51, %110 : f32
    %c1_52 = arith.constant 1 : index
    %c1_53 = arith.constant 1 : index
    %116 = memref.load %arg1[%c1_52, %c1_53] : memref<2x2xf32, #tpu.memory_space<smem>>
    %117 = vector.extract_strided_slice %50 {offsets = [3, 0], sizes = [1, 32], strides = [1, 1]} : vector<4x32xf32> to vector<1x32xf32>
    %118 = vector.broadcast %116 : f32 to vector<1x32xf32>
    %119 = arith.mulf %118, %117 : vector<1x32xf32>
    %120 = arith.addf %114, %119 : vector<1x32xf32>
    %121 = arith.addf %115, %116 : f32
    %122 = vector.broadcast %121 : f32 to vector<1x32xf32>
    %123 = arith.divf %120, %122 : vector<1x32xf32>
    %c1_54 = arith.constant 1 : index
    %c0_55 = arith.constant 0 : index
    %c0_56 = arith.constant 0 : index
    %124 = vector.load %arg5[%c1_54, %c0_55, %c0_56] : memref<2x8x32xf32, #tpu.memory_space<vmem>>, vector<1x8x32xf32>
    %125 = vector.shape_cast %124 : vector<1x8x32xf32> to vector<8x32xf32>
    %c0_57 = arith.constant 0 : index
    %c1_58 = arith.constant 1 : index
    %126 = vector.load %arg6[%c0_57, %c1_58] : memref<8x2xf32, #tpu.memory_space<vmem>>, vector<8x1xf32>
    %127 = vector.broadcast %126 : vector<8x1xf32> to vector<8x32xf32>
    %128 = vector.broadcast %123 : vector<1x32xf32> to vector<8x32xf32>
    %129 = arith.mulf %127, %128 : vector<8x32xf32>
    %130 = arith.addf %125, %129 : vector<8x32xf32>
    %c0_i32_59 = arith.constant 0 : i32
    %131 = vector.broadcast %c0_i32_59 : i32 to vector<8x1xi32>
    %132 = arith.cmpi eq, %3, %131 : vector<8x1xi32>
    %133 = vector.extract_strided_slice %23 {offsets = [1, 0], sizes = [1, 32], strides = [1, 1]} : vector<2x128xf32> to vector<1x32xf32>
    %134 = vector.shape_cast %132 : vector<8x1xi1> to vector<8x1xi1>
    %135 = vector.broadcast %134 : vector<8x1xi1> to vector<8x32xi1>
    %136 = vector.shape_cast %133 : vector<1x32xf32> to vector<1x32xf32>
    %137 = vector.broadcast %136 : vector<1x32xf32> to vector<8x32xf32>
    %138 = arith.select %135, %137, %1 : vector<8x32xi1>, vector<8x32xf32>
    %c1_i32_60 = arith.constant 1 : i32
    %139 = vector.broadcast %c1_i32_60 : i32 to vector<8x1xi32>
    %140 = arith.cmpi eq, %3, %139 : vector<8x1xi32>
    %141 = vector.extract_strided_slice %23 {offsets = [1, 32], sizes = [1, 32], strides = [1, 1]} : vector<2x128xf32> to vector<1x32xf32>
    %142 = vector.shape_cast %140 : vector<8x1xi1> to vector<8x1xi1>
    %143 = vector.broadcast %142 : vector<8x1xi1> to vector<8x32xi1>
    %144 = vector.shape_cast %141 : vector<1x32xf32> to vector<1x32xf32>
    %145 = vector.broadcast %144 : vector<1x32xf32> to vector<8x32xf32>
    %146 = arith.select %143, %145, %138 : vector<8x32xi1>, vector<8x32xf32>
    %c2_i32_61 = arith.constant 2 : i32
    %147 = vector.broadcast %c2_i32_61 : i32 to vector<8x1xi32>
    %148 = arith.cmpi eq, %3, %147 : vector<8x1xi32>
    %149 = vector.extract_strided_slice %23 {offsets = [1, 64], sizes = [1, 32], strides = [1, 1]} : vector<2x128xf32> to vector<1x32xf32>
    %150 = vector.shape_cast %148 : vector<8x1xi1> to vector<8x1xi1>
    %151 = vector.broadcast %150 : vector<8x1xi1> to vector<8x32xi1>
    %152 = vector.shape_cast %149 : vector<1x32xf32> to vector<1x32xf32>
    %153 = vector.broadcast %152 : vector<1x32xf32> to vector<8x32xf32>
    %154 = arith.select %151, %153, %146 : vector<8x32xi1>, vector<8x32xf32>
    %c3_i32_62 = arith.constant 3 : i32
    %155 = vector.broadcast %c3_i32_62 : i32 to vector<8x1xi32>
    %156 = arith.cmpi eq, %3, %155 : vector<8x1xi32>
    %157 = vector.extract_strided_slice %23 {offsets = [1, 96], sizes = [1, 32], strides = [1, 1]} : vector<2x128xf32> to vector<1x32xf32>
    %158 = vector.shape_cast %156 : vector<8x1xi1> to vector<8x1xi1>
    %159 = vector.broadcast %158 : vector<8x1xi1> to vector<8x32xi1>
    %160 = vector.shape_cast %157 : vector<1x32xf32> to vector<1x32xf32>
    %161 = vector.broadcast %160 : vector<1x32xf32> to vector<8x32xf32>
    %162 = arith.select %159, %161, %154 : vector<8x32xi1>, vector<8x32xf32>
    %163 = tpu.concatenate %130, %162 in 0 : vector<8x32xf32>, vector<8x32xf32> -> vector<16x32xf32>
    %c1_63 = arith.constant 1 : index
    %c0_64 = arith.constant 0 : index
    %164 = vector.load %arg8[%c1_63, %c0_64] : memref<2x32xf32, #tpu.memory_space<vmem>>, vector<1x32xf32>
    %cst_65 = arith.constant 1.000000e-01 : f32
    %165 = vector.broadcast %cst_65 : f32 to vector<1x32xf32>
    %166 = arith.mulf %165, %164 : vector<1x32xf32>
    %167 = vector.broadcast %166 : vector<1x32xf32> to vector<16x32xf32>
    %168 = arith.addf %163, %167 : vector<16x32xf32>
    %169 = tpu.concatenate %109, %168 in 0 : vector<16x32xf32>, vector<16x32xf32> -> vector<32x32xf32>
    %c0_66 = arith.constant 0 : index
    %c0_67 = arith.constant 0 : index
    %170 = vector.load %arg23[%c0_66, %c0_67] : memref<32x64xf32, #tpu.memory_space<vmem>>, vector<32x64xf32>
    %cst_68 = arith.constant dense<0.000000e+00> : vector<32x64xf32>
    %171 = tpu.matmul %169, %170, %cst_68 {dimension_numbers = #tpu.dot_dimension_numbers<[1], [0], [0], [1], [0, 0, 1, 1], [], []>} : vector<32x32xf32>, vector<32x64xf32>, vector<32x64xf32> -> vector<32x64xf32>
    %c0_69 = arith.constant 0 : index
    %c0_70 = arith.constant 0 : index
    %172 = vector.load %arg24[%c0_69, %c0_70] : memref<1x64xf32, #tpu.memory_space<vmem>>, vector<1x64xf32>
    %173 = vector.broadcast %172 : vector<1x64xf32> to vector<32x64xf32>
    %174 = arith.addf %171, %173 : vector<32x64xf32>
    %cst_71 = arith.constant 0.000000e+00 : f32
    %175 = vector.broadcast %cst_71 : f32 to vector<1x1xf32>
    %cst_72 = arith.constant 0.000000e+00 : f32
    %176 = vector.broadcast %cst_72 : f32 to vector<1x1xf32>
    %c0_73 = arith.constant 0 : index
    %c0_74 = arith.constant 0 : index
    %c0_75 = arith.constant 0 : index
    %177 = vector.load %arg7[%c0_73, %c0_74, %c0_75] : memref<2x4x256xf32, #tpu.memory_space<vmem>>, vector<1x4x256xf32>
    %178 = vector.shape_cast %177 : vector<1x4x256xf32> to vector<4x256xf32>
    %c0_76 = arith.constant 0 : index
    %c0_77 = arith.constant 0 : index
    %179 = vector.load %arg21[%c0_76, %c0_77] : memref<4x32xf32, #tpu.memory_space<vmem>>, vector<4x32xf32>
    %cst_78 = arith.constant dense<0.000000e+00> : vector<32x256xf32>
    %180 = tpu.matmul %179, %178, %cst_78 {dimension_numbers = #tpu.dot_dimension_numbers<[0], [0], [1], [1], [0, 1, 1, 1], [], []>} : vector<4x32xf32>, vector<4x256xf32>, vector<32x256xf32> -> vector<32x256xf32>
    %c0_79 = arith.constant 0 : index
    %c0_80 = arith.constant 0 : index
    %181 = vector.load %arg22[%c0_79, %c0_80] : memref<32x1xf32, #tpu.memory_space<vmem>>, vector<32x1xf32>
    %182 = vector.broadcast %181 : vector<32x1xf32> to vector<32x256xf32>
    %183 = arith.addf %180, %182 : vector<32x256xf32>
    %184 = vector.extract_strided_slice %174 {offsets = [0, 0], sizes = [16, 64], strides = [1, 1]} : vector<32x64xf32> to vector<16x64xf32>
    %185 = vector.extract_strided_slice %184 {offsets = [0, 0], sizes = [16, 32], strides = [1, 1]} : vector<16x64xf32> to vector<16x32xf32>
    %186 = vector.extract_strided_slice %184 {offsets = [0, 32], sizes = [16, 32], strides = [1, 1]} : vector<16x64xf32> to vector<16x32xf32>
    %c0_81 = arith.constant 0 : index
    %c0_82 = arith.constant 0 : index
    %187 = vector.load %arg9[%c0_81, %c0_82] : memref<2x2xi32, #tpu.memory_space<vmem>>, vector<2x1xi32>
    %188 = vector.broadcast %187 : vector<2x1xi32> to vector<2x16xi32>
    %189 = arith.cmpi eq, %4, %188 : vector<2x16xi32>
    %190 = arith.extui %189 : vector<2x16xi1> to vector<2x16xi32>
    %191 = arith.sitofp %190 : vector<2x16xi32> to vector<2x16xf32>
    %c0_83 = arith.constant 0 : index
    %c0_84 = arith.constant 0 : index
    %c0_85 = arith.constant 0 : index
    %192 = vector.load %arg11[%c0_83, %c0_84, %c0_85] : memref<2x2x256xf32, #tpu.memory_space<vmem>>, vector<1x2x256xf32>
    %193 = vector.shape_cast %192 : vector<1x2x256xf32> to vector<2x256xf32>
    %cst_86 = arith.constant 1.000000e+00 : f32
    %194 = vector.broadcast %cst_86 : f32 to vector<2x256xf32>
    %195 = arith.subf %194, %193 : vector<2x256xf32>
    %cst_87 = arith.constant dense<0.000000e+00> : vector<2xf32>
    %196 = vector.multi_reduction <add>, %195, %cst_87 [1] : vector<2x256xf32> to vector<2xf32>
    %197 = vector.shape_cast %196 : vector<2xf32> to vector<2x1xf32>
    %cst_88 = arith.constant 9.99999974E-6 : f32
    %198 = vector.broadcast %cst_88 : f32 to vector<2x1xf32>
    %199 = arith.addf %197, %198 : vector<2x1xf32>
    %cst_89 = arith.constant dense<0.000000e+00> : vector<2xf32>
    %200 = vector.multi_reduction <add>, %193, %cst_89 [1] : vector<2x256xf32> to vector<2xf32>
    %201 = vector.shape_cast %200 : vector<2xf32> to vector<2x1xf32>
    %cst_90 = arith.constant 9.99999974E-6 : f32
    %202 = vector.broadcast %cst_90 : f32 to vector<2x1xf32>
    %203 = arith.addf %201, %202 : vector<2x1xf32>
    %c0_91 = arith.constant 0 : index
    %c0_92 = arith.constant 0 : index
    %204 = vector.load %arg10[%c0_91, %c0_92] : memref<2x2xf32, #tpu.memory_space<vmem>>, vector<2x1xf32>
    %205 = vector.shape_cast %204 : vector<2x1xf32> to vector<1x2x1xf32>
    %cst_93 = arith.constant dense<0.000000e+00> : vector<1xf32>
    %206 = vector.multi_reduction <add>, %205, %cst_93 [1, 2] : vector<1x2x1xf32> to vector<1xf32>
    %207 = vector.shape_cast %206 : vector<1xf32> to vector<1x1x1xf32>
    %208 = vector.extract %207[0, 0, 0] : f32 from vector<1x1x1xf32>
    %209 = vector.broadcast %208 : f32 to vector<1x1xf32>
    %cst_94 = arith.constant 9.99999974E-6 : f32
    %210 = vector.broadcast %cst_94 : f32 to vector<1x1xf32>
    %211 = arith.addf %209, %210 : vector<1x1xf32>
    %212 = vector.extract_strided_slice %183 {offsets = [0, 0], sizes = [16, 256], strides = [1, 1]} : vector<32x256xf32> to vector<16x256xf32>
    %213 = vector.extract_strided_slice %185 {offsets = [0, 0], sizes = [16, 16], strides = [1, 1]} : vector<16x32xf32> to vector<16x16xf32>
    %214 = vector.extract_strided_slice %186 {offsets = [0, 0], sizes = [16, 16], strides = [1, 1]} : vector<16x32xf32> to vector<16x16xf32>
    %cst_95 = arith.constant dense<0.000000e+00> : vector<16x256xf32>
    %215 = tpu.matmul %213, %212, %cst_95 {dimension_numbers = #tpu.dot_dimension_numbers<[1], [0], [0], [1], [0, 0, 1, 1], [], []>} : vector<16x16xf32>, vector<16x256xf32>, vector<16x256xf32> -> vector<16x256xf32>
    %cst_96 = arith.constant 2.500000e-01 : f32
    %216 = vector.broadcast %cst_96 : f32 to vector<16x256xf32>
    %217 = arith.mulf %215, %216 : vector<16x256xf32>
    %218 = vector.broadcast %10 : vector<16x1xf32> to vector<16x256xf32>
    %219 = arith.addf %217, %218 : vector<16x256xf32>
    %cst_97 = arith.constant dense<0xFF800000> : vector<256xf32>
    %220 = vector.multi_reduction <maximumf>, %219, %cst_97 [0] : vector<16x256xf32> to vector<256xf32>
    %221 = vector.shape_cast %220 : vector<256xf32> to vector<1x256xf32>
    %222 = vector.broadcast %221 : vector<1x256xf32> to vector<16x256xf32>
    %223 = arith.subf %219, %222 : vector<16x256xf32>
    %224 = math.exp %223 : vector<16x256xf32>
    %cst_98 = arith.constant dense<0.000000e+00> : vector<256xf32>
    %225 = vector.multi_reduction <add>, %224, %cst_98 [0] : vector<16x256xf32> to vector<256xf32>
    %226 = vector.shape_cast %225 : vector<256xf32> to vector<1x256xf32>
    %cst_99 = arith.constant 1.000000e+00 : f32
    %227 = vector.broadcast %cst_99 : f32 to vector<1x256xf32>
    %228 = arith.divf %227, %226 : vector<1x256xf32>
    %229 = vector.broadcast %228 : vector<1x256xf32> to vector<16x256xf32>
    %230 = arith.mulf %224, %229 : vector<16x256xf32>
    %cst_100 = arith.constant dense<0.000000e+00> : vector<16x256xf32>
    %231 = tpu.matmul %214, %230, %cst_100 {dimension_numbers = #tpu.dot_dimension_numbers<[0], [0], [1], [1], [0, 1, 1, 1], [], []>} : vector<16x16xf32>, vector<16x256xf32>, vector<16x256xf32> -> vector<16x256xf32>
    %c0_101 = arith.constant 0 : index
    %c0_102 = arith.constant 0 : index
    %232 = vector.load %arg25[%c0_101, %c0_102] : memref<32x4xf32, #tpu.memory_space<vmem>>, vector<16x4xf32>
    %cst_103 = arith.constant dense<0.000000e+00> : vector<4x256xf32>
    %233 = tpu.matmul %232, %231, %cst_103 {dimension_numbers = #tpu.dot_dimension_numbers<[0], [0], [1], [1], [0, 1, 1, 1], [], []>} : vector<16x4xf32>, vector<16x256xf32>, vector<4x256xf32> -> vector<4x256xf32>
    %234 = arith.addf %2, %233 : vector<4x256xf32>
    %cst_104 = arith.constant dense<0.000000e+00> : vector<2x256xf32>
    %235 = tpu.matmul %191, %230, %cst_104 {dimension_numbers = #tpu.dot_dimension_numbers<[1], [0], [0], [1], [0, 0, 1, 1], [], []>} : vector<2x16xf32>, vector<16x256xf32>, vector<2x256xf32> -> vector<2x256xf32>
    %cst_105 = arith.constant dense<0xFF800000> : vector<2xf32>
    %236 = vector.multi_reduction <maximumf>, %235, %cst_105 [1] : vector<2x256xf32> to vector<2xf32>
    %237 = vector.shape_cast %236 : vector<2xf32> to vector<2x1xf32>
    %cst_106 = arith.constant 9.99999974E-6 : f32
    %238 = vector.broadcast %cst_106 : f32 to vector<2x1xf32>
    %239 = arith.addf %237, %238 : vector<2x1xf32>
    %240 = vector.broadcast %239 : vector<2x1xf32> to vector<2x256xf32>
    %241 = arith.divf %235, %240 : vector<2x256xf32>
    %242 = arith.mulf %241, %195 : vector<2x256xf32>
    %cst_107 = arith.constant dense<0.000000e+00> : vector<2xf32>
    %243 = vector.multi_reduction <add>, %242, %cst_107 [1] : vector<2x256xf32> to vector<2xf32>
    %244 = vector.shape_cast %243 : vector<2xf32> to vector<2x1xf32>
    %245 = arith.divf %244, %199 : vector<2x1xf32>
    %246 = arith.mulf %241, %193 : vector<2x256xf32>
    %cst_108 = arith.constant dense<0.000000e+00> : vector<2xf32>
    %247 = vector.multi_reduction <add>, %246, %cst_108 [1] : vector<2x256xf32> to vector<2xf32>
    %248 = vector.shape_cast %247 : vector<2xf32> to vector<2x1xf32>
    %249 = arith.divf %248, %203 : vector<2x1xf32>
    %250 = arith.subf %245, %249 : vector<2x1xf32>
    %251 = arith.mulf %250, %204 : vector<2x1xf32>
    %252 = vector.shape_cast %251 : vector<2x1xf32> to vector<1x2x1xf32>
    %cst_109 = arith.constant dense<0.000000e+00> : vector<1xf32>
    %253 = vector.multi_reduction <add>, %252, %cst_109 [1, 2] : vector<1x2x1xf32> to vector<1xf32>
    %254 = vector.shape_cast %253 : vector<1xf32> to vector<1x1x1xf32>
    %255 = vector.extract %254[0, 0, 0] : f32 from vector<1x1x1xf32>
    %256 = vector.broadcast %255 : f32 to vector<1x1xf32>
    %257 = arith.divf %256, %211 : vector<1x1xf32>
    %258 = arith.addf %175, %257 : vector<1x1xf32>
    %259 = vector.extract_strided_slice %183 {offsets = [16, 0], sizes = [16, 256], strides = [1, 1]} : vector<32x256xf32> to vector<16x256xf32>
    %260 = vector.extract_strided_slice %185 {offsets = [0, 16], sizes = [16, 16], strides = [1, 1]} : vector<16x32xf32> to vector<16x16xf32>
    %261 = vector.extract_strided_slice %186 {offsets = [0, 16], sizes = [16, 16], strides = [1, 1]} : vector<16x32xf32> to vector<16x16xf32>
    %cst_110 = arith.constant dense<0.000000e+00> : vector<16x256xf32>
    %262 = tpu.matmul %260, %259, %cst_110 {dimension_numbers = #tpu.dot_dimension_numbers<[1], [0], [0], [1], [0, 0, 1, 1], [], []>} : vector<16x16xf32>, vector<16x256xf32>, vector<16x256xf32> -> vector<16x256xf32>
    %cst_111 = arith.constant 2.500000e-01 : f32
    %263 = vector.broadcast %cst_111 : f32 to vector<16x256xf32>
    %264 = arith.mulf %262, %263 : vector<16x256xf32>
    %265 = vector.broadcast %10 : vector<16x1xf32> to vector<16x256xf32>
    %266 = arith.addf %264, %265 : vector<16x256xf32>
    %cst_112 = arith.constant dense<0xFF800000> : vector<256xf32>
    %267 = vector.multi_reduction <maximumf>, %266, %cst_112 [0] : vector<16x256xf32> to vector<256xf32>
    %268 = vector.shape_cast %267 : vector<256xf32> to vector<1x256xf32>
    %269 = vector.broadcast %268 : vector<1x256xf32> to vector<16x256xf32>
    %270 = arith.subf %266, %269 : vector<16x256xf32>
    %271 = math.exp %270 : vector<16x256xf32>
    %cst_113 = arith.constant dense<0.000000e+00> : vector<256xf32>
    %272 = vector.multi_reduction <add>, %271, %cst_113 [0] : vector<16x256xf32> to vector<256xf32>
    %273 = vector.shape_cast %272 : vector<256xf32> to vector<1x256xf32>
    %cst_114 = arith.constant 1.000000e+00 : f32
    %274 = vector.broadcast %cst_114 : f32 to vector<1x256xf32>
    %275 = arith.divf %274, %273 : vector<1x256xf32>
    %276 = vector.broadcast %275 : vector<1x256xf32> to vector<16x256xf32>
    %277 = arith.mulf %271, %276 : vector<16x256xf32>
    %cst_115 = arith.constant dense<0.000000e+00> : vector<16x256xf32>
    %278 = tpu.matmul %261, %277, %cst_115 {dimension_numbers = #tpu.dot_dimension_numbers<[0], [0], [1], [1], [0, 1, 1, 1], [], []>} : vector<16x16xf32>, vector<16x256xf32>, vector<16x256xf32> -> vector<16x256xf32>
    %c16 = arith.constant 16 : index
    %c0_116 = arith.constant 0 : index
    %279 = vector.load %arg25[%c16, %c0_116] : memref<32x4xf32, #tpu.memory_space<vmem>>, vector<16x4xf32>
    %cst_117 = arith.constant dense<0.000000e+00> : vector<4x256xf32>
    %280 = tpu.matmul %279, %278, %cst_117 {dimension_numbers = #tpu.dot_dimension_numbers<[0], [0], [1], [1], [0, 1, 1, 1], [], []>} : vector<16x4xf32>, vector<16x256xf32>, vector<4x256xf32> -> vector<4x256xf32>
    %281 = arith.addf %234, %280 : vector<4x256xf32>
    %cst_118 = arith.constant dense<0.000000e+00> : vector<2x256xf32>
    %282 = tpu.matmul %191, %277, %cst_118 {dimension_numbers = #tpu.dot_dimension_numbers<[1], [0], [0], [1], [0, 0, 1, 1], [], []>} : vector<2x16xf32>, vector<16x256xf32>, vector<2x256xf32> -> vector<2x256xf32>
    %cst_119 = arith.constant dense<0xFF800000> : vector<2xf32>
    %283 = vector.multi_reduction <maximumf>, %282, %cst_119 [1] : vector<2x256xf32> to vector<2xf32>
    %284 = vector.shape_cast %283 : vector<2xf32> to vector<2x1xf32>
    %cst_120 = arith.constant 9.99999974E-6 : f32
    %285 = vector.broadcast %cst_120 : f32 to vector<2x1xf32>
    %286 = arith.addf %284, %285 : vector<2x1xf32>
    %287 = vector.broadcast %286 : vector<2x1xf32> to vector<2x256xf32>
    %288 = arith.divf %282, %287 : vector<2x256xf32>
    %289 = arith.mulf %288, %195 : vector<2x256xf32>
    %cst_121 = arith.constant dense<0.000000e+00> : vector<2xf32>
    %290 = vector.multi_reduction <add>, %289, %cst_121 [1] : vector<2x256xf32> to vector<2xf32>
    %291 = vector.shape_cast %290 : vector<2xf32> to vector<2x1xf32>
    %292 = arith.divf %291, %199 : vector<2x1xf32>
    %293 = arith.mulf %288, %193 : vector<2x256xf32>
    %cst_122 = arith.constant dense<0.000000e+00> : vector<2xf32>
    %294 = vector.multi_reduction <add>, %293, %cst_122 [1] : vector<2x256xf32> to vector<2xf32>
    %295 = vector.shape_cast %294 : vector<2xf32> to vector<2x1xf32>
    %296 = arith.divf %295, %203 : vector<2x1xf32>
    %297 = arith.subf %292, %296 : vector<2x1xf32>
    %298 = arith.mulf %297, %204 : vector<2x1xf32>
    %299 = vector.shape_cast %298 : vector<2x1xf32> to vector<1x2x1xf32>
    %cst_123 = arith.constant dense<0.000000e+00> : vector<1xf32>
    %300 = vector.multi_reduction <add>, %299, %cst_123 [1, 2] : vector<1x2x1xf32> to vector<1xf32>
    %301 = vector.shape_cast %300 : vector<1xf32> to vector<1x1x1xf32>
    %302 = vector.extract %301[0, 0, 0] : f32 from vector<1x1x1xf32>
    %303 = vector.broadcast %302 : f32 to vector<1x1xf32>
    %304 = arith.divf %303, %211 : vector<1x1xf32>
    %305 = arith.addf %258, %304 : vector<1x1xf32>
    %c0_124 = arith.constant 0 : index
    %c0_125 = arith.constant 0 : index
    %306 = memref.load %arg0[%c0_124, %c0_125] : memref<2x1xf32, #tpu.memory_space<smem>>
    %307 = vector.broadcast %306 : f32 to vector<4x256xf32>
    %308 = arith.mulf %178, %307 : vector<4x256xf32>
    %309 = arith.addf %308, %281 : vector<4x256xf32>
    %c0_126 = arith.constant 0 : index
    %c0_127 = arith.constant 0 : index
    %310 = vector.load %arg26[%c0_126, %c0_127] : memref<4x1xf32, #tpu.memory_space<vmem>>, vector<4x1xf32>
    %311 = vector.broadcast %310 : vector<4x1xf32> to vector<4x256xf32>
    %312 = arith.addf %309, %311 : vector<4x256xf32>
    %c0_128 = arith.constant 0 : index
    %c0_129 = arith.constant 0 : index
    %c0_130 = arith.constant 0 : index
    %313 = vector.load %arg13[%c0_128, %c0_129, %c0_130] : memref<2x1x256xf32, #tpu.memory_space<vmem>>, vector<1x1x256xf32>
    %314 = vector.shape_cast %313 : vector<1x1x256xf32> to vector<1x256xf32>
    %315 = vector.broadcast %314 : vector<1x256xf32> to vector<4x256xf32>
    %316 = arith.mulf %312, %315 : vector<4x256xf32>
    %c0_131 = arith.constant 0 : index
    %c0_132 = arith.constant 0 : index
    %c0_133 = arith.constant 0 : index
    %317 = vector.load %arg12[%c0_131, %c0_132, %c0_133] : memref<2x4x256xf32, #tpu.memory_space<vmem>>, vector<1x4x256xf32>
    %318 = vector.shape_cast %317 : vector<1x4x256xf32> to vector<4x256xf32>
    %319 = vector.broadcast %314 : vector<1x256xf32> to vector<4x256xf32>
    %320 = arith.mulf %318, %319 : vector<4x256xf32>
    %321 = arith.subf %316, %320 : vector<4x256xf32>
    %322 = arith.mulf %321, %321 : vector<4x256xf32>
    %323 = vector.shape_cast %322 : vector<4x256xf32> to vector<1x4x256xf32>
    %cst_134 = arith.constant dense<0.000000e+00> : vector<1xf32>
    %324 = vector.multi_reduction <add>, %323, %cst_134 [1, 2] : vector<1x4x256xf32> to vector<1xf32>
    %325 = vector.shape_cast %324 : vector<1xf32> to vector<1x1x1xf32>
    %326 = vector.extract %325[0, 0, 0] : f32 from vector<1x1x1xf32>
    %327 = vector.broadcast %326 : f32 to vector<1x1xf32>
    %328 = arith.addf %176, %327 : vector<1x1xf32>
    %c0_135 = arith.constant 0 : index
    %c0_136 = arith.constant 0 : index
    %c0_137 = arith.constant 0 : index
    %329 = vector.load %arg27[%c0_135, %c0_136, %c0_137] : memref<2x4x256xf32, #tpu.memory_space<vmem>>, vector<1x4x256xf32>
    %330 = vector.shape_cast %329 : vector<1x4x256xf32> to vector<4x256xf32>
    %331 = vector.shape_cast %316 : vector<4x256xf32> to vector<1x4x256xf32>
    tpu.vector_store %arg27[%c0_135, %c0_136, %c0_137], %331 {strides = array<i32>} : memref<2x4x256xf32, #tpu.memory_space<vmem>>, vector<1x4x256xf32>,
    %c1_138 = arith.constant 1 : index
    %c0_139 = arith.constant 0 : index
    %c0_140 = arith.constant 0 : index
    %332 = vector.load %arg7[%c1_138, %c0_139, %c0_140] : memref<2x4x256xf32, #tpu.memory_space<vmem>>, vector<1x4x256xf32>
    %333 = vector.shape_cast %332 : vector<1x4x256xf32> to vector<4x256xf32>
    %c0_141 = arith.constant 0 : index
    %c0_142 = arith.constant 0 : index
    %334 = vector.load %arg21[%c0_141, %c0_142] : memref<4x32xf32, #tpu.memory_space<vmem>>, vector<4x32xf32>
    %cst_143 = arith.constant dense<0.000000e+00> : vector<32x256xf32>
    %335 = tpu.matmul %334, %333, %cst_143 {dimension_numbers = #tpu.dot_dimension_numbers<[0], [0], [1], [1], [0, 1, 1, 1], [], []>} : vector<4x32xf32>, vector<4x256xf32>, vector<32x256xf32> -> vector<32x256xf32>
    %c0_144 = arith.constant 0 : index
    %c0_145 = arith.constant 0 : index
    %336 = vector.load %arg22[%c0_144, %c0_145] : memref<32x1xf32, #tpu.memory_space<vmem>>, vector<32x1xf32>
    %337 = vector.broadcast %336 : vector<32x1xf32> to vector<32x256xf32>
    %338 = arith.addf %335, %337 : vector<32x256xf32>
    %339 = vector.extract_strided_slice %174 {offsets = [16, 0], sizes = [16, 64], strides = [1, 1]} : vector<32x64xf32> to vector<16x64xf32>
    %340 = vector.extract_strided_slice %339 {offsets = [0, 0], sizes = [16, 32], strides = [1, 1]} : vector<16x64xf32> to vector<16x32xf32>
    %341 = vector.extract_strided_slice %339 {offsets = [0, 32], sizes = [16, 32], strides = [1, 1]} : vector<16x64xf32> to vector<16x32xf32>
    %c0_146 = arith.constant 0 : index
    %c1_147 = arith.constant 1 : index
    %342 = vector.load %arg9[%c0_146, %c1_147] : memref<2x2xi32, #tpu.memory_space<vmem>>, vector<2x1xi32>
    %343 = vector.broadcast %342 : vector<2x1xi32> to vector<2x16xi32>
    %344 = arith.cmpi eq, %4, %343 : vector<2x16xi32>
    %345 = arith.extui %344 : vector<2x16xi1> to vector<2x16xi32>
    %346 = arith.sitofp %345 : vector<2x16xi32> to vector<2x16xf32>
    %c1_148 = arith.constant 1 : index
    %c0_149 = arith.constant 0 : index
    %c0_150 = arith.constant 0 : index
    %347 = vector.load %arg11[%c1_148, %c0_149, %c0_150] : memref<2x2x256xf32, #tpu.memory_space<vmem>>, vector<1x2x256xf32>
    %348 = vector.shape_cast %347 : vector<1x2x256xf32> to vector<2x256xf32>
    %cst_151 = arith.constant 1.000000e+00 : f32
    %349 = vector.broadcast %cst_151 : f32 to vector<2x256xf32>
    %350 = arith.subf %349, %348 : vector<2x256xf32>
    %cst_152 = arith.constant dense<0.000000e+00> : vector<2xf32>
    %351 = vector.multi_reduction <add>, %350, %cst_152 [1] : vector<2x256xf32> to vector<2xf32>
    %352 = vector.shape_cast %351 : vector<2xf32> to vector<2x1xf32>
    %cst_153 = arith.constant 9.99999974E-6 : f32
    %353 = vector.broadcast %cst_153 : f32 to vector<2x1xf32>
    %354 = arith.addf %352, %353 : vector<2x1xf32>
    %cst_154 = arith.constant dense<0.000000e+00> : vector<2xf32>
    %355 = vector.multi_reduction <add>, %348, %cst_154 [1] : vector<2x256xf32> to vector<2xf32>
    %356 = vector.shape_cast %355 : vector<2xf32> to vector<2x1xf32>
    %cst_155 = arith.constant 9.99999974E-6 : f32
    %357 = vector.broadcast %cst_155 : f32 to vector<2x1xf32>
    %358 = arith.addf %356, %357 : vector<2x1xf32>
    %c0_156 = arith.constant 0 : index
    %c1_157 = arith.constant 1 : index
    %359 = vector.load %arg10[%c0_156, %c1_157] : memref<2x2xf32, #tpu.memory_space<vmem>>, vector<2x1xf32>
    %360 = vector.shape_cast %359 : vector<2x1xf32> to vector<1x2x1xf32>
    %cst_158 = arith.constant dense<0.000000e+00> : vector<1xf32>
    %361 = vector.multi_reduction <add>, %360, %cst_158 [1, 2] : vector<1x2x1xf32> to vector<1xf32>
    %362 = vector.shape_cast %361 : vector<1xf32> to vector<1x1x1xf32>
    %363 = vector.extract %362[0, 0, 0] : f32 from vector<1x1x1xf32>
    %364 = vector.broadcast %363 : f32 to vector<1x1xf32>
    %cst_159 = arith.constant 9.99999974E-6 : f32
    %365 = vector.broadcast %cst_159 : f32 to vector<1x1xf32>
    %366 = arith.addf %364, %365 : vector<1x1xf32>
    %367 = vector.extract_strided_slice %338 {offsets = [0, 0], sizes = [16, 256], strides = [1, 1]} : vector<32x256xf32> to vector<16x256xf32>
    %368 = vector.extract_strided_slice %340 {offsets = [0, 0], sizes = [16, 16], strides = [1, 1]} : vector<16x32xf32> to vector<16x16xf32>
    %369 = vector.extract_strided_slice %341 {offsets = [0, 0], sizes = [16, 16], strides = [1, 1]} : vector<16x32xf32> to vector<16x16xf32>
    %cst_160 = arith.constant dense<0.000000e+00> : vector<16x256xf32>
    %370 = tpu.matmul %368, %367, %cst_160 {dimension_numbers = #tpu.dot_dimension_numbers<[1], [0], [0], [1], [0, 0, 1, 1], [], []>} : vector<16x16xf32>, vector<16x256xf32>, vector<16x256xf32> -> vector<16x256xf32>
    %cst_161 = arith.constant 2.500000e-01 : f32
    %371 = vector.broadcast %cst_161 : f32 to vector<16x256xf32>
    %372 = arith.mulf %370, %371 : vector<16x256xf32>
    %373 = vector.broadcast %10 : vector<16x1xf32> to vector<16x256xf32>
    %374 = arith.addf %372, %373 : vector<16x256xf32>
    %cst_162 = arith.constant dense<0xFF800000> : vector<256xf32>
    %375 = vector.multi_reduction <maximumf>, %374, %cst_162 [0] : vector<16x256xf32> to vector<256xf32>
    %376 = vector.shape_cast %375 : vector<256xf32> to vector<1x256xf32>
    %377 = vector.broadcast %376 : vector<1x256xf32> to vector<16x256xf32>
    %378 = arith.subf %374, %377 : vector<16x256xf32>
    %379 = math.exp %378 : vector<16x256xf32>
    %cst_163 = arith.constant dense<0.000000e+00> : vector<256xf32>
    %380 = vector.multi_reduction <add>, %379, %cst_163 [0] : vector<16x256xf32> to vector<256xf32>
    %381 = vector.shape_cast %380 : vector<256xf32> to vector<1x256xf32>
    %cst_164 = arith.constant 1.000000e+00 : f32
    %382 = vector.broadcast %cst_164 : f32 to vector<1x256xf32>
    %383 = arith.divf %382, %381 : vector<1x256xf32>
    %384 = vector.broadcast %383 : vector<1x256xf32> to vector<16x256xf32>
    %385 = arith.mulf %379, %384 : vector<16x256xf32>
    %cst_165 = arith.constant dense<0.000000e+00> : vector<16x256xf32>
    %386 = tpu.matmul %369, %385, %cst_165 {dimension_numbers = #tpu.dot_dimension_numbers<[0], [0], [1], [1], [0, 1, 1, 1], [], []>} : vector<16x16xf32>, vector<16x256xf32>, vector<16x256xf32> -> vector<16x256xf32>
    %c0_166 = arith.constant 0 : index
    %c0_167 = arith.constant 0 : index
    %387 = vector.load %arg25[%c0_166, %c0_167] : memref<32x4xf32, #tpu.memory_space<vmem>>, vector<16x4xf32>
    %cst_168 = arith.constant dense<0.000000e+00> : vector<4x256xf32>
    %388 = tpu.matmul %387, %386, %cst_168 {dimension_numbers = #tpu.dot_dimension_numbers<[0], [0], [1], [1], [0, 1, 1, 1], [], []>} : vector<16x4xf32>, vector<16x256xf32>, vector<4x256xf32> -> vector<4x256xf32>
    %389 = arith.addf %2, %388 : vector<4x256xf32>
    %cst_169 = arith.constant dense<0.000000e+00> : vector<2x256xf32>
    %390 = tpu.matmul %346, %385, %cst_169 {dimension_numbers = #tpu.dot_dimension_numbers<[1], [0], [0], [1], [0, 0, 1, 1], [], []>} : vector<2x16xf32>, vector<16x256xf32>, vector<2x256xf32> -> vector<2x256xf32>
    %cst_170 = arith.constant dense<0xFF800000> : vector<2xf32>
    %391 = vector.multi_reduction <maximumf>, %390, %cst_170 [1] : vector<2x256xf32> to vector<2xf32>
    %392 = vector.shape_cast %391 : vector<2xf32> to vector<2x1xf32>
    %cst_171 = arith.constant 9.99999974E-6 : f32
    %393 = vector.broadcast %cst_171 : f32 to vector<2x1xf32>
    %394 = arith.addf %392, %393 : vector<2x1xf32>
    %395 = vector.broadcast %394 : vector<2x1xf32> to vector<2x256xf32>
    %396 = arith.divf %390, %395 : vector<2x256xf32>
    %397 = arith.mulf %396, %350 : vector<2x256xf32>
    %cst_172 = arith.constant dense<0.000000e+00> : vector<2xf32>
    %398 = vector.multi_reduction <add>, %397, %cst_172 [1] : vector<2x256xf32> to vector<2xf32>
    %399 = vector.shape_cast %398 : vector<2xf32> to vector<2x1xf32>
    %400 = arith.divf %399, %354 : vector<2x1xf32>
    %401 = arith.mulf %396, %348 : vector<2x256xf32>
    %cst_173 = arith.constant dense<0.000000e+00> : vector<2xf32>
    %402 = vector.multi_reduction <add>, %401, %cst_173 [1] : vector<2x256xf32> to vector<2xf32>
    %403 = vector.shape_cast %402 : vector<2xf32> to vector<2x1xf32>
    %404 = arith.divf %403, %358 : vector<2x1xf32>
    %405 = arith.subf %400, %404 : vector<2x1xf32>
    %406 = arith.mulf %405, %359 : vector<2x1xf32>
    %407 = vector.shape_cast %406 : vector<2x1xf32> to vector<1x2x1xf32>
    %cst_174 = arith.constant dense<0.000000e+00> : vector<1xf32>
    %408 = vector.multi_reduction <add>, %407, %cst_174 [1, 2] : vector<1x2x1xf32> to vector<1xf32>
    %409 = vector.shape_cast %408 : vector<1xf32> to vector<1x1x1xf32>
    %410 = vector.extract %409[0, 0, 0] : f32 from vector<1x1x1xf32>
    %411 = vector.broadcast %410 : f32 to vector<1x1xf32>
    %412 = arith.divf %411, %366 : vector<1x1xf32>
    %413 = arith.addf %305, %412 : vector<1x1xf32>
    %414 = vector.extract_strided_slice %338 {offsets = [16, 0], sizes = [16, 256], strides = [1, 1]} : vector<32x256xf32> to vector<16x256xf32>
    %415 = vector.extract_strided_slice %340 {offsets = [0, 16], sizes = [16, 16], strides = [1, 1]} : vector<16x32xf32> to vector<16x16xf32>
    %416 = vector.extract_strided_slice %341 {offsets = [0, 16], sizes = [16, 16], strides = [1, 1]} : vector<16x32xf32> to vector<16x16xf32>
    %cst_175 = arith.constant dense<0.000000e+00> : vector<16x256xf32>
    %417 = tpu.matmul %415, %414, %cst_175 {dimension_numbers = #tpu.dot_dimension_numbers<[1], [0], [0], [1], [0, 0, 1, 1], [], []>} : vector<16x16xf32>, vector<16x256xf32>, vector<16x256xf32> -> vector<16x256xf32>
    %cst_176 = arith.constant 2.500000e-01 : f32
    %418 = vector.broadcast %cst_176 : f32 to vector<16x256xf32>
    %419 = arith.mulf %417, %418 : vector<16x256xf32>
    %420 = vector.broadcast %10 : vector<16x1xf32> to vector<16x256xf32>
    %421 = arith.addf %419, %420 : vector<16x256xf32>
    %cst_177 = arith.constant dense<0xFF800000> : vector<256xf32>
    %422 = vector.multi_reduction <maximumf>, %421, %cst_177 [0] : vector<16x256xf32> to vector<256xf32>
    %423 = vector.shape_cast %422 : vector<256xf32> to vector<1x256xf32>
    %424 = vector.broadcast %423 : vector<1x256xf32> to vector<16x256xf32>
    %425 = arith.subf %421, %424 : vector<16x256xf32>
    %426 = math.exp %425 : vector<16x256xf32>
    %cst_178 = arith.constant dense<0.000000e+00> : vector<256xf32>
    %427 = vector.multi_reduction <add>, %426, %cst_178 [0] : vector<16x256xf32> to vector<256xf32>
    %428 = vector.shape_cast %427 : vector<256xf32> to vector<1x256xf32>
    %cst_179 = arith.constant 1.000000e+00 : f32
    %429 = vector.broadcast %cst_179 : f32 to vector<1x256xf32>
    %430 = arith.divf %429, %428 : vector<1x256xf32>
    %431 = vector.broadcast %430 : vector<1x256xf32> to vector<16x256xf32>
    %432 = arith.mulf %426, %431 : vector<16x256xf32>
    %cst_180 = arith.constant dense<0.000000e+00> : vector<16x256xf32>
    %433 = tpu.matmul %416, %432, %cst_180 {dimension_numbers = #tpu.dot_dimension_numbers<[0], [0], [1], [1], [0, 1, 1, 1], [], []>} : vector<16x16xf32>, vector<16x256xf32>, vector<16x256xf32> -> vector<16x256xf32>
    %c16_181 = arith.constant 16 : index
    %c0_182 = arith.constant 0 : index
    %434 = vector.load %arg25[%c16_181, %c0_182] : memref<32x4xf32, #tpu.memory_space<vmem>>, vector<16x4xf32>
    %cst_183 = arith.constant dense<0.000000e+00> : vector<4x256xf32>
    %435 = tpu.matmul %434, %433, %cst_183 {dimension_numbers = #tpu.dot_dimension_numbers<[0], [0], [1], [1], [0, 1, 1, 1], [], []>} : vector<16x4xf32>, vector<16x256xf32>, vector<4x256xf32> -> vector<4x256xf32>
    %436 = arith.addf %389, %435 : vector<4x256xf32>
    %cst_184 = arith.constant dense<0.000000e+00> : vector<2x256xf32>
    %437 = tpu.matmul %346, %432, %cst_184 {dimension_numbers = #tpu.dot_dimension_numbers<[1], [0], [0], [1], [0, 0, 1, 1], [], []>} : vector<2x16xf32>, vector<16x256xf32>, vector<2x256xf32> -> vector<2x256xf32>
    %cst_185 = arith.constant dense<0xFF800000> : vector<2xf32>
    %438 = vector.multi_reduction <maximumf>, %437, %cst_185 [1] : vector<2x256xf32> to vector<2xf32>
    %439 = vector.shape_cast %438 : vector<2xf32> to vector<2x1xf32>
    %cst_186 = arith.constant 9.99999974E-6 : f32
    %440 = vector.broadcast %cst_186 : f32 to vector<2x1xf32>
    %441 = arith.addf %439, %440 : vector<2x1xf32>
    %442 = vector.broadcast %441 : vector<2x1xf32> to vector<2x256xf32>
    %443 = arith.divf %437, %442 : vector<2x256xf32>
    %444 = arith.mulf %443, %350 : vector<2x256xf32>
    %cst_187 = arith.constant dense<0.000000e+00> : vector<2xf32>
    %445 = vector.multi_reduction <add>, %444, %cst_187 [1] : vector<2x256xf32> to vector<2xf32>
    %446 = vector.shape_cast %445 : vector<2xf32> to vector<2x1xf32>
    %447 = arith.divf %446, %354 : vector<2x1xf32>
    %448 = arith.mulf %443, %348 : vector<2x256xf32>
    %cst_188 = arith.constant dense<0.000000e+00> : vector<2xf32>
    %449 = vector.multi_reduction <add>, %448, %cst_188 [1] : vector<2x256xf32> to vector<2xf32>
    %450 = vector.shape_cast %449 : vector<2xf32> to vector<2x1xf32>
    %451 = arith.divf %450, %358 : vector<2x1xf32>
    %452 = arith.subf %447, %451 : vector<2x1xf32>
    %453 = arith.mulf %452, %359 : vector<2x1xf32>
    %454 = vector.shape_cast %453 : vector<2x1xf32> to vector<1x2x1xf32>
    %cst_189 = arith.constant dense<0.000000e+00> : vector<1xf32>
    %455 = vector.multi_reduction <add>, %454, %cst_189 [1, 2] : vector<1x2x1xf32> to vector<1xf32>
    %456 = vector.shape_cast %455 : vector<1xf32> to vector<1x1x1xf32>
    %457 = vector.extract %456[0, 0, 0] : f32 from vector<1x1x1xf32>
    %458 = vector.broadcast %457 : f32 to vector<1x1xf32>
    %459 = arith.divf %458, %366 : vector<1x1xf32>
    %460 = arith.addf %413, %459 : vector<1x1xf32>
    %c1_190 = arith.constant 1 : index
    %c0_191 = arith.constant 0 : index
    %461 = memref.load %arg0[%c1_190, %c0_191] : memref<2x1xf32, #tpu.memory_space<smem>>
    %462 = vector.broadcast %461 : f32 to vector<4x256xf32>
    %463 = arith.mulf %333, %462 : vector<4x256xf32>
    %464 = arith.addf %463, %436 : vector<4x256xf32>
    %c0_192 = arith.constant 0 : index
    %c0_193 = arith.constant 0 : index
    %465 = vector.load %arg26[%c0_192, %c0_193] : memref<4x1xf32, #tpu.memory_space<vmem>>, vector<4x1xf32>
    %466 = vector.broadcast %465 : vector<4x1xf32> to vector<4x256xf32>
    %467 = arith.addf %464, %466 : vector<4x256xf32>
    %c1_194 = arith.constant 1 : index
    %c0_195 = arith.constant 0 : index
    %c0_196 = arith.constant 0 : index
    %468 = vector.load %arg13[%c1_194, %c0_195, %c0_196] : memref<2x1x256xf32, #tpu.memory_space<vmem>>, vector<1x1x256xf32>
    %469 = vector.shape_cast %468 : vector<1x1x256xf32> to vector<1x256xf32>
    %470 = vector.broadcast %469 : vector<1x256xf32> to vector<4x256xf32>
    %471 = arith.mulf %467, %470 : vector<4x256xf32>
    %c1_197 = arith.constant 1 : index
    %c0_198 = arith.constant 0 : index
    %c0_199 = arith.constant 0 : index
    %472 = vector.load %arg12[%c1_197, %c0_198, %c0_199] : memref<2x4x256xf32, #tpu.memory_space<vmem>>, vector<1x4x256xf32>
    %473 = vector.shape_cast %472 : vector<1x4x256xf32> to vector<4x256xf32>
    %474 = vector.broadcast %469 : vector<1x256xf32> to vector<4x256xf32>
    %475 = arith.mulf %473, %474 : vector<4x256xf32>
    %476 = arith.subf %471, %475 : vector<4x256xf32>
    %477 = arith.mulf %476, %476 : vector<4x256xf32>
    %478 = vector.shape_cast %477 : vector<4x256xf32> to vector<1x4x256xf32>
    %cst_200 = arith.constant dense<0.000000e+00> : vector<1xf32>
    %479 = vector.multi_reduction <add>, %478, %cst_200 [1, 2] : vector<1x4x256xf32> to vector<1xf32>
    %480 = vector.shape_cast %479 : vector<1xf32> to vector<1x1x1xf32>
    %481 = vector.extract %480[0, 0, 0] : f32 from vector<1x1x1xf32>
    %482 = vector.broadcast %481 : f32 to vector<1x1xf32>
    %483 = arith.addf %328, %482 : vector<1x1xf32>
    %c1_201 = arith.constant 1 : index
    %c0_202 = arith.constant 0 : index
    %c0_203 = arith.constant 0 : index
    %484 = vector.load %arg27[%c1_201, %c0_202, %c0_203] : memref<2x4x256xf32, #tpu.memory_space<vmem>>, vector<1x4x256xf32>
    %485 = vector.shape_cast %484 : vector<1x4x256xf32> to vector<4x256xf32>
    %486 = vector.shape_cast %471 : vector<4x256xf32> to vector<1x4x256xf32>
    tpu.vector_store %arg27[%c1_201, %c0_202, %c0_203], %486 {strides = array<i32>} : memref<2x4x256xf32, #tpu.memory_space<vmem>>, vector<1x4x256xf32>,
    %cst_204 = arith.constant 4.000000e+00 : f32
    %487 = vector.broadcast %cst_204 : f32 to vector<1x1xf32>
    %488 = arith.divf %460, %487 : vector<1x1xf32>
    %c0_205 = arith.constant 0 : index
    %c0_206 = arith.constant 0 : index
    %489 = vector.load %arg28[%c0_205, %c0_206] : memref<1x1xf32, #tpu.memory_space<vmem>>, vector<1x1xf32>
    tpu.vector_store %arg28[%c0_205, %c0_206], %488 {strides = array<i32>} : memref<1x1xf32, #tpu.memory_space<vmem>>, vector<1x1xf32>,
    %cst_207 = arith.constant 2.048000e+03 : f32
    %490 = vector.broadcast %cst_207 : f32 to vector<1x1xf32>
    %491 = arith.divf %483, %490 : vector<1x1xf32>
    %c0_208 = arith.constant 0 : index
    %c0_209 = arith.constant 0 : index
    %492 = vector.load %arg29[%c0_208, %c0_209] : memref<1x1xf32, #tpu.memory_space<vmem>>, vector<1x1xf32>
    tpu.vector_store %arg29[%c0_208, %c0_209], %491 {strides = array<i32>} : memref<1x1xf32, #tpu.memory_space<vmem>>, vector<1x1xf32>,
    return
  }
}

</mosaic_0001>

<bundles_post_ra>
// kernel: tpu_custom_call.1
= control target key start
LH: loop header
LB: loop body
LE: loop exit
PB: predicated region body
PF: predicated region fallthrough
CT: control target
= control target key end

     0   :  { %s4320_s6 = smov 1   ;;  %s4321_s10 = smov 2   ;;  %s5275_s0 = inlined_call_operand.smem [shape: u32[30], index: -1, kind: input, shape index: {}] }
   0x1   :  { %s4389_s5 = sld [smem:[%s5275_s0]]   ;;  %s4322_s14 = smov 3  }
   0x2   :  { %s4394_s9 = sld [smem:[%s5275_s0 + %s4320_s6]]   ;;  %s4323_s18 = smov 4  }
   0x3   :  { %s4399_s13 = sld [smem:[%s5275_s0 + %s4321_s10]]   ;;  %s4324_s22 = smov 5  }
   0x4   :  { %s4404_s17 = sld [smem:[%s5275_s0 + %s4322_s14]]   ;;  %s4325_s26 = smov 6  }
   0x5   :  { %s4409_s21 = sld [smem:[%s5275_s0 + %s4323_s18]]   ;;  %s4326_s30 = smov 7  }
   0x6   :  { %s4414_s25 = sld [smem:[%s5275_s0 + %s4324_s22]]   ;;  %s4327_s4 = smov 8  }
   0x7   :  { %s4419_s29 = sld [smem:[%s5275_s0 + %s4325_s26]]   ;;  %s4328_s10 = smov 9  }
   0x8   :  { %s4424_s3 = sld [smem:[%s5275_s0 + %s4326_s30]]   ;;  %s4329_s15 = smov 10  }
   0x9   :  { %s4429_s8 = sld [smem:[%s5275_s0 + %s4327_s4]]   ;;  %s4330_s20 = smov 11  }
   0xa   :  { %s4434_s14 = sld [smem:[%s5275_s0 + %s4328_s10]]   ;;  %s4331_s26 = smov 12  }
   0xb   :  { %s4439_s19 = sld [smem:[%s5275_s0 + %s4329_s15]]   ;;  %s4332_s1 = smov 13  }
   0xc   :  { %s4444_s24 = sld [smem:[%s5275_s0 + %s4330_s20]]   ;;  %s4333_s7 = smov 14  }
   0xd   :  { %5283 = sst [smem:[#allocation37_spill]] %s4419_s29  ;;  %s4334_s15 = smov 15  }
   0xe   :  { %s4449_s30 = sld [smem:[%s5275_s0 + %s4331_s26]]   ;;  %s4335_s22 = smov 16  }
   0xf   :  { %s4454_s6 = sld [smem:[%s5275_s0 + %s4332_s1]]   ;;  %s4336_s28 = smov 17  }
  0x10   :  { %s4459_s12 = sld [smem:[%s5275_s0 + %s4333_s7]]   ;;  %s4337_s7 = smov 18  }
  0x11   :  { %s4464_s20 = sld [smem:[%s5275_s0 + %s4334_s15]]   ;;  %s4338_s15 = smov 19  }
  0x12   :  { %s4469_s27 = sld [smem:[%s5275_s0 + %s4335_s22]]   ;;  %s4339_s22 = smov 20  }
  0x13   :  { %s4474_s4 = sld [smem:[%s5275_s0 + %s4336_s28]]   ;;  %s4340_s28 = smov 21  }
  0x14   :  { %s4484_s29 = sld [smem:[%s5275_s0 + %s4338_s15]]   ;;  %s4342_s15 = smov 23  }
  0x15   :  { %5284 = sst [smem:[#allocation38_spill]] %s4454_s6 }
  0x16   :  { %s4479_s6 = sld [smem:[%s5275_s0 + %s4337_s7]]   ;;  %s4341_s7 = smov 22  }
  0x18   :  { %5285 = sst [smem:[#allocation39_spill]] %s4469_s27 }
  0x19   :  { %5286 = sst [smem:[#allocation40_spill]] %s4474_s4 }
  0x1a   :  { %5288 = sst [smem:[#allocation42_spill]] %s4484_s29 }
  0x1b   :  { %s4489_s27 = sld [smem:[%s5275_s0 + %s4339_s22]]   ;;  %s4343_s22 = smov 24  }
  0x1c   :  { %5287 = sst [smem:[#allocation41_spill]] %s4479_s6 }
  0x1d   :  { %s4494_s4 = sld [smem:[%s5275_s0 + %s4340_s28]]   ;;  %s4344_s28 = smov 25  }
  0x1e   :  { %s4499_s6 = sld [smem:[%s5275_s0 + %s4341_s7]]   ;;  %s4345_s7 = smov 26  }
  0x1f   :  { %s4504_s29 = sld [smem:[%s5275_s0 + %s4342_s15]]   ;;  %s4346_s15 = smov 27  }
  0x21   :  { %5289 = sst [smem:[#allocation43_spill]] %s4489_s27 }
  0x22   :  { %s4509_s27 = sld [smem:[%s5275_s0 + %s4343_s22]]   ;;  %s4347_s22 = smov 28  }
  0x23   :  { %5290 = sst [smem:[#allocation44_spill]] %s4494_s4 }
  0x24   :  { %5291 = sst [smem:[#allocation45_spill]] %s4499_s6 }
  0x25   :  { %5292 = sst [smem:[#allocation46_spill]] %s4504_s29 }
  0x26   :  { %s4514_s4 = sld [smem:[%s5275_s0 + %s4344_s28]]   ;;  %s4348_s28 = smov 29  }
  0x27   :  { %s4519_s6 = sld [smem:[%s5275_s0 + %s4345_s7]]  }
  0x28   :  { %5293 = sst [smem:[#allocation47_spill]] %s4509_s27 }
  0x29   :  { %s4524_s29 = sld [smem:[%s5275_s0 + %s4346_s15]]  }
  0x2a   :  { %s4529_s27 = sld [smem:[%s5275_s0 + %s4347_s22]]  }
  0x2c   :  { %5294 = sst [smem:[#allocation48_spill]] %s4514_s4 }
  0x2d   :  { %s4534_s4 = sld [smem:[%s5275_s0 + %s4348_s28]]  }
  0x2e   :  { %65 = vsyncpa [#allocation6], 0 }
  0x2f   :  { %66 = vsyncpa [#allocation5], 0 }
  0x30   :  { %67 = vsyncpa [#allocation3], 0 }
  0x31   :  { %68 = vsyncpa [#allocation10], 0 }
  0x32   :  { %69 = vsyncpa [#allocation13], 0 }
  0x33   :  { %70 = vsyncpa [#allocation16], 0 }
  0x34   :  { %71 = vsyncpa [#allocation19], 0 }
  0x35   :  { %72 = vsyncpa [#allocation22], 0 }
  0x36   :  { %73 = vsyncpa [#allocation4], 0 }
  0x37   :  { %74 = vsyncpa [#allocation25], 0  ;;  %s4349_s7 = smov [#allocation9]   ;;  %s3992_s11 = scalar_lea.hbm %s4404_s17, 128 }
  0x38   :  { %s108_s10 = sshll.u32 %s4349_s7, 4  ;;  %p3993_p0 = scmp.ne.s32.totalorder %s4404_s17, %s3992_s11  ;;  %s109_s10 = int_to_ptr.vmem [resolvable:$true] %s108_s10 }
  0x39   :  { %p3996_p1 = scmp.lt.u32.totalorder %s3992_s11, %s4404_s17 }
  0x3b   :  { %p3998_p2 = pnand %p3996_p1, %p3993_p0 }
  0x3d   :  { %4001 = shalt.err (!%p3998_p2)
}
  0x3e   :  { %s4002_s0 = scalar_lea.vmem %s109_s10, 128  ;;  %p4007_p4 = scmp.lt.s32.totalorder %s109_s10, %s109_s10 }
  0x3f   :  { %p4003_p3 = scmp.ne.s32.totalorder %s109_s10, %s4002_s0  ;;  %p4008_p5 = scmp.lt.s32.totalorder %s4002_s0, %s4002_s0 }
  0x41   :  { %p4009_p6 = por %p4008_p5, %p4007_p4 }
  0x43   :  { %p4010_p7 = pnand %p4009_p6, %p4003_p3 }
  0x45   :  { %4013 = shalt.err (!%p4010_p7)
}
  0x46   :  { %s4350_s15 = smov 64   ;;  %s4351_s16 = smov 4  }
  0x47   :  { %114 = dma.hbm_to_vmem [thread:$0]  %s4404_s17, 128, %s109_s10, [#allocation10], %s4350_s15, %s4350_s15, %s4351_s16  }
  0x48   :  { %s4352_s18 = smov [#allocation12]   ;;  %s4014_s23 = scalar_lea.hbm %s4414_s25, 256 }
  0x49   :  { %s132_s22 = sshll.u32 %s4352_s18, 4  ;;  %p4015_p8 = scmp.ne.s32.totalorder %s4414_s25, %s4014_s23  ;;  %s133_s22 = int_to_ptr.vmem [resolvable:$true] %s132_s22 }
  0x4a   :  { %p4018_p9 = scmp.lt.u32.totalorder %s4014_s23, %s4414_s25 }
  0x4c   :  { %p4020_p10 = pnand %p4018_p9, %p4015_p8 }
  0x4e   :  { %4023 = shalt.err (!%p4020_p10)
}
  0x4f   :  { %s4024_s26 = scalar_lea.vmem %s133_s22, 256  ;;  %p4029_p12 = scmp.lt.s32.totalorder %s133_s22, %s133_s22 }
  0x50   :  { %p4025_p11 = scmp.ne.s32.totalorder %s133_s22, %s4024_s26  ;;  %p4030_p13 = scmp.lt.s32.totalorder %s4024_s26, %s4024_s26 }
  0x52   :  { %p4031_p0 = por %p4030_p13, %p4029_p12 }
  0x54   :  { %p4032_p1 = pnand %p4031_p0, %p4025_p11 }
  0x56   :  { %4035 = shalt.err (!%p4032_p1)
}
  0x57   :  { %s4353_s28 = smov 128   ;;  %s4354_s17 = smov 8  }
  0x58   :  { %138 = dma.hbm_to_vmem [thread:$0]  %s4414_s25, 256, %s133_s22, [#allocation13], %s4353_s28, %s4353_s28, %s4354_s17  }
  0x59   :  { %s4355_s1 = smov [#allocation15]   ;;  %s4356_s7 = smov [#allocation18]  }
  0x5a   :  { %s159_s2 = sshll.u32 %s4355_s1, 4  ;;  %s179_s10 = sshll.u32 %s4356_s7, 4  ;;  %s160_s2 = int_to_ptr.vmem [resolvable:$true] %s159_s2  ;;  %s180_s10 = int_to_ptr.vmem [resolvable:$true] %s179_s10 }
  0x5b   :  { %s4036_s11 = scalar_lea.hbm %s4429_s8, 32 }
  0x5c   :  { %p4037_p2 = scmp.ne.s32.totalorder %s4429_s8, %s4036_s11  ;;  %p4040_p3 = scmp.lt.u32.totalorder %s4036_s11, %s4429_s8 }
  0x5e   :  { %p4042_p4 = pnand %p4040_p3, %p4037_p2 }
  0x60   :  { %4045 = shalt.err (!%p4042_p4)
}
  0x61   :  { %s4046_s0 = scalar_lea.vmem %s160_s2, 32  ;;  %p4051_p6 = scmp.lt.s32.totalorder %s160_s2, %s160_s2 }
  0x62   :  { %p4047_p5 = scmp.ne.s32.totalorder %s160_s2, %s4046_s0  ;;  %p4052_p7 = scmp.lt.s32.totalorder %s4046_s0, %s4046_s0 }
  0x64   :  { %p4053_p8 = por %p4052_p7, %p4051_p6 }
  0x66   :  { %p4054_p9 = pnand %p4053_p8, %p4047_p5 }
  0x68   :  { %4057 = shalt.err (!%p4054_p9)
}
  0x69   :  { %162 = dma.hbm_to_vmem [thread:$0]  %s4429_s8, 32, %s160_s2, [#allocation16]  }
  0x6a   :  { %s4058_s25 = scalar_lea.hbm %s4439_s19, 32 }
  0x6b   :  { %p4059_p10 = scmp.ne.s32.totalorder %s4439_s19, %s4058_s25  ;;  %p4062_p11 = scmp.lt.u32.totalorder %s4058_s25, %s4439_s19 }
  0x6d   :  { %p4064_p12 = pnand %p4062_p11, %p4059_p10 }
  0x6f   :  { %4067 = shalt.err (!%p4064_p12)
}
  0x70   :  { %s4068_s18 = scalar_lea.vmem %s180_s10, 32  ;;  %p4073_p0 = scmp.lt.s32.totalorder %s180_s10, %s180_s10 }
  0x71   :  { %p4069_p13 = scmp.ne.s32.totalorder %s180_s10, %s4068_s18  ;;  %p4074_p1 = scmp.lt.s32.totalorder %s4068_s18, %s4068_s18 }
  0x73   :  { %p4075_p2 = por %p4074_p1, %p4073_p0 }
  0x75   :  { %p4076_p3 = pnand %p4075_p2, %p4069_p13 }
  0x77   :  { %4079 = shalt.err (!%p4076_p3)
}
  0x78   :  { %182 = dma.hbm_to_vmem [thread:$0]  %s4439_s19, 32, %s180_s10, [#allocation19]  }
  0x79   :  { %s81_s22 = sshll.u32 %s4389_s5, 4  ;;  %s82_s22 = int_to_ptr.vmem [resolvable:$true] %s81_s22 }
  0x7a   :  { %s4080_s23 = scalar_lea.vmem %s82_s22, 32  ;;  %p4085_p5 = scmp.lt.s32.totalorder %s82_s22, %s82_s22 }
  0x7b   :  { %p4081_p4 = scmp.ne.s32.totalorder %s82_s22, %s4080_s23  ;;  %p4086_p6 = scmp.lt.s32.totalorder %s4080_s23, %s4080_s23 }
  0x7d   :  { %p4087_p7 = por %p4086_p6, %p4085_p5 }
  0x7f   :  { %p4088_p8 = pnand %p4087_p7, %p4081_p4 }
  0x81   :  { %4091 = shalt.err (!%p4088_p8)
}
  0x82   :  { %s4357_s8 = smov [#allocation2]   ;;  %s4092_s26 = scalar_lea.hbm %s4394_s9, 32 }
  0x83   :  { %84 = dma.vmem_to_smem %s82_s22, 32, %s4357_s8, [#allocation6]  }
  0x84   :  { %p4093_p9 = scmp.ne.s32.totalorder %s4394_s9, %s4092_s26  ;;  %p4096_p10 = scmp.lt.u32.totalorder %s4092_s26, %s4394_s9 }
  0x86   :  { %p4098_p11 = pnand %p4096_p10, %p4093_p9 }
  0x88   :  { %4101 = shalt.err (!%p4098_p11)
}
  0x89   :  { %s4358_s19 = smov [#allocation7]   ;;  %s4359_s5 = smov [#allocation8]  }
  0x8a   :  { %92 = dma.hbm_to_smem %s4394_s9, 32, %s4358_s19, [#allocation5]  }
  0x8b   :  { %s99_s1 = sshll.u32 %s4359_s5, 4  ;;  %s4360_s2 = smov [#allocation11]   ;;  %s100_s1 = int_to_ptr.vmem [resolvable:$true] %s99_s1 }
  0x8c   :  { %s120_s7 = sshll.u32 %s4360_s2, 4  ;;  %s4102_s10 = scalar_lea.hbm %s4399_s13, 32  ;;  %s4563_s7 = int_to_ptr.vmem [resolvable:$true] %s120_s7 }
  0x8d   :  { %p4103_p12 = scmp.ne.s32.totalorder %s4399_s13, %s4102_s10  ;;  %p4106_p13 = scmp.lt.u32.totalorder %s4102_s10, %s4399_s13 }
  0x8f   :  { %p4108_p0 = pnand %p4106_p13, %p4103_p12 }
  0x91   :  { %4111 = shalt.err (!%p4108_p0)
}
  0x92   :  { %s4112_s11 = scalar_lea.vmem %s100_s1, 32  ;;  %p4117_p2 = scmp.lt.s32.totalorder %s100_s1, %s100_s1 }
  0x93   :  { %p4113_p1 = scmp.ne.s32.totalorder %s100_s1, %s4112_s11  ;;  %p4118_p3 = scmp.lt.s32.totalorder %s4112_s11, %s4112_s11 }
  0x95   :  { %p4119_p4 = por %p4118_p3, %p4117_p2 }
  0x97   :  { %p4120_p5 = pnand %p4119_p4, %p4113_p1 }
  0x99   :  { %4123 = shalt.err (!%p4120_p5)
}
  0x9a   :  { %102 = dma.hbm_to_vmem [thread:$0]  %s4399_s13, 32, %s100_s1, [#allocation3]  }
  0x9b   :  { %s4124_s9 = scalar_lea.hbm %s4409_s21, 256 }
  0x9c   :  { %p4125_p6 = scmp.ne.s32.totalorder %s4409_s21, %s4124_s9  ;;  %p4128_p7 = scmp.lt.u32.totalorder %s4124_s9, %s4409_s21 }
  0x9e   :  { %p4130_p8 = pnand %p4128_p7, %p4125_p6 }
  0xa0   :  { %4133 = shalt.err (!%p4130_p8)
}
  0xa1   :  { %s4134_s0 = scalar_lea.vmem %s4563_s7, 256  ;;  %p4139_p10 = scmp.lt.s32.totalorder %s4563_s7, %s4563_s7 }
  0xa2   :  { %p4135_p9 = scmp.ne.s32.totalorder %s4563_s7, %s4134_s0  ;;  %p4140_p11 = scmp.lt.s32.totalorder %s4134_s0, %s4134_s0 }
  0xa4   :  { %p4141_p12 = por %p4140_p11, %p4139_p10 }
  0xa6   :  { %p4142_p13 = pnand %p4141_p12, %p4135_p9 }
  0xa8   :  { %4145 = shalt.err (!%p4142_p13)
}
  0xa9   :  { %126 = dma.hbm_to_vmem [thread:$0]  %s4409_s21, 256, %s4563_s7, [#allocation10], %s4350_s15, %s4350_s15, %s4351_s16  }
  0xaa   :  { %s4361_s13 = smov [#allocation14]   ;;  %s4362_s18 = smov [#allocation17]  }
  0xab   :  { %s146_s25 = sshll.u32 %s4361_s13, 4  ;;  %s169_s22 = sshll.u32 %s4362_s18, 4  ;;  %s147_s25 = int_to_ptr.vmem [resolvable:$true] %s146_s25  ;;  %s170_s22 = int_to_ptr.vmem [resolvable:$true] %s169_s22 }
  0xac   :  { %s4146_s23 = scalar_lea.hbm %s4424_s3, 256 }
  0xad   :  { %p4147_p0 = scmp.ne.s32.totalorder %s4424_s3, %s4146_s23  ;;  %p4150_p1 = scmp.lt.u32.totalorder %s4146_s23, %s4424_s3 }
  0xaf   :  { %p4152_p2 = pnand %p4150_p1, %p4147_p0 }
  0xb1   :  { %4155 = shalt.err (!%p4152_p2)
}
  0xb2   :  { %s4156_s8 = scalar_lea.vmem %s147_s25, 256  ;;  %p4161_p4 = scmp.lt.s32.totalorder %s147_s25, %s147_s25 }
  0xb3   :  { %p4157_p3 = scmp.ne.s32.totalorder %s147_s25, %s4156_s8  ;;  %p4162_p5 = scmp.lt.s32.totalorder %s4156_s8, %s4156_s8 }
  0xb5   :  { %p4163_p6 = por %p4162_p5, %p4161_p4 }
  0xb7   :  { %p4164_p7 = pnand %p4163_p6, %p4157_p3 }
  0xb9   :  { %4167 = shalt.err (!%p4164_p7)
}
  0xba   :  { %152 = dma.hbm_to_vmem [thread:$0]  %s4424_s3, 256, %s147_s25, [#allocation13], %s4353_s28, %s4353_s28, %s4354_s17  }
  0xbb   :  { %s4168_s21 = scalar_lea.hbm %s4434_s14, 32 }
  0xbc   :  { %p4169_p8 = scmp.ne.s32.totalorder %s4434_s14, %s4168_s21  ;;  %p4172_p9 = scmp.lt.u32.totalorder %s4168_s21, %s4434_s14 }
  0xbe   :  { %p4174_p10 = pnand %p4172_p9, %p4169_p8 }
  0xc0   :  { %4177 = shalt.err (!%p4174_p10)
}
  0xc1   :  { %s4178_s26 = scalar_lea.vmem %s170_s22, 32  ;;  %p4183_p12 = scmp.lt.s32.totalorder %s170_s22, %s170_s22 }
  0xc2   :  { %p4179_p11 = scmp.ne.s32.totalorder %s170_s22, %s4178_s26  ;;  %p4184_p13 = scmp.lt.s32.totalorder %s4178_s26, %s4178_s26 }
  0xc4   :  { %p4185_p0 = por %p4184_p13, %p4183_p12 }
  0xc6   :  { %p4186_p1 = pnand %p4185_p0, %p4179_p11 }
  0xc8   :  { %4189 = shalt.err (!%p4186_p1)
}
  0xc9   :  { %172 = dma.hbm_to_vmem [thread:$0]  %s4434_s14, 32, %s170_s22, [#allocation16]  }
  0xca   :  { %s4363_s19 = smov [#allocation20]   ;;  %s4364_s3 = smov [#allocation21]  }
  0xcb   :  { %s188_s5 = sshll.u32 %s4363_s19, 4  ;;  %s200_s1 = sshll.u32 %s4364_s3, 4  ;;  %s189_s5 = int_to_ptr.vmem [resolvable:$true] %s188_s5  ;;  %s4592_s1 = int_to_ptr.vmem [resolvable:$true] %s200_s1 }
  0xcc   :  { %s4190_s2 = scalar_lea.hbm %s4444_s24, 128 }
  0xcd   :  { %p4191_p2 = scmp.ne.s32.totalorder %s4444_s24, %s4190_s2  ;;  %p4194_p3 = scmp.lt.u32.totalorder %s4190_s2, %s4444_s24 }
  0xcf   :  { %p4196_p4 = pnand %p4194_p3, %p4191_p2 }
  0xd1   :  { %4199 = shalt.err (!%p4196_p4)
}
  0xd2   :  { %s4200_s7 = scalar_lea.vmem %s189_s5, 128  ;;  %p4205_p6 = scmp.lt.s32.totalorder %s189_s5, %s189_s5 }
  0xd3   :  { %p4201_p5 = scmp.ne.s32.totalorder %s189_s5, %s4200_s7  ;;  %p4206_p7 = scmp.lt.s32.totalorder %s4200_s7, %s4200_s7 }
  0xd5   :  { %p4207_p8 = por %p4206_p7, %p4205_p6 }
  0xd7   :  { %p4208_p9 = pnand %p4207_p8, %p4201_p5 }
  0xd9   :  { %4211 = shalt.err (!%p4208_p9)
}
  0xda   :  { %194 = dma.hbm_to_vmem [thread:$0]  %s4444_s24, 128, %s189_s5, [#allocation19], %s4350_s15, %s4350_s15, %s4351_s16  }
  0xdb   :  { %s4212_s14 = scalar_lea.hbm %s4449_s30, 256 }
  0xdc   :  { %p4213_p10 = scmp.ne.s32.totalorder %s4449_s30, %s4212_s14  ;;  %p4216_p11 = scmp.lt.u32.totalorder %s4212_s14, %s4449_s30 }
  0xde   :  { %p4218_p12 = pnand %p4216_p11, %p4213_p10 }
  0xe0   :  { %4221 = shalt.err (!%p4218_p12)
}
  0xe1   :  { %s4222_s10 = scalar_lea.vmem %s4592_s1, 256  ;;  %p4227_p0 = scmp.lt.s32.totalorder %s4592_s1, %s4592_s1 }
  0xe2   :  { %p4223_p13 = scmp.ne.s32.totalorder %s4592_s1, %s4222_s10  ;;  %p4228_p1 = scmp.lt.s32.totalorder %s4222_s10, %s4222_s10 }
  0xe4   :  { %p4229_p2 = por %p4228_p1, %p4227_p0 }
  0xe6   :  { %p4230_p3 = pnand %p4229_p2, %p4223_p13 }
  0xe8   :  { %4233 = shalt.err (!%p4230_p3)
}
  0xe9   :  { %206 = dma.hbm_to_vmem [thread:$0]  %s4449_s30, 256, %s4592_s1, [#allocation22], %s4353_s28, %s4353_s28, %s4354_s17  }
  0xea   :  { %4300 = dma.done.wait [#allocation6], 32  }
  0xeb   :  { %4301 = vsyncadd [#allocation6], 4294967264 }
  0xec   :  { %4302 = dma.done.wait [#allocation5], 32  }
  0xed   :  { %4303 = vsyncadd [#allocation5], 4294967264 }
  0xee   :  { %4304 = dma.done.wait [#allocation3], 32  }
  0xef   :  { %4305 = vsyncadd [#allocation3], 4294967264 }
  0xf0   :  { %4306 = dma.done.wait [#allocation10], 384  }
  0xf1   :  { %4307 = vsyncadd [#allocation10], 4294966912 }
  0xf2   :  { %4308 = dma.done.wait [#allocation13], 512  }
  0xf3   :  { %4309 = vsyncadd [#allocation13], 4294966784 }
  0xf4   :  { %4310 = dma.done.wait [#allocation16], 64  }
  0xf5   :  { %4311 = vsyncadd [#allocation16], 4294967232 }
  0xf6   :  { %4312 = dma.done.wait [#allocation19], 160  }
  0xf7   :  { %4313 = vsyncadd [#allocation19], 4294967136 }
  0xf8   :  { %4314 = dma.done.wait [#allocation22], 256  }
  0xf9   :  { %4315 = vsyncadd [#allocation22], 4294967040 }
  0xfa   :  { %271 = sfence }
  0xfb   :  { %v310_v0 = vld [vmem:[%s4464_s20] sm:$0xff]  ;;  %v311_v1 = vld [vmem:[%s4464_s20 + $0x8] sm:$0xff]  ;;  %v4365_v3 = vmov 0.0|0.0   ;;  %v312_v6 = vld [vmem:[%s4464_s20 + $0x10] sm:$0xff]  ;;  %vm4366_vm0 = vmmov 0   ;;  %v4367_v11 = vmov 0.0  }
  0xfc   :  { %v302_v2 = vld [vmem:[%s4459_s12] sm:$0xff]  ;;  %3716 = vmatprep.subr.bf16.mxu0 %v4365_v3  ;;  %3728 = vmatprep.subr.bf16.mxu1 %v4365_v3  ;;  %v3717_v4 = vpack.c.bf16 %v311_v1, %v310_v0  ;;  %v303_v5 = vld [vmem:[%s4459_s12 + $0x8] sm:$0xff]  ;;  %v313_v7 = vld [vmem:[%s4464_s20 + $0x18] sm:$0xff]  ;;  %vm283_vm1 = vcmask 519168   ;;  %s5295_s24 = sld [smem:[#allocation40_spill]]  ;;  %vm322_vm2 = vcmask 523264  }
  0xfd   :  { %v3729_v8 = vpack.c.bf16 %v303_v5, %v302_v2  ;;  %v304_v9 = vld [vmem:[%s4459_s12 + $0x10] sm:$0xff]  ;;  %v305_v10 = vld [vmem:[%s4459_s12 + $0x18] sm:$0xff]  ;;  %3650 = vmatprep.mubr.msk.f32.mxu0 %vm4366_vm0, %v4367_v11  ;;  %3669 = vmatprep.mubr.msk.f32.mxu1 %vm4366_vm0, %v4367_v11  ;;  %v3720_v12 = vpack.c.bf16 %v313_v7, %v312_v6  ;;  %v314_v14 = vld [vmem:[%s4464_s20 + $0x20] sm:$0xff]  ;;  %vm320_vm3 = vcmask 1041409   ;;  %s5296_s30 = sld [smem:[#allocation42_spill]]  ;;  %vm532_vm4 = vcmask 1042434  }
  0xfe   :  { %3718 = vmatpush3.bf16.msra.mxu0 %v3717_v4  ;;  %v3732_v13 = vpack.c.bf16 %v305_v10, %v304_v9  ;;  %v315_v15 = vld [vmem:[%s4464_s20 + $0x28] sm:$0xff]  ;;  %v306_v16 = vld [vmem:[%s4459_s12 + $0x20] sm:$0xff]  ;;  %v281_v18 = vld [vmem:[#allocation9] sm:$0xf]  ;;  %vm534_vm5 = vcmask 1043459   ;;  %s4368_s15 = smov 32  }
  0xff   :  { %3730 = vmatpush3.bf16.msra.mxu1 %v3729_v8  ;;  %3719 = vmatprep.subr.bf16.mxu0 %v4365_v3  ;;  %v307_v17 = vld [vmem:[%s4459_s12 + $0x28] sm:$0xff]  ;;  %v282_v19 = vld [vmem:[#allocation9 + $0x4] sm:$0xf]  ;;  %v284_v20 = vsel %vm283_vm1, %v281_v18, 0.0  ;;  %v3723_v22 = vpack.c.bf16 %v315_v15, %v314_v14  ;;  %v316_v26 = vld [vmem:[%s4464_s20 + $0x30] sm:$0xff]  ;;  %s5299_s16 = sld [smem:[#allocation37_spill]] }
 0x100   :  { %3731 = vmatprep.subr.bf16.mxu1 %v4365_v3  ;;  %v291_v21 = vsel %vm283_vm1, %v282_v19, 0.0  ;;  %v285_v23 = vrot.slane %v284_v20, 4  ;;  %v3735_v25 = vpack.c.bf16 %v307_v17, %v306_v16  ;;  %v317_v27 = vld [vmem:[%s4464_s20 + $0x38] sm:$0xff]  ;;  %v308_v28 = vld [vmem:[%s4459_s12 + $0x30] sm:$0xff]  ;;  %v476_v58 = vld [vmem:[#allocation11] sm:$0xf] }
 0x101   :  { %v292_v24 = vrot.slane %v291_v21, 4  ;;  %v309_v29 = vld [vmem:[%s4459_s12 + $0x38] sm:$0xff]  ;;  %v3726_v32 = vpack.c.bf16 %v317_v27, %v316_v26  ;;  %v477_v59 = vld [vmem:[#allocation11 + $0x4] sm:$0xf]  ;;  %v480_v60 = vsel %vm283_vm1, %v476_v58, 0.0  ;;  %s5297_s12 = sld [smem:[#allocation39_spill]] }
 0x102   :  { %3721 = vmatpush3.bf16.msra.mxu0 %v3720_v12  ;;  %v286_v30 = vadd.f32 %v285_v23, %v284_v20  ;;  %v3738_v35 = vpack.c.bf16 %v309_v29, %v308_v28  ;;  %v301_v40 = vld [vmem:[#allocation8] sm:$0x3]  ;;  %v512_v41 = vld [vmem:[%s5295_s24] sm:$0xff]  ;;  %v513_v42 = vld [vmem:[%s5295_s24 + $0x8] sm:$0xff]  ;;  %v487_v61 = vsel %vm283_vm1, %v477_v59, 0.0  ;;  %v481_v62 = vrot.slane %v480_v60, 4 }
 0x103   :  { %3733 = vmatpush3.bf16.msra.mxu1 %v3732_v13  ;;  %3722 = vmatprep.subr.bf16.mxu0 %v4365_v3  ;;  %v293_v31 = vadd.f32 %v292_v24, %v291_v21  ;;  %v3741_v47 = vpack.c.bf16 %v513_v42, %v512_v41  ;;  %v514_v48 = vld [vmem:[%s5295_s24 + $0x10] sm:$0xff]  ;;  %v515_v49 = vld [vmem:[%s5295_s24 + $0x18] sm:$0xff]  ;;  %v516_v52 = vld [vmem:[%s5295_s24 + $0x20] sm:$0xff]  ;;  %v488_v63 = vrot.slane %v487_v61, 4  ;;  %s5298_s20 = sld [smem:[#allocation41_spill]]  ;;  %vm628_vm7 = vcmask 261120  }
 0x104   :  { %3734 = vmatprep.subr.bf16.mxu1 %v4365_v3  ;;  %v287_v33 = vrot.slane %v286_v30, 2  ;;  %v3744_v51 = vpack.c.bf16 %v515_v49, %v514_v48  ;;  %v517_v53 = vld [vmem:[%s5295_s24 + $0x28] sm:$0xff]  ;;  %v518_v55 = vld [vmem:[%s5295_s24 + $0x30] sm:$0xff]  ;;  %v519_v56 = vld [vmem:[%s5295_s24 + $0x38] sm:$0xff]  ;;  %v482_v0 = vadd.f32 %v481_v62, %v480_v60  ;;  %s5300_s11 = sld [smem:[#allocation44_spill]]  ;;  %s5301_s9 = sld [smem:[#allocation46_spill]] }
 0x105   :  { %v294_v34 = vrot.slane %v293_v31, 2  ;;  %v3747_v54 = vpack.c.bf16 %v517_v53, %v516_v52  ;;  %v3750_v57 = vpack.c.bf16 %v519_v56, %v518_v55  ;;  %v489_v1 = vadd.f32 %v488_v63, %v487_v61  ;;  %v478_v7 = vld [vmem:[#allocation11 + $0x8] sm:$0xf]  ;;  %v479_v10 = vld [vmem:[#allocation11 + $0xc] sm:$0xf]  ;;  %v620_v61 = vld [vmem:[%s5296_s30 + $0x18] sm:$0xff] }
 0x106   :  { %3724 = vmatpush3.bf16.msra.mxu0 %v3723_v22  ;;  %v288_v36 = vadd.f32 %v287_v33, %v286_v30  ;;  %v483_v2 = vrot.slane %v482_v0, 2  ;;  %v494_v12 = vsel %vm283_vm1, %v478_v7, 0.0  ;;  %v501_v14 = vsel %vm283_vm1, %v479_v10, 0.0  ;;  %v619_v60 = vld [vmem:[%s5296_s30 + $0x10] sm:$0xff]  ;;  %v4707_v7 = vld [vmem:[%s5299_s16] sm:$0xff]  ;;  %s5302_s0 = sld [smem:[#allocation45_spill]] }
 0x107   :  { %3736 = vmatpush3.bf16.msra.mxu1 %v3735_v25  ;;  %3725 = vmatprep.subr.bf16.mxu0 %v4365_v3  ;;  %v295_v37 = vadd.f32 %v294_v34, %v293_v31  ;;  %v490_v4 = vrot.slane %v489_v1, 2  ;;  %v495_v13 = vrot.slane %v494_v12, 4  ;;  %v502_v15 = vrot.slane %v501_v14, 4  ;;  %s5303_s13 = sld [smem:[#allocation43_spill]]  ;;  %s702_s25 = sld [smem:[#allocation7]] }
 0x108   :  { %3737 = vmatprep.subr.bf16.mxu1 %v4365_v3  ;;  %v289_v38 = vrot.slane %v288_v36, 1  ;;  %v484_v5 = vadd.f32 %v483_v2, %v482_v0  ;;  %v3756_v62 = vpack.c.bf16 %v620_v61, %v619_v60  ;;  %vm1016_vm10 = vcmask 1043456   ;;  %s3546_s18 = sld [smem:[#allocation7 + $0x1]]  ;;  %s3547_s8 = sld [smem:[#allocation7 + $0x80]] }
 0x109   :  { %v296_v39 = vrot.slane %v295_v37, 1  ;;  %v491_v6 = vadd.f32 %v490_v4, %v489_v1  ;;  %v496_v16 = vadd.f32 %v495_v13, %v494_v12  ;;  %v503_v19 = vadd.f32 %v502_v15, %v501_v14  ;;  %s3548_s21 = sld [smem:[#allocation7 + $0x81]]  ;;  %s5304_s5 = sld [smem:[#allocation47_spill]] }
 0x10a   :  { %3727 = vmatpush3.bf16.msra.mxu0 %v3726_v32  ;;  %v290_v43 = vadd.f32 %v289_v38, %v288_v36  ;;  %v485_v8 = vrot.slane %v484_v5, 1  ;;  %v617_v36 = vld [vmem:[%s5296_s30] sm:$0xff]  ;;  %v4369_v1 = vmov 0   ;;  %v836_v13 = vld [vmem:[%s5301_s9 + $0x8] sm:$0xff]  ;;  %v837_v14 = vld [vmem:[%s5301_s9 + $0x10] sm:$0xff]  ;;  %vm1003_vm12 = vcmask 31744  }
 0x10b   :  { %3739 = vmatpush3.bf16.msra.mxu1 %v3738_v35  ;;  %3740 = vmatprep.subr.bf16.mxu0 %v4365_v3  ;;  %v297_v44 = vadd.f32 %v296_v39, %v295_v37  ;;  %v492_v9 = vrot.slane %v491_v6, 1  ;;  %v497_v20 = vrot.slane %v496_v16, 2  ;;  %v504_v21 = vrot.slane %v503_v19, 2  ;;  %v618_v37 = vld [vmem:[%s5296_s30 + $0x8] sm:$0xff]  ;;  %v944_v10 = vld [vmem:[%s5300_s11] sm:$0xf] }
 0x10c   :  { %3752 = vmatprep.subr.bf16.mxu1 %v4365_v3  ;;  %v299_v45 = vmul.f32 0.25, %v290_v43  ;;  %v486_v17 = vadd.f32 %v485_v8, %v484_v5  ;;  %v272_v35 = vlaneseq  ;;  %v3541_v43 = vld [vmem:[%s5297_s12] ss:$0 sm:$0xff]  ;;  %3911 = vset.pattern.permute.xlu1 %v4369_v1  ;;  %v943_v8 = vld [vmem:[#allocation14] sm:$0xff]  ;;  %s4371_s3 = smov 112   ;;  %s4372_s1 = smov 96  }
 0x10d   :  { %v300_v46 = vmul.f32 0.25, %v297_v44  ;;  %v493_v18 = vadd.f32 %v492_v9, %v491_v6  ;;  %v498_v22 = vadd.f32 %v497_v20, %v496_v16  ;;  %v505_v25 = vadd.f32 %v504_v21, %v503_v19  ;;  %v835_v12 = vld [vmem:[%s5301_s9] sm:$0xff]  ;;  %v838_v16 = vld [vmem:[%s5301_s9 + $0x18] sm:$0xff]  ;;  %s706_s22 = sadd.f32 1e-05, %s702_s25  ;;  %v4770_v60 = vld [vmem:[%s5302_s0 + $0x8] sm:$0xff] }
 0x10e   :  { %3670 = vmatmul.mubr.msk.f32.vlgmr.msra.gmra.mrb[0].mxu1 %vm322_vm2, %v301_v40  ;;  %v508_v23 = vmul.f32 0.25, %v486_v17  ;;  %v4673_v38 = vshrl.u32 %v272_v35, 7  ;;  %v3753_v40 = vpack.c.bf16 %v618_v37, %v617_v36  ;;  %v1002_v9 = vcombine.high %v943_v8, %v943_v8  ;;  %v3544_v21 = vld [vmem:[%s5303_s13] ss:$0 sm:$0xff]  ;;  %s779_s26 = sadd.f32 1e-05, %s3547_s8 }
 0x10f   :  { %3699 = vmatprep.mubr.msk.f32.mxu1 %vm4366_vm0, %v4367_v11  ;;  %v321_v50 = vsel %vm320_vm3, %v300_v46, %v299_v45  ;;  %v509_v24 = vmul.f32 0.25, %v493_v18  ;;  %v499_v26 = vrot.slane %v498_v22, 1  ;;  %v506_v27 = vrot.slane %v505_v25, 1  ;;  %v4718_v18 = vld [vmem:[%s5302_s0 + $0x18] sm:$0xff]  ;;  %s714_s23 = sadd.f32 %s3546_s18, %s706_s22  ;;  %s4373_s2 = smov 80  }
 0x110   :  { %3651 = vmatmul.mubr.msk.f32.vlgmr.msra.gmra.mrb[0].mxu0 %vm322_vm2, %v321_v50  ;;  %3754 = vmatpush3.bf16.msra.mxu1 %v3753_v40  ;;  %v4678_v45 = vsub.s32 0, %v4673_v38  ;;  %vm731_vm6 = vcmp.eq.s32.totalorder %v4673_v38, 0  ;;  %vm739_vm8 = vcmp.eq.s32.totalorder %v4673_v38, 1  ;;  %vm747_vm9 = vcmp.eq.s32.totalorder %v4673_v38, 2  ;;  %s787_s19 = sadd.f32 %s3548_s21, %s779_s26  ;;  %s5305_s7 = sld [smem:[#allocation48_spill]] }
 0x111   :  { %3742 = vmatpush3.bf16.msra.mxu0 %v3741_v47  ;;  %3688 = vmatprep.mubr.msk.f32.mxu0 %vm4366_vm0, %v4367_v11  ;;  %v500_v28 = vadd.f32 %v499_v26, %v498_v22  ;;  %v531_v29 = vsel %vm320_vm3, %v509_v24, %v508_v23  ;;  %v507_v30 = vadd.f32 %v506_v27, %v505_v25  ;;  %v715_v23 = vstv %s714_s23  ;;  %s2135_s14 = sld [smem:[#allocation2]]  ;;  %s5306_s10 = sld [smem:[#allocation38_spill]] }
 0x112   :  { %3743 = vmatprep.subr.bf16.mxu0 %v4365_v3  ;;  %3755 = vmatprep.subr.bf16.mxu1 %v4365_v3  ;;  %v3758_v15 = vpack.c.bf16 %v836_v13, %v835_v12  ;;  %v3762_v17 = vpack.c.bf16 %v838_v16, %v837_v14  ;;  %v708_v24 = vstv %s3546_s18  ;;  %v4725_v25 = vsub.s32 1, %v4673_v38  ;;  %s4377_s24 = smov 127   ;;  %s4378_s30 = smov [#allocation23]  }
 0x113   :  { %v510_v31 = vmul.f32 0.25, %v500_v28  ;;  %v511_v32 = vmul.f32 0.25, %v507_v30  ;;  %vm755_vm11 = vcmp.eq.s32.totalorder %v4673_v38, 3  ;;  %v703_v27 = vstv %s702_s25  ;;  %s3464_s12 = sshll.u32 %s4378_s30, 4  ;;  %s3465_s12 = int_to_ptr.vmem [resolvable:$true] %s3464_s12 }
 0x114   :  { %3757 = vmatpush3.bf16.msra.mxu1 %v3756_v62  ;;  %v776_v14 = vstv %s3547_s8  ;;  %vm1168_vm13 = vcmask 130048   ;;  %vm1130_vm0 = vcmask 1041408   ;;  %p4239_p5 = scmp.lt.s32.totalorder %s3465_s12, %s3465_s12 }
 0x115   :  { %3745 = vmatpush3.bf16.msra.mxu0 %v3744_v51  ;;  %v533_v33 = vsel %vm532_vm4, %v510_v31, %v531_v29  ;;  %3759 = vmatprep.subr.bf16.mxu1 %v3758_v15 }
 0x116   :  { %3746 = vmatprep.subr.bf16.mxu0 %v4365_v3  ;;  %v535_v34 = vsel %vm534_vm5, %v511_v32, %v533_v33 }
 0x119   :  { %3748 = vmatpush3.bf16.msra.mxu0 %v3747_v54 }
 0x11a   :  { %3749 = vmatprep.subr.bf16.mxu0 %v4365_v3  ;;  %v3542_v3 = vld [vmem:[%s5298_s20] ss:$0 sm:$0xff]  ;;  %s4234_s20 = scalar_lea.vmem %s3465_s12, 256 }
 0x11b   :  { %p4235_p4 = scmp.ne.s32.totalorder %s3465_s12, %s4234_s20  ;;  %p4240_p6 = scmp.lt.s32.totalorder %s4234_s20, %s4234_s20 }
 0x11d   :  { %3751 = vmatpush3.bf16.msra.mxu0 %v3750_v57  ;;  %p4241_p7 = por %p4240_p6, %p4239_p5 }
 0x11e   :  { %3554 = vmatprep.subr.msk.mxu0 %vm1016_vm10, %v1002_v9  ;;  %v781_v9 = vstv %s3548_s21 }
 0x11f   :  { %p4242_p8 = pnand %p4241_p7, %p4235_p4 }
 0x120   :  { %3689 = vmatmul.mubr.msk.f32.vlgmr.msra.gmra.mrb[2].mxu0 %vm322_vm2, %v535_v34  ;;  %vm1155_vm2 = vcmask 1024  }
 0x121   :  { %1085 = vmatprep.mubr.f32.mxu0 %v4367_v11  ;;  %3555 = vmatpush1.msk.msra.mxu0 %vm1016_vm10, %v943_v8  ;;  %v788_v8 = vstv %s787_s19 }
 0x1e1   :  { %v464_v39 = vpop.f32.mrb[0].mxu1 }
 0x1e2   :  { %v3671_v41 = vpop.f32.mrb[1].mxu1 }
 0x1e3   :  { %v391_v42 = vpop.f32.mrb[0].mxu0 }
 0x1e4   :  { %v465_v44 = vadd.f32 %v464_v39, %v391_v42  ;;  %v3652_v46 = vpop.f32.mrb[1].mxu0  ;;  %v767_v39 = vld [vmem:[#allocation15] sm:$0x1] }
 0x1e5   :  { %v768_v40 = vmul.f32 0.1, %v767_v39 }
 0x1e6   :  { %v4680_v47 = vadd.f32 %v3541_v43, %v465_v44  ;;  %v718_v43 = vld [vmem:[#allocation12] sm:$0xff] }
 0x1e7   :  { %v772_v44 = vrot.slane %v768_v40, %v4678_v45 }
 0x1e8   :  { %v4685_v48 = vrot.slane %v4680_v47, %v4678_v45  ;;  %v4731_v29 = vrot.slane %v4680_v47, %v4725_v25 }
 0x1ea   :  { %v738_v49 = vsel %vm731_vm6, %v4685_v48, 0.0  ;;  %v807_v33 = vsel %vm731_vm6, %v4731_v29, 0.0 }
 0x1eb   :  { %743 = vrot.lane.b32.xlu0 %v738_v49, %s4368_s15 }
 0x1f3   :  { %v604_v50 = vpop.f32.mrb[2].mxu0 }
 0x1f4   :  { %v605_v51 = vadd.f32 %v3542_v3, %v604_v50  ;;  %v3690_v52 = vpop.f32.mrb[3].mxu0 }
 0x1f5   :  { %v4370_v52 = vmov 1  }
 0x1f6   :  { %v608_v53 = vmul.f32 %v605_v51, %v605_v51  ;;  %3912 = vset.pattern.permute.xlu0 %v4370_v52 }
 0x1f8   :  { %v609_v54 = vmul.f32 %v608_v53, %v605_v51 }
 0x1fa   :  { %v610_v55 = vmul.f32 0.044715, %v609_v54 }
 0x1fc   :  { %v611_v56 = vadd.f32 %v610_v55, %v605_v51 }
 0x1fe   :  { %v612_v57 = vmul.f32 0.7978846, %v611_v56 }
 0x200   :  { %3917 = vtanh.f32 %v612_v57 }
 0x201   :  { %3919 = vrcp.f32 %v715_v23  ;;  %v4792_v23 = vld [vmem:[%s5304_s5] ss:$0 sm:$0xff] }
 0x202   :  { %3921 = vrcp.f32 %v788_v8  ;;  %v4849_v8 = vld [vmem:[%s5305_s7 + $0x8] sm:$0xff] }
 0x20a   :  { %v3918_v58 = vpop.eup %3917 }
 0x20b   :  { %v614_v59 = vadd.f32 1.0, %v3918_v58  ;;  %v3920_v36 = vpop.eup %3919 }
 0x20d   :  { %v615_v63 = vmul.f32 0.5, %v614_v59  ;;  %v4765_v59 = vld [vmem:[%s5302_s0] sm:$0xff] }
 0x20f   :  { %v616_v0 = vmul.f32 %v615_v63, %v605_v51 }
 0x211   :  { %3700 = vmatmul.mubr.msk.f32.vlgmr.msra.gmra.mrb[2].mxu1 %vm628_vm7, %v616_v0 }
 0x212   :  { %3761 = vmatpush3.bf16.msra.mxu1 %v3758_v15  ;;  %v4787_v15 = vld [vmem:[%s5302_s0 + $0x10] sm:$0xff] }
 0x213   :  { %3763 = vmatprep.subr.bf16.mxu1 %v3762_v17 }
 0x216   :  { %3765 = vmatpush3.bf16.msra.mxu1 %v3762_v17 }
 0x25d   :  { %v744_v2 = vpop.permute.xlu0 %743 }
 0x25e   :  { %v746_v4 = vsel %vm739_vm8, %v4685_v48, %v744_v2 }
 0x25f   :  { %751 = vrot.lane.b32.xlu0 %v746_v4, %s4368_s15 }
 0x2d1   :  { %v752_v5 = vpop.permute.xlu0 %751 }
 0x2d2   :  { %v754_v6 = vsel %vm747_vm9, %v4685_v48, %v752_v5 }
 0x2d3   :  { %759 = vrot.lane.b32.xlu1 %v754_v6, %s4368_s15 }
 0x2d7   :  { %722 = vperm.xlu1 %3911, %v4707_v7  }
 0x2e4   :  { %v698_v19 = vpop.f32.mrb[2].mxu1 }
 0x2e5   :  { %v3701_v20 = vpop.f32.mrb[3].mxu1  ;;  %v4722_v22 = vadd.f32 %v3544_v21, %v698_v19  ;;  %v1110_v19 = vld [vmem:[#allocation17] sm:$0x3]  ;;  %v3922_v21 = vpop.eup %3921 }
 0x2e7   :  { %v709_v26 = vmul.f32 %v708_v24, %v4722_v22  ;;  %v704_v31 = vmul.f32 %v703_v27, %v4722_v22  ;;  %v777_v16 = vmul.f32 %v776_v14, %v4722_v22  ;;  %v827_v24 = vld [vmem:[#allocation15 + $0x1] sm:$0x1] }
 0x2e9   :  { %v711_v32 = vrot.slane %v709_v26, 1 }
 0x2eb   :  { %v713_v34 = vadd.f32 %v711_v32, %v704_v31  ;;  %v792_v31 = vld [vmem:[#allocation12 + $0x8] sm:$0xff] }
 0x2ed   :  { %v717_v37 = vmul.f32 %v3920_v36, %v713_v34 }
 0x2ef   :  { %v728_v41 = vrot.slane %v717_v37, %v4678_v45 }
 0x300   :  { %969 = vxpose.xlu1.b32.start.end [1/1] (short) (narrow) %v944_v10, 32  ;;  %v782_v10 = vmul.f32 %v781_v9, %v4722_v22 }
 0x302   :  { %v784_v17 = vrot.slane %v782_v10, 1  ;;  %v276_v10 = vadd.s32 8, %v4673_v38 }
 0x304   :  { %v786_v20 = vadd.f32 %v784_v17, %v777_v16  ;;  %vm278_vm14 = vcmp.lt.s32.totalorder %v276_v10, 12  ;;  %v4374_v16 = vmov -1e+30  }
 0x305   :  { %v4866_v17 = vsel %vm278_vm14, 0.0, %v4374_v16 }
 0x306   :  { %v790_v27 = vmul.f32 %v3922_v21, %v786_v20 }
 0x32a   :  { %966 = vperm.xlu1 %3911, %v4718_v18  }
 0x345   :  { %v760_v28 = vpop.permute.xlu1 %759 }
 0x346   :  { %v762_v30 = vsel %vm755_vm11, %v4685_v48, %v760_v28  ;;  %v799_v28 = vsub.s32 2, %v4673_v38 }
 0x347   :  { %764 = vrot.lane.b32.xlu0 %v762_v30, %s4368_s15 }
 0x348   :  { %v800_v30 = vrot.slane %v790_v27, %v799_v28 }
 0x34b   :  { %809 = vrot.lane.b32.xlu0 %v807_v33, %s4368_s15 }
 0x356   :  { %v723_v42 = vpop.permute.xlu1 %722 }
 0x357   :  { %v729_v46 = vmul.f32 %v728_v41, %v723_v42 }
 0x359   :  { %v730_v47 = vadd.f32 %v729_v46, %v718_v43 }
 0x35b   :  { %v773_v48 = vadd.f32 %v772_v44, %v730_v47 }
 0x35d   :  { %3710 = vmatprep.mubr.msk.f32.mxu1 %vm628_vm7, %v773_v48 }
 0x380   :  { %v985_v49 = vpop.trf.xlu1 }
 0x381   :  { %3556 = vmatmul.mubr.msk.f32.vlgmr.msra.gmra.mrb[4].mxu0 %vm1003_vm12, %v985_v49 }
 0x382   :  { %1091 = vmatprep.mubr.f32.mxu0 %v4367_v11 }
 0x384   :  { %v986_v3 = vpop.trf.xlu1 }
 0x385   :  { %3557 = vmatmul.mubr.msk.f32.gmra.mrb[6].mxu0 %vm1003_vm12, %v986_v3 }
 0x386   :  { %1097 = vmatprep.mubr.f32.mxu0 %v4367_v11 }
 0x388   :  { %v987_v50 = vpop.trf.xlu1 }
 0x389   :  { %3558 = vmatmul.mubr.msk.f32.gmra.mrb[8].mxu0 %vm1003_vm12, %v987_v50 }
 0x38a   :  { %1103 = vmatprep.mubr.f32.mxu0 %v4367_v11 }
 0x38c   :  { %v988_v51 = vpop.trf.xlu1 }
 0x38d   :  { %3559 = vmatmul.mubr.msk.f32.gmra.mrb[10].mxu0 %vm1003_vm12, %v988_v51 }
 0x38e   :  { %1498 = vmatprep.mubr.f32.mxu0 %v4367_v11 }
 0x3a9   :  { %v967_v3 = vpop.permute.xlu1 %966 }
 0x3b9   :  { %v765_v53 = vpop.permute.xlu0 %764 }
 0x3ba   :  { %v774_v54 = vadd.f32 %v772_v44, %v765_v53 }
 0x3bc   :  { %3711 = vmatmul.mubr.msk.f32.vlgmr.msra.gmra.mrb[4].mxu1 %vm628_vm7, %v774_v54 }
 0x3bd   :  { %v810_v55 = vpop.permute.xlu0 %809 }
 0x3be   :  { %v812_v56 = vsel %vm739_vm8, %v4731_v29, %v810_v55 }
 0x3bf   :  { %814 = vrot.lane.b32.xlu0 %v812_v56, %s4368_s15 }
 0x431   :  { %v815_v57 = vpop.permute.xlu0 %814 }
 0x432   :  { %v817_v58 = vsel %vm747_vm9, %v4731_v29, %v815_v57 }
 0x433   :  { %819 = vrot.lane.b32.xlu0 %v817_v58, %s4368_s15 }
 0x437   :  { %794 = vperm.xlu0 %3912, %v4707_v7  }
 0x43b   :  { %3913 = vset.pattern.permute.xlu0 %v4369_v1 }
 0x43c   :  { %951 = vperm.xlu0 %3913, %v4765_v59  }
 0x440   :  { %956 = vperm.xlu0 %3913, %v4770_v60  }
 0x454   :  { %v1087_v61 = vpop.f32.mrb[4].mxu0 }
 0x455   :  { %v1089_v62 = vpop.f32.mrb[5].mxu0 }
 0x458   :  { %v1093_v63 = vpop.f32.mrb[6].mxu0 }
 0x459   :  { %v1095_v0 = vpop.f32.mrb[7].mxu0 }
 0x45c   :  { %v4773_v2 = vpop.f32.mrb[8].mxu0 }
 0x45d   :  { %v4775_v4 = vpop.f32.mrb[9].mxu0 }
 0x460   :  { %v4777_v5 = vpop.f32.mrb[10].mxu0 }
 0x461   :  { %v4779_v6 = vpop.f32.mrb[11].mxu0  ;;  %v4812_v51 = vadd.f32 %v4777_v5, %v967_v3 }
 0x462   :  { %v4815_v53 = vadd.f32 %v4779_v6, %v967_v3  ;;  %v4837_v6 = vld [vmem:[%s5305_s7 + $0x10] sm:$0xff] }
 0x48f   :  { %v3712_v1 = vpop.f32.mrb[4].mxu1 }
 0x490   :  { %v924_v7 = vpop.f32.mrb[5].mxu1  ;;  %v930_v22 = vadd.f32 %v3712_v1, %v4792_v23  ;;  %v4841_v1 = vld [vmem:[%s5305_s7 + $0x18] sm:$0xff] }
 0x491   :  { %v925_v26 = vadd.f32 %v4792_v23, %v924_v7  ;;  %v4845_v7 = vld [vmem:[%s5305_s7] sm:$0xff] }
 0x4a5   :  { %v820_v12 = vpop.permute.xlu0 %819 }
 0x4a6   :  { %v822_v13 = vsel %vm755_vm11, %v4731_v29, %v820_v12  ;;  %v828_v29 = vmul.f32 0.1, %v827_v24 }
 0x4a7   :  { %824 = vrot.lane.b32.xlu0 %v822_v13, %s4368_s15 }
 0x4a8   :  { %v832_v33 = vrot.slane %v828_v29, %v4678_v45 }
 0x4ab   :  { %961 = vperm.xlu0 %3913, %v4787_v15  }
 0x4af   :  { %1112 = vperm.xlu0 %3913, %v1110_v19  }
 0x4b3   :  { %1548 = vrot.lane.b32.xlu0 %v925_v26, %s4371_s3 }
 0x4b6   :  { %v795_v32 = vpop.permute.xlu0 %794 }
 0x4b7   :  { %v801_v34 = vmul.f32 %v800_v30, %v795_v32  ;;  %1550 = vrot.lane.b32.xlu0 %v930_v22, %s4371_s3 }
 0x4b9   :  { %v802_v36 = vadd.f32 %v801_v34, %v792_v31 }
 0x4bb   :  { %v833_v37 = vadd.f32 %v832_v33, %v802_v36  ;;  %1308 = vrot.lane.b32.xlu0 %v925_v26, %s4372_s1  ;;  %v952_v39 = vpop.permute.xlu0 %951 }
 0x4bc   :  { %v1088_v40 = vadd.f32 %v1087_v61, %v952_v39  ;;  %v1090_v41 = vadd.f32 %v1089_v62, %v952_v39 }
 0x4bd   :  { %3713 = vmatprep.mubr.msk.f32.mxu1 %vm628_vm7, %v833_v37 }
 0x4bf   :  { %1310 = vrot.lane.b32.xlu0 %v930_v22, %s4372_s1  ;;  %v957_v42 = vpop.permute.xlu0 %956 }
 0x4c0   :  { %v1094_v43 = vadd.f32 %v1093_v63, %v957_v42  ;;  %v1096_v44 = vadd.f32 %v1095_v0, %v957_v42 }
 0x4c2   :  { %v3766_v46 = vpack.c.bf16 %v1096_v44, %v1090_v41  ;;  %v3768_v47 = vpack.c.bf16 %v1094_v43, %v1088_v40  ;;  %v2358_v40 = vld [vmem:[#allocation17] sm:$0x3] }
 0x4c3   :  { %1689 = vrot.lane.b32.xlu0 %v925_v26, %s4373_s2 }
 0x4c4   :  { %3767 = vmatprep.subr.bf16.mxu1 %v3766_v46 }
 0x4c5   :  { %3769 = vmatpush1.bf16.msra.mxu1 %v3768_v47 }
 0x4c7   :  { %1691 = vrot.lane.b32.xlu0 %v930_v22, %s4373_s2 }
 0x519   :  { %v825_v48 = vpop.permute.xlu0 %824 }
 0x51a   :  { %v834_v49 = vadd.f32 %v832_v33, %v825_v48 }
 0x51c   :  { %3714 = vmatmul.mubr.msk.f32.gmra.mrb[6].mxu1 %vm628_vm7, %v834_v49 }
 0x51d   :  { %1239 = vmatprep.mubr.f32.mxu1 %v4367_v11 }
 0x520   :  { %3561 = vmatmul.mubr.msk.f32.vlgmr.msra.gmra.mrb[8].mxu1 %vm1168_vm13, %v925_v26 }
 0x521   :  { %1245 = vmatprep.mubr.f32.mxu1 %v4367_v11 }
 0x524   :  { %3562 = vmatmul.mubr.msk.f32.gmra.mrb[10].mxu1 %vm1168_vm13, %v930_v22 }
 0x525   :  { %1416 = vmatprep.mubr.f32.mxu1 %v4367_v11 }
 0x52a   :  { %v962_v50 = vpop.permute.xlu0 %961 }
 0x52b   :  { %v4818_v54 = vadd.f32 %v4773_v2, %v962_v50  ;;  %v4821_v55 = vadd.f32 %v4775_v4, %v962_v50  ;;  %v2194_v2 = vld [vmem:[%s5300_s11] sm:$0xf] }
 0x52d   :  { %v3778_v56 = vpack.c.bf16 %v4815_v53, %v4821_v55  ;;  %v3780_v57 = vpack.c.bf16 %v4812_v51, %v4818_v54 }
 0x52e   :  { %v4827_v58 = vpop.permute.xlu0 %1112 }
 0x532   :  { %v4829_v61 = vpop.permute.xlu0 %1548 }
 0x536   :  { %v4831_v62 = vpop.permute.xlu0 %1550 }
 0x53a   :  { %v1309_v63 = vpop.permute.xlu0 %1308 }
 0x53b   :  { %1314 = vxpose.xlu0.b32.start [1/2] (short) (narrow) %v1309_v63, 16 }
 0x53e   :  { %v1311_v0 = vpop.permute.xlu0 %1310 }
 0x53f   :  { %1315 = vxpose.xlu0.b32.end [2/2] (short) (narrow) %v1311_v0, 16 }
 0x542   :  { %v1690_v4 = vpop.permute.xlu0 %1689 }
 0x543   :  { %2219 = vxpose.xlu0.b32.start.end [1/1] (short) (narrow) %v2194_v2, 32  ;;  %1695 = vxpose.xlu1.b32.start [1/2] (short) (narrow) %v1690_v4, 16 }
 0x546   :  { %v1692_v5 = vpop.permute.xlu0 %1691 }
 0x547   :  { %1696 = vxpose.xlu1.b32.end [2/2] (short) (narrow) %v1692_v5, 16 }
 0x565   :  { %2206 = vperm.xlu1 %3911, %v4770_v60  }
 0x578   :  { %2201 = vperm.xlu0 %3913, %v4765_v59  }
 0x58e   :  { %1812 = vxpose.xlu1.b32.start [1/2] (short) (narrow) %v4837_v6, 8 }
 0x592   :  { %1813 = vxpose.xlu1.b32.end [2/2] (short) (narrow) %v4841_v1, 8 }
 0x596   :  { %1918 = vxpose.xlu0.b32.start [1/2] (short) (narrow) %v4845_v7, 8 }
 0x59a   :  { %1919 = vxpose.xlu0.b32.end [2/2] (short) (narrow) %v4849_v8, 8 }
 0x5c3   :  { %v4911_v55 = vpop.trf.xlu1 }
 0x5ef   :  { %v3715_v9 = vpop.f32.mrb[6].mxu1 }
 0x5f0   :  { %v4853_v60 = vadd.f32 %v3715_v9, %v4792_v23  ;;  %v934_v59 = vpop.f32.mrb[7].mxu1 }
 0x5f1   :  { %v4857_v12 = vadd.f32 %v4792_v23, %v934_v59 }
 0x5f2   :  { %2560 = vrot.lane.b32.xlu1 %v4853_v60, %s4372_s1 }
 0x5f3   :  { %2558 = vrot.lane.b32.xlu0 %v4857_v12, %s4372_s1  ;;  %v1241_v13 = vpop.f32.mrb[8].mxu1 }
 0x5f4   :  { %v1243_v14 = vpop.f32.mrb[9].mxu1  ;;  %v1252_v24 = vmul.f32 0.25, %v1241_v13 }
 0x5f5   :  { %v1253_v27 = vmul.f32 0.25, %v1243_v14 }
 0x5f6   :  { %2211 = vperm.xlu1 %3911, %v4787_v15  }
 0x5f7   :  { %2802 = vrot.lane.b32.xlu0 %v4857_v12, %s4371_s3  ;;  %v1247_v19 = vpop.f32.mrb[10].mxu1 }
 0x5f8   :  { %v1254_v20 = vmul.f32 0.25, %v1247_v19  ;;  %v1249_v21 = vpop.f32.mrb[11].mxu1 }
 0x5f9   :  { %v1255_v23 = vmul.f32 0.25, %v1249_v21 }
 0x5fa   :  { %v1258_v26 = vadd.f32 %v1254_v20, %v4866_v17  ;;  %2216 = vperm.xlu1 %3911, %v4718_v18  }
 0x5fb   :  { %v1259_v28 = vadd.f32 %v1255_v23, %v4866_v17 }
 0x5fc   :  { %v1260_v29 = vmax.f32 %v1252_v24, %v1258_v26 }
 0x5fd   :  { %v1267_v15 = vmax.f32 %v1253_v27, %v1259_v28 }
 0x5fe   :  { %v1261_v22 = vrot.slane %v1260_v29, 4  ;;  %2804 = vrot.lane.b32.xlu1 %v4853_v60, %s4371_s3 }
 0x5ff   :  { %v1268_v30 = vrot.slane %v1267_v15, 4  ;;  %3914 = vset.pattern.permute.xlu1 %v4370_v52 }
 0x600   :  { %v1262_v31 = vmax.f32 %v1260_v29, %v1261_v22  ;;  %v4879_v22 = vand.u32 127, %v272_v35 }
 0x601   :  { %v1269_v32 = vmax.f32 %v1267_v15, %v1268_v30 }
 0x602   :  { %v1263_v33 = vrot.slane %v1262_v31, 2  ;;  %2943 = vrot.lane.b32.xlu1 %v4857_v12, %s4373_s2  ;;  %vm1114_vm15 = vcmp.eq.s32.totalorder %v4879_v22, %v4827_v58 }
 0x603   :  { %v1270_v34 = vrot.slane %v1269_v32, 2 }
 0x604   :  { %v1264_v18 = vmax.f32 %v1262_v31, %v1263_v33  ;;  %v1330_v33 = vpop.trf.xlu0 }
 0x605   :  { %v1271_v36 = vmax.f32 %v1269_v32, %v1270_v34 }
 0x606   :  { %v1265_v37 = vrot.slane %v1264_v18, 1  ;;  %2945 = vrot.lane.b32.xlu1 %v4853_v60, %s4373_s2 }
 0x607   :  { %v1272_v39 = vrot.slane %v1271_v36, 1 }
 0x608   :  { %v1266_v41 = vmax.f32 %v1264_v18, %v1265_v37  ;;  %v4887_v18 = vsel %vm1114_vm15, 1.0, %v4367_v11  ;;  %v1331_v35 = vpop.trf.xlu0 }
 0x609   :  { %v1273_v42 = vmax.f32 %v1271_v36, %v1272_v39 }
 0x60a   :  { %v1274_v43 = vsub.f32 %v1252_v24, %v1266_v41  ;;  %v1276_v44 = vsub.f32 %v1258_v26, %v1266_v41  ;;  %2360 = vperm.xlu1 %3914, %v2358_v40  }
 0x60b   :  { %v1275_v52 = vsub.f32 %v1253_v27, %v1273_v42  ;;  %v1277_v46 = vsub.f32 %v1259_v28, %v1273_v42 }
 0x60c   :  { %v1278_v47 = vmul.f32 1.442695, %v1274_v43  ;;  %v1282_v48 = vmul.f32 1.442695, %v1276_v44  ;;  %v4902_v53 = vpop.trf.xlu0 }
 0x60d   :  { %v1280_v49 = vmul.f32 1.442695, %v1275_v52  ;;  %v1284_v3 = vmul.f32 1.442695, %v1277_v46 }
 0x60e   :  { %3923 = vpow2.f32 %v1278_v47 }
 0x60f   :  { %3925 = vpow2.f32 %v1282_v48 }
 0x610   :  { %3927 = vpow2.f32 %v1280_v49  ;;  %v4907_v51 = vpop.trf.xlu0 }
 0x611   :  { %3929 = vpow2.f32 %v1284_v3 }
 0x614   :  { %v4909_v54 = vpop.trf.xlu0 }
 0x618   :  { %v3924_v50 = vpop.eup %3923 }
 0x619   :  { %v3926_v63 = vpop.eup %3925 }
 0x61a   :  { %v3928_v0 = vpop.eup %3927  ;;  %v1286_v2 = vadd.f32 %v3926_v63, %v3924_v50 }
 0x61b   :  { %v3930_v4 = vpop.eup %3929 }
 0x61c   :  { %v1287_v5 = vrot.slane %v1286_v2, 4  ;;  %v1293_v9 = vadd.f32 %v3930_v4, %v3928_v0 }
 0x61e   :  { %v1288_v59 = vadd.f32 %v1287_v5, %v1286_v2  ;;  %v1294_v10 = vrot.slane %v1293_v9, 4 }
 0x620   :  { %v1289_v13 = vrot.slane %v1288_v59, 2  ;;  %v1295_v14 = vadd.f32 %v1294_v10, %v1293_v9 }
 0x622   :  { %v1290_v16 = vadd.f32 %v1289_v13, %v1288_v59  ;;  %v1296_v19 = vrot.slane %v1295_v14, 2 }
 0x624   :  { %v1291_v20 = vrot.slane %v1290_v16, 1  ;;  %v1297_v21 = vadd.f32 %v1296_v19, %v1295_v14 }
 0x626   :  { %v1298_v23 = vrot.slane %v1297_v21, 1  ;;  %v1292_v24 = vadd.f32 %v1291_v20, %v1290_v16 }
 0x628   :  { %v1299_v26 = vadd.f32 %v1298_v23, %v1297_v21  ;;  %3931 = vrcp.f32 %v1292_v24 }
 0x62a   :  { %3933 = vrcp.f32 %v1299_v26 }
 0x632   :  { %v3932_v27 = vpop.eup %3931 }
 0x633   :  { %v1304_v28 = vmul.f32 %v3932_v27, %v3924_v50  ;;  %v1306_v29 = vmul.f32 %v3932_v27, %v3926_v63 }
 0x634   :  { %v3934_v15 = vpop.eup %3933 }
 0x635   :  { %v1305_v30 = vmul.f32 %v3934_v15, %v3928_v0  ;;  %v1307_v31 = vmul.f32 %v3934_v15, %v3930_v4  ;;  %v3772_v32 = vpack.c.bf16 %v1306_v29, %v1304_v28 }
 0x637   :  { %v3770_v34 = vpack.c.bf16 %v1307_v31, %v1305_v30 }
 0x639   :  { %3771 = vmatprep.subr.bf16.mxu1 %v3770_v34  ;;  %3775 = vmatprep.subr.bf16.mxu0 %v3770_v34 }
 0x63a   :  { %3773 = vmatpush1.bf16.msra.mxu1 %v3772_v32  ;;  %3777 = vmatpush1.bf16.msra.mxu0 %v3772_v32 }
 0x63b   :  { %3779 = vmatprep.subr.bf16.mxu0 %v3778_v56  ;;  %v4913_v56 = vpop.trf.xlu0 }
 0x63d   :  { %3565 = vmatmul.mubr.msk.f32.vlgmr.msra.gmra.mrb[12].mxu0 %vm1168_vm13, %v4887_v18  ;;  %3563 = vmatmul.mubr.msk.f32.vlgmr.msra.gmra.mrb[12].mxu1 %vm1168_vm13, %v1330_v33 }
 0x63e   :  { %3781 = vmatpush1.bf16.msra.mxu0 %v3780_v57  ;;  %1620 = vmatprep.mubr.f32.mxu0 %v4367_v11  ;;  %v4915_v57 = vpop.trf.xlu1 }
 0x63f   :  { %1422 = vmatprep.mubr.f32.mxu1 %v4367_v11  ;;  %v4917_v58 = vpop.permute.xlu0 %2201 }
 0x641   :  { %3566 = vmatmul.mubr.msk.f32.vlgmr.msra.gmra.mrb[14].mxu0 %vm1168_vm13, %v4829_v61  ;;  %3564 = vmatmul.mubr.msk.f32.gmra.mrb[14].mxu1 %vm1168_vm13, %v1331_v35 }
 0x642   :  { %1626 = vmatprep.mubr.f32.mxu0 %v4367_v11  ;;  %1797 = vmatprep.mubr.f32.mxu1 %v4367_v11  ;;  %v4919_v61 = vpop.permute.xlu1 %2206 }
 0x643   :  { %v4921_v36 = vpop.trf.xlu0 }
 0x645   :  { %3567 = vmatmul.mubr.msk.f32.gmra.mrb[16].mxu0 %vm1168_vm13, %v4831_v62 }
 0x646   :  { %1911 = vmatprep.mubr.f32.mxu0 %v4367_v11  ;;  %v4923_v37 = vpop.trf.xlu1 }
 0x664   :  { %v2561_v39 = vpop.permute.xlu1 %2560 }
 0x665   :  { %v2559_v62 = vpop.permute.xlu0 %2558 }
 0x666   :  { %2564 = vxpose.xlu0.b32.start [1/2] (short) (narrow) %v2559_v62, 16 }
 0x66a   :  { %2565 = vxpose.xlu0.b32.end [2/2] (short) (narrow) %v2561_v39, 16 }
 0x66e   :  { %3066 = vxpose.xlu0.b32.start [1/2] (short) (narrow) %v4837_v6, 8 }
 0x672   :  { %3067 = vxpose.xlu0.b32.end [2/2] (short) (narrow) %v4841_v1, 8 }
 0x675   :  { %v4927_v40 = vpop.permute.xlu1 %2211 }
 0x676   :  { %3172 = vxpose.xlu0.b32.start [1/2] (short) (narrow) %v4845_v7, 8 }
 0x679   :  { %v4930_v41 = vpop.permute.xlu1 %2216 }
 0x67a   :  { %3173 = vxpose.xlu0.b32.end [2/2] (short) (narrow) %v4849_v8, 8 }
 0x67d   :  { %v4933_v42 = vpop.permute.xlu1 %2804 }
 0x681   :  { %v2944_v43 = vpop.permute.xlu1 %2943 }
 0x682   :  { %2949 = vxpose.xlu1.b32.start [1/2] (short) (narrow) %v2944_v43, 16 }
 0x685   :  { %v2946_v44 = vpop.permute.xlu1 %2945 }
 0x686   :  { %2950 = vxpose.xlu1.b32.end [2/2] (short) (narrow) %v2946_v44, 16 }
 0x710   :  { %v4935_v52 = vpop.f32.mrb[12].mxu0  ;;  %v4937_v6 = vpop.f32.mrb[12].mxu1 }
 0x711   :  { %v4941_v1 = vsel %vm1130_vm0, %v4935_v52, -inf  ;;  %v4943_v7 = vpop.f32.mrb[13].mxu0  ;;  %v4945_v46 = vpop.f32.mrb[13].mxu1 }
 0x712   :  { %v4949_v8 = vsel %vm1130_vm0, %v4943_v7, -inf }
 0x713   :  { %v1507_v47 = vmax.f32 %v4941_v1, %v4949_v8 }
 0x714   :  { %v1622_v48 = vpop.f32.mrb[14].mxu0  ;;  %v4953_v49 = vpop.f32.mrb[14].mxu1 }
 0x715   :  { %v1624_v3 = vpop.f32.mrb[15].mxu0  ;;  %v3792_v50 = vpack.c.bf16 %v4953_v49, %v4937_v6  ;;  %v4957_v63 = vpop.f32.mrb[15].mxu1  ;;  %v1633_v59 = vmul.f32 0.25, %v1622_v48 }
 0x716   :  { %v3790_v0 = vpack.c.bf16 %v4957_v63, %v4945_v46  ;;  %v1634_v13 = vmul.f32 0.25, %v1624_v3 }
 0x718   :  { %v1628_v2 = vpop.f32.mrb[16].mxu0 }
 0x719   :  { %v1635_v4 = vmul.f32 0.25, %v1628_v2  ;;  %v1630_v5 = vpop.f32.mrb[17].mxu0 }
 0x71a   :  { %v1636_v9 = vmul.f32 0.25, %v1630_v5 }
 0x71b   :  { %v1639_v10 = vadd.f32 %v1635_v4, %v4866_v17 }
 0x71c   :  { %v1640_v14 = vadd.f32 %v1636_v9, %v4866_v17 }
 0x71d   :  { %v1641_v16 = vmax.f32 %v1633_v59, %v1639_v10 }
 0x71e   :  { %v1648_v19 = vmax.f32 %v1634_v13, %v1640_v14 }
 0x71f   :  { %v1642_v20 = vrot.slane %v1641_v16, 4 }
 0x720   :  { %v1649_v21 = vrot.slane %v1648_v19, 4 }
 0x721   :  { %v1643_v23 = vmax.f32 %v1641_v16, %v1642_v20 }
 0x722   :  { %v1650_v24 = vmax.f32 %v1648_v19, %v1649_v21 }
 0x723   :  { %v1644_v26 = vrot.slane %v1643_v23, 2 }
 0x724   :  { %v1651_v27 = vrot.slane %v1650_v24, 2 }
 0x725   :  { %v1645_v28 = vmax.f32 %v1643_v23, %v1644_v26 }
 0x726   :  { %v1652_v29 = vmax.f32 %v1650_v24, %v1651_v27 }
 0x727   :  { %v1646_v15 = vrot.slane %v1645_v28, 1 }
 0x728   :  { %v1653_v30 = vrot.slane %v1652_v29, 1 }
 0x729   :  { %v1647_v31 = vmax.f32 %v1645_v28, %v1646_v15 }
 0x72a   :  { %v1654_v32 = vmax.f32 %v1652_v29, %v1653_v30 }
 0x72b   :  { %v1655_v33 = vsub.f32 %v1633_v59, %v1647_v31  ;;  %v1657_v34 = vsub.f32 %v1639_v10, %v1647_v31 }
 0x72c   :  { %v1656_v35 = vsub.f32 %v1634_v13, %v1654_v32  ;;  %v1658_v62 = vsub.f32 %v1640_v14, %v1654_v32 }
 0x72d   :  { %v1659_v39 = vmul.f32 1.442695, %v1655_v33  ;;  %v1663_v43 = vmul.f32 1.442695, %v1657_v34 }
 0x72e   :  { %v1661_v44 = vmul.f32 1.442695, %v1656_v35  ;;  %v1665_v48 = vmul.f32 1.442695, %v1658_v62  ;;  %v4963_v62 = vld [vmem:[#allocation14 + $0x8] sm:$0xff] }
 0x72f   :  { %3935 = vpow2.f32 %v1659_v39  ;;  %v2252_v39 = vcombine.high %v4963_v62, %v4963_v62 }
 0x730   :  { %3937 = vpow2.f32 %v1663_v43 }
 0x731   :  { %3939 = vpow2.f32 %v1661_v44 }
 0x732   :  { %3941 = vpow2.f32 %v1665_v48 }
 0x739   :  { %v3936_v3 = vpop.eup %3935 }
 0x73a   :  { %v3938_v2 = vpop.eup %3937 }
 0x73b   :  { %v3940_v4 = vpop.eup %3939  ;;  %v1667_v5 = vadd.f32 %v3938_v2, %v3936_v3 }
 0x73c   :  { %v3942_v9 = vpop.eup %3941 }
 0x73d   :  { %v1668_v16 = vrot.slane %v1667_v5, 4  ;;  %v1674_v19 = vadd.f32 %v3942_v9, %v3940_v4 }
 0x73f   :  { %v1669_v20 = vadd.f32 %v1668_v16, %v1667_v5  ;;  %v1675_v59 = vrot.slane %v1674_v19, 4 }
 0x741   :  { %v1670_v10 = vrot.slane %v1669_v20, 2  ;;  %v1676_v13 = vadd.f32 %v1675_v59, %v1674_v19 }
 0x743   :  { %v1671_v14 = vadd.f32 %v1670_v10, %v1669_v20  ;;  %v1677_v21 = vrot.slane %v1676_v13, 2 }
 0x745   :  { %v1672_v23 = vrot.slane %v1671_v14, 1  ;;  %v1678_v24 = vadd.f32 %v1677_v21, %v1676_v13 }
 0x747   :  { %v1679_v26 = vrot.slane %v1678_v24, 1  ;;  %v1673_v27 = vadd.f32 %v1672_v23, %v1671_v14 }
 0x749   :  { %v1680_v28 = vadd.f32 %v1679_v26, %v1678_v24  ;;  %3943 = vrcp.f32 %v1673_v27 }
 0x74b   :  { %3945 = vrcp.f32 %v1680_v28 }
 0x753   :  { %v3944_v29 = vpop.eup %3943 }
 0x754   :  { %v1685_v15 = vmul.f32 %v3944_v29, %v3936_v3  ;;  %v1687_v30 = vmul.f32 %v3944_v29, %v3938_v2 }
 0x755   :  { %v3946_v31 = vpop.eup %3945 }
 0x756   :  { %v1686_v32 = vmul.f32 %v3946_v31, %v3940_v4  ;;  %v1688_v33 = vmul.f32 %v3946_v31, %v3942_v9  ;;  %v3784_v34 = vpack.c.bf16 %v1687_v30, %v1685_v15 }
 0x758   :  { %v3782_v35 = vpack.c.bf16 %v1688_v33, %v1686_v32 }
 0x75a   :  { %3783 = vmatprep.subr.bf16.mxu1 %v3782_v35 }
 0x75b   :  { %3785 = vmatpush1.bf16.msra.mxu1 %v3784_v34 }
 0x75c   :  { %3795 = vmatprep.subr.bf16.mxu1 %v3782_v35 }
 0x75e   :  { %3568 = vmatmul.mubr.msk.f32.vlgmr.msra.gmra.mrb[16].mxu1 %vm1168_vm13, %v4911_v55 }
 0x75f   :  { %3797 = vmatpush1.bf16.msra.mxu1 %v3784_v34  ;;  %1803 = vmatprep.mubr.f32.mxu1 %v4367_v11 }
 0x760   :  { %3573 = vmatprep.subr.msk.mxu1 %vm1016_vm10, %v2252_v39 }
 0x762   :  { %3569 = vmatmul.mubr.msk.f32.gmra.mrb[18].mxu1 %vm1168_vm13, %v4915_v57 }
 0x763   :  { %2088 = vmatprep.mubr.f32.mxu1 %v4367_v11 }
 0x766   :  { %3572 = vmatmul.mubr.msk.f32.vlgmr.msra.gmra.mrb[20].mxu1 %vm1168_vm13, %v4887_v18 }
 0x767   :  { %3574 = vmatpush1.msk.msra.mxu1 %vm1016_vm10, %v4963_v62  ;;  %2333 = vmatprep.mubr.f32.mxu1 %v4367_v11 }
 0x76a   :  { %3575 = vmatmul.mubr.msk.f32.vlgmr.msra.gmra.mrb[22].mxu1 %vm1003_vm12, %v4902_v53 }
 0x76b   :  { %2339 = vmatprep.mubr.f32.mxu1 %v4367_v11 }
 0x76e   :  { %3576 = vmatmul.mubr.msk.f32.gmra.mrb[24].mxu1 %vm1003_vm12, %v4907_v51 }
 0x76f   :  { %2345 = vmatprep.mubr.f32.mxu1 %v4367_v11 }
 0x772   :  { %3577 = vmatmul.mubr.msk.f32.gmra.mrb[26].mxu1 %vm1003_vm12, %v4909_v54 }
 0x773   :  { %2351 = vmatprep.mubr.f32.mxu1 %v4367_v11 }
 0x776   :  { %3578 = vmatmul.mubr.msk.f32.gmra.mrb[28].mxu1 %vm1003_vm12, %v4913_v56 }
 0x777   :  { %2748 = vmatprep.mubr.f32.mxu1 %v4367_v11 }
 0x831   :  { %v1799_v18 = vpop.f32.mrb[16].mxu1 }
 0x832   :  { %v1801_v55 = vpop.f32.mrb[17].mxu1 }
 0x835   :  { %v1805_v53 = vpop.f32.mrb[18].mxu1 }
 0x836   :  { %v3788_v57 = vpack.c.bf16 %v1805_v53, %v1799_v18  ;;  %v1807_v43 = vpop.f32.mrb[19].mxu1 }
 0x837   :  { %v3786_v44 = vpack.c.bf16 %v1807_v43, %v1801_v55 }
 0x839   :  { %3787 = vmatprep.subr.bf16.mxu0 %v3786_v44  ;;  %v4991_v51 = vpop.f32.mrb[20].mxu1 }
 0x83a   :  { %v4995_v48 = vsel %vm1130_vm0, %v4991_v51, -inf  ;;  %3789 = vmatpush1.bf16.msra.mxu0 %v3788_v57  ;;  %v4997_v54 = vpop.f32.mrb[21].mxu1 }
 0x83b   :  { %v5001_v56 = vsel %vm1130_vm0, %v4997_v54, -inf  ;;  %3791 = vmatprep.subr.bf16.mxu0 %v3790_v0 }
 0x83c   :  { %v2097_v3 = vmax.f32 %v4995_v48, %v5001_v56  ;;  %v4375_v48 = vmov 1983009808  }
 0x83d   :  { %v2335_v2 = vpop.f32.mrb[22].mxu1  ;;  %3570 = vmatmul.mubr.msk.f32.vlgmr.msra.gmra.mrb[18].mxu0 %vm1168_vm13, %v4923_v37  ;;  %v1121_v56 = vunpack.c.l.s4 %v4375_v48 }
 0x83e   :  { %3793 = vmatpush1.bf16.msra.mxu0 %v3792_v50  ;;  %v2337_v4 = vpop.f32.mrb[23].mxu1  ;;  %2017 = vmatprep.mubr.f32.mxu0 %v4367_v11  ;;  %v2336_v9 = vadd.f32 %v2335_v2, %v4917_v58 }
 0x83f   :  { %v2338_v0 = vadd.f32 %v2337_v4, %v4917_v58 }
 0x841   :  { %v2341_v5 = vpop.f32.mrb[24].mxu1 }
 0x842   :  { %v2342_v46 = vadd.f32 %v2341_v5, %v4919_v61  ;;  %v2343_v63 = vpop.f32.mrb[25].mxu1 }
 0x843   :  { %v2344_v16 = vadd.f32 %v2343_v63, %v4919_v61 }
 0x844   :  { %v3800_v19 = vpack.c.bf16 %v2342_v46, %v2336_v9 }
 0x845   :  { %v3798_v20 = vpack.c.bf16 %v2344_v16, %v2338_v0  ;;  %v2347_v37 = vpop.f32.mrb[26].mxu1  ;;  %3571 = vmatmul.mubr.msk.f32.vlgmr.msra.gmra.mrb[18].mxu0 %vm1168_vm13, %v4921_v36 }
 0x846   :  { %v2349_v6 = vpop.f32.mrb[27].mxu1  ;;  %2489 = vmatprep.mubr.f32.mxu0 %v4367_v11  ;;  %v5022_v50 = vadd.f32 %v2347_v37, %v4927_v40 }
 0x847   :  { %3799 = vmatprep.subr.bf16.mxu0 %v3798_v20  ;;  %v5028_v61 = vadd.f32 %v2349_v6, %v4927_v40 }
 0x848   :  { %3801 = vmatpush1.bf16.msra.mxu0 %v3800_v19 }
 0x849   :  { %v2353_v49 = vpop.f32.mrb[28].mxu1 }
 0x84a   :  { %v5025_v59 = vadd.f32 %v2353_v49, %v4930_v41  ;;  %v2355_v58 = vpop.f32.mrb[29].mxu1 }
 0x84b   :  { %v5031_v10 = vadd.f32 %v2355_v58, %v4930_v41  ;;  %3580 = vmatmul.mubr.msk.f32.vlgmr.msra.gmra.mrb[20].mxu0 %vm1168_vm13, %v4857_v12 }
 0x84c   :  { %v3812_v36 = vpack.c.bf16 %v5025_v59, %v5022_v50  ;;  %2495 = vmatprep.mubr.f32.mxu0 %v4367_v11 }
 0x84d   :  { %v3810_v13 = vpack.c.bf16 %v5031_v10, %v5028_v61 }
 0x84f   :  { %3581 = vmatmul.mubr.msk.f32.gmra.mrb[22].mxu0 %vm1168_vm13, %v4853_v60 }
 0x850   :  { %2666 = vmatprep.mubr.f32.mxu0 %v4367_v11 }
 0x918   :  { %v5043_v40 = vpop.f32.mrb[18].mxu0 }
 0x919   :  { %v5045_v41 = vpop.f32.mrb[19].mxu0 }
 0x91a   :  { %v2140_v12 = vcombine.low %v5043_v40, %v5045_v41 }
 0x91e   :  { %v2491_v14 = vpop.f32.mrb[20].mxu0 }
 0x91f   :  { %v2493_v21 = vpop.f32.mrb[21].mxu0  ;;  %v2502_v28 = vmul.f32 0.25, %v2491_v14 }
 0x920   :  { %v2503_v15 = vmul.f32 0.25, %v2493_v21 }
 0x922   :  { %v2497_v23 = vpop.f32.mrb[22].mxu0 }
 0x923   :  { %v2504_v24 = vmul.f32 0.25, %v2497_v23  ;;  %v2499_v26 = vpop.f32.mrb[23].mxu0 }
 0x924   :  { %v2505_v27 = vmul.f32 0.25, %v2499_v26 }
 0x925   :  { %v2508_v29 = vadd.f32 %v2504_v24, %v4866_v17 }
 0x926   :  { %v2509_v60 = vadd.f32 %v2505_v27, %v4866_v17 }
 0x927   :  { %v2510_v30 = vmax.f32 %v2502_v28, %v2508_v29 }
 0x928   :  { %v2517_v31 = vmax.f32 %v2503_v15, %v2509_v60 }
 0x929   :  { %v2511_v32 = vrot.slane %v2510_v30, 4 }
 0x92a   :  { %v2518_v33 = vrot.slane %v2517_v31, 4 }
 0x92b   :  { %v2512_v34 = vmax.f32 %v2510_v30, %v2511_v32 }
 0x92c   :  { %v2519_v35 = vmax.f32 %v2517_v31, %v2518_v33 }
 0x92d   :  { %v2513_v39 = vrot.slane %v2512_v34, 2 }
 0x92e   :  { %v2520_v18 = vrot.slane %v2519_v35, 2 }
 0x92f   :  { %v2514_v55 = vmax.f32 %v2512_v34, %v2513_v39 }
 0x930   :  { %v2521_v53 = vmax.f32 %v2519_v35, %v2520_v18  ;;  %v2803_v18 = vpop.permute.xlu0 %2802 }
 0x931   :  { %v2515_v57 = vrot.slane %v2514_v55, 1 }
 0x932   :  { %v2522_v43 = vrot.slane %v2521_v53, 1 }
 0x933   :  { %v2516_v44 = vmax.f32 %v2514_v55, %v2515_v57  ;;  %v2361_v55 = vpop.permute.xlu1 %2360 }
 0x934   :  { %v2523_v2 = vmax.f32 %v2521_v53, %v2522_v43  ;;  %vm2362_vm1 = vcmp.eq.s32.totalorder %v4879_v22, %v2361_v55 }
 0x935   :  { %v2524_v4 = vsub.f32 %v2502_v28, %v2516_v44  ;;  %v2526_v5 = vsub.f32 %v2508_v29, %v2516_v44 }
 0x936   :  { %v2525_v9 = vsub.f32 %v2503_v15, %v2523_v2  ;;  %v2527_v46 = vsub.f32 %v2509_v60, %v2523_v2  ;;  %v2580_v2 = vpop.trf.xlu0 }
 0x937   :  { %v2528_v63 = vmul.f32 1.442695, %v2524_v4  ;;  %v2532_v0 = vmul.f32 1.442695, %v2526_v5  ;;  %v5053_v4 = vsel %vm2362_vm1, 1.0, %v4367_v11 }
 0x938   :  { %v2530_v16 = vmul.f32 1.442695, %v2525_v9  ;;  %v2534_v19 = vmul.f32 1.442695, %v2527_v46 }
 0x939   :  { %3947 = vpow2.f32 %v2528_v63 }
 0x93a   :  { %3949 = vpow2.f32 %v2532_v0  ;;  %v2581_v22 = vpop.trf.xlu0 }
 0x93b   :  { %3951 = vpow2.f32 %v2530_v16 }
 0x93c   :  { %3953 = vpow2.f32 %v2534_v19 }
 0x943   :  { %v3948_v20 = vpop.eup %3947 }
 0x944   :  { %v3950_v37 = vpop.eup %3949 }
 0x945   :  { %v3952_v6 = vpop.eup %3951  ;;  %v2536_v49 = vadd.f32 %v3950_v37, %v3948_v20 }
 0x946   :  { %v3954_v58 = vpop.eup %3953 }
 0x947   :  { %v2537_v14 = vrot.slane %v2536_v49, 4  ;;  %v2543_v21 = vadd.f32 %v3954_v58, %v3952_v6 }
 0x949   :  { %v2538_v23 = vadd.f32 %v2537_v14, %v2536_v49  ;;  %v2544_v24 = vrot.slane %v2543_v21, 4 }
 0x94b   :  { %v2539_v26 = vrot.slane %v2538_v23, 2  ;;  %v2545_v27 = vadd.f32 %v2544_v24, %v2543_v21 }
 0x94d   :  { %v2540_v28 = vadd.f32 %v2539_v26, %v2538_v23  ;;  %v2546_v29 = vrot.slane %v2545_v27, 2 }
 0x94f   :  { %v2541_v15 = vrot.slane %v2540_v28, 1  ;;  %v2547_v60 = vadd.f32 %v2546_v29, %v2545_v27 }
 0x951   :  { %v2548_v30 = vrot.slane %v2547_v60, 1  ;;  %v2542_v31 = vadd.f32 %v2541_v15, %v2540_v28 }
 0x953   :  { %v2549_v32 = vadd.f32 %v2548_v30, %v2547_v60  ;;  %3955 = vrcp.f32 %v2542_v31  ;;  %v1122_v30 = vunpack.c.0.s8 %v1121_v56 }
 0x955   :  { %3957 = vrcp.f32 %v2549_v32  ;;  %v1117_v32 = vld [vmem:[#allocation20] sm:$0xf] }
 0x95d   :  { %v3956_v33 = vpop.eup %3955 }
 0x95e   :  { %v2554_v34 = vmul.f32 %v3956_v33, %v3948_v20  ;;  %v2556_v35 = vmul.f32 %v3956_v33, %v3950_v37 }
 0x95f   :  { %v3958_v39 = vpop.eup %3957 }
 0x960   :  { %v2555_v53 = vmul.f32 %v3958_v39, %v3952_v6  ;;  %v2557_v57 = vmul.f32 %v3958_v39, %v3954_v58  ;;  %v3804_v43 = vpack.c.bf16 %v2556_v35, %v2554_v34  ;;  %v1118_v34 = vsub.f32 1.0, %v1117_v32 }
 0x962   :  { %v3802_v44 = vpack.c.bf16 %v2557_v57, %v2555_v53 }
 0x964   :  { %3803 = vmatprep.subr.bf16.mxu0 %v3802_v44  ;;  %3807 = vmatprep.subr.bf16.mxu1 %v3802_v44 }
 0x965   :  { %3805 = vmatpush1.bf16.msra.mxu0 %v3804_v43  ;;  %3809 = vmatpush1.bf16.msra.mxu1 %v3804_v43 }
 0x966   :  { %3811 = vmatprep.subr.bf16.mxu0 %v3810_v13 }
 0x968   :  { %3582 = vmatmul.mubr.msk.f32.vlgmr.msra.gmra.mrb[24].mxu0 %vm1168_vm13, %v2580_v2  ;;  %3584 = vmatmul.mubr.msk.f32.vlgmr.msra.gmra.mrb[30].mxu1 %vm1168_vm13, %v5053_v4 }
 0x969   :  { %3813 = vmatpush1.bf16.msra.mxu0 %v3812_v36  ;;  %2672 = vmatprep.mubr.f32.mxu0 %v4367_v11 }
 0x96a   :  { %3051 = vmatprep.mubr.f32.mxu1 %v4367_v11 }
 0x96c   :  { %3583 = vmatmul.mubr.msk.f32.gmra.mrb[26].mxu0 %vm1168_vm13, %v2581_v22 }
 0x96d   :  { %2874 = vmatprep.mubr.f32.mxu0 %v4367_v11 }
 0x970   :  { %3585 = vmatmul.mubr.msk.f32.vlgmr.msra.gmra.mrb[28].mxu0 %vm1168_vm13, %v2803_v18 }
 0x971   :  { %2880 = vmatprep.mubr.f32.mxu0 %v4367_v11 }
 0x974   :  { %3586 = vmatmul.mubr.msk.f32.gmra.mrb[30].mxu0 %vm1168_vm13, %v4933_v42 }
 0x975   :  { %3165 = vmatprep.mubr.f32.mxu0 %v4367_v11 }
 0xa3b   :  { %v5073_v50 = vpop.f32.mrb[30].mxu1  ;;  %v5075_v59 = vpop.f32.mrb[24].mxu0 }
 0xa3c   :  { %v2755_v61 = vsel %vm1130_vm0, %v5073_v50, -inf  ;;  %v5079_v10 = vpop.f32.mrb[31].mxu1  ;;  %v5081_v36 = vpop.f32.mrb[25].mxu0 }
 0xa3d   :  { %v2756_v13 = vsel %vm1130_vm0, %v5079_v10, -inf }
 0xa3e   :  { %v2757_v5 = vmax.f32 %v2755_v61, %v2756_v13 }
 0xa3f   :  { %v5085_v9 = vpop.f32.mrb[26].mxu0 }
 0xa40   :  { %2758 = vmax.xlane.f32.xlu0 %v2757_v5  ;;  %v3824_v42 = vpack.c.bf16 %v5085_v9, %v5075_v59  ;;  %v5089_v46 = vpop.f32.mrb[27].mxu0 }
 0xa41   :  { %v3822_v63 = vpack.c.bf16 %v5089_v46, %v5081_v36 }
 0xa43   :  { %v2876_v0 = vpop.f32.mrb[28].mxu0 }
 0xa44   :  { %1508 = vmax.xlane.f32.xlu0 %v1507_v47  ;;  %v2878_v16 = vpop.f32.mrb[29].mxu0  ;;  %v2887_v49 = vmul.f32 0.25, %v2876_v0 }
 0xa45   :  { %v2888_v14 = vmul.f32 0.25, %v2878_v16 }
 0xa47   :  { %v2882_v19 = vpop.f32.mrb[30].mxu0 }
 0xa48   :  { %v2889_v20 = vmul.f32 0.25, %v2882_v19  ;;  %2098 = vmax.xlane.f32.xlu0 %v2097_v3  ;;  %v2884_v37 = vpop.f32.mrb[31].mxu0 }
 0xa49   :  { %v2890_v6 = vmul.f32 0.25, %v2884_v37 }
 0xa4a   :  { %v2893_v58 = vadd.f32 %v2889_v20, %v4866_v17 }
 0xa4b   :  { %v2894_v21 = vadd.f32 %v2890_v6, %v4866_v17  ;;  %v5102_v17 = vsub.s32 %v1122_v30, %v4673_v38 }
 0xa4c   :  { %v2895_v23 = vmax.f32 %v2887_v49, %v2893_v58 }
 0xa4d   :  { %v2902_v24 = vmax.f32 %v2888_v14, %v2894_v21  ;;  %v5105_v53 = vrot.slane %v1117_v32, %v5102_v17  ;;  %v5108_v57 = vrot.slane %v1118_v34, %v5102_v17 }
 0xa4e   :  { %v2896_v26 = vrot.slane %v2895_v23, 4 }
 0xa4f   :  { %v2903_v1 = vrot.slane %v2902_v24, 4  ;;  %v5112_v61 = vcombine.high %v5105_v53, %v5105_v53  ;;  %v1148_v13 = vsel %vm1130_vm0, %v5105_v53, 0.0 }
 0xa50   :  { %v2897_v8 = vmax.f32 %v2895_v23, %v2896_v26 }
 0xa51   :  { %v2904_v47 = vmax.f32 %v2902_v24, %v2903_v1  ;;  %v1149_v5 = vsel %vm1130_vm0, %v5112_v61, 0.0 }
 0xa52   :  { %v2898_v27 = vrot.slane %v2897_v8, 2  ;;  %v1150_v0 = vadd.f32 %v1149_v5, %v1148_v13 }
 0xa53   :  { %v2905_v28 = vrot.slane %v2904_v47, 2 }
 0xa54   :  { %v2899_v29 = vmax.f32 %v2897_v8, %v2898_v27  ;;  %1151 = vadd.xlane.f32.xlu0 %v1150_v0 }
 0xa55   :  { %v2906_v15 = vmax.f32 %v2904_v47, %v2905_v28 }
 0xa56   :  { %v2900_v3 = vrot.slane %v2899_v29, 1 }
 0xa57   :  { %v2907_v60 = vrot.slane %v2906_v15, 1 }
 0xa58   :  { %v2901_v31 = vmax.f32 %v2899_v29, %v2900_v3 }
 0xa59   :  { %v2908_v33 = vmax.f32 %v2906_v15, %v2907_v60 }
 0xa5a   :  { %v2909_v35 = vsub.f32 %v2887_v49, %v2901_v31  ;;  %v2911_v39 = vsub.f32 %v2893_v58, %v2901_v31 }
 0xa5b   :  { %v2910_v18 = vsub.f32 %v2888_v14, %v2908_v33  ;;  %v2912_v55 = vsub.f32 %v2894_v21, %v2908_v33  ;;  %v2965_v33 = vpop.trf.xlu1 }
 0xa5c   :  { %v2913_v43 = vmul.f32 1.442695, %v2909_v35  ;;  %v2917_v44 = vmul.f32 1.442695, %v2911_v39  ;;  %v5124_v35 = vpop.trf.xlu0 }
 0xa5d   :  { %v2915_v2 = vmul.f32 1.442695, %v2910_v18  ;;  %v2919_v22 = vmul.f32 1.442695, %v2912_v55 }
 0xa5e   :  { %3959 = vpow2.f32 %v2913_v43  ;;  %v2366_v43 = vld [vmem:[#allocation20 + $0x4] sm:$0xf] }
 0xa5f   :  { %3961 = vpow2.f32 %v2917_v44  ;;  %v2966_v34 = vpop.trf.xlu1  ;;  %v5132_v0 = vrot.slane %v2366_v43, %v5102_v17 }
 0xa60   :  { %3963 = vpow2.f32 %v2915_v2  ;;  %v5126_v39 = vpop.trf.xlu0  ;;  %v2367_v2 = vsub.f32 1.0, %v2366_v43 }
 0xa61   :  { %3965 = vpow2.f32 %v2919_v22 }
 0xa62   :  { %v5129_v5 = vrot.slane %v2367_v2, %v5102_v17 }
 0xa64   :  { %v2379_v46 = vsel %vm1130_vm0, %v5129_v5, 0.0 }
 0xa68   :  { %v3960_v16 = vpop.eup %3959 }
 0xa69   :  { %v3962_v19 = vpop.eup %3961 }
 0xa6a   :  { %v3964_v20 = vpop.eup %3963  ;;  %v2921_v37 = vadd.f32 %v3962_v19, %v3960_v16 }
 0xa6b   :  { %v3966_v6 = vpop.eup %3965 }
 0xa6c   :  { %v2922_v49 = vrot.slane %v2921_v37, 4  ;;  %v2928_v58 = vadd.f32 %v3966_v6, %v3964_v20 }
 0xa6e   :  { %v2923_v14 = vadd.f32 %v2922_v49, %v2921_v37  ;;  %v2929_v21 = vrot.slane %v2928_v58, 4  ;;  %v1127_v49 = vcombine.high %v5108_v57, %v5108_v57 }
 0xa70   :  { %v2924_v23 = vrot.slane %v2923_v14, 2  ;;  %v2930_v24 = vadd.f32 %v2929_v21, %v2928_v58 }
 0xa72   :  { %v2925_v26 = vadd.f32 %v2924_v23, %v2923_v14  ;;  %v2931_v1 = vrot.slane %v2930_v24, 2 }
 0xa74   :  { %v2926_v8 = vrot.slane %v2925_v26, 1  ;;  %v2932_v47 = vadd.f32 %v2931_v1, %v2930_v24 }
 0xa76   :  { %v2933_v27 = vrot.slane %v2932_v47, 1  ;;  %v2927_v28 = vadd.f32 %v2926_v8, %v2925_v26 }
 0xa78   :  { %v2934_v29 = vadd.f32 %v2933_v27, %v2932_v47  ;;  %3967 = vrcp.f32 %v2927_v28 }
 0xa7a   :  { %3969 = vrcp.f32 %v2934_v29 }
 0xa82   :  { %v3968_v15 = vpop.eup %3967 }
 0xa83   :  { %v2939_v48 = vmul.f32 %v3968_v15, %v3960_v16  ;;  %v2941_v56 = vmul.f32 %v3968_v15, %v3962_v19  ;;  %v5136_v16 = vcombine.high %v5129_v5, %v5129_v5  ;;  %v5140_v19 = vcombine.high %v5132_v0, %v5132_v0 }
 0xa84   :  { %v3970_v3 = vpop.eup %3969 }
 0xa85   :  { %v2940_v60 = vmul.f32 %v3970_v3, %v3964_v20  ;;  %v2942_v30 = vmul.f32 %v3970_v3, %v3966_v6  ;;  %v3816_v31 = vpack.c.bf16 %v2941_v56, %v2939_v48  ;;  %v2397_v9 = vsel %vm1130_vm0, %v5140_v19, 0.0 }
 0xa87   :  { %v3814_v32 = vpack.c.bf16 %v2942_v30, %v2940_v60 }
 0xa89   :  { %3815 = vmatprep.subr.bf16.mxu1 %v3814_v32 }
 0xa8a   :  { %3817 = vmatpush1.bf16.msra.mxu1 %v3816_v31 }
 0xa8b   :  { %3827 = vmatprep.subr.bf16.mxu1 %v3814_v32 }
 0xa8d   :  { %3587 = vmatmul.mubr.msk.f32.vlgmr.msra.gmra.mrb[32].mxu1 %vm1168_vm13, %v2965_v33 }
 0xa8e   :  { %3829 = vmatpush1.bf16.msra.mxu1 %v3816_v31  ;;  %3057 = vmatprep.mubr.f32.mxu1 %v4367_v11 }
 0xa91   :  { %3588 = vmatmul.mubr.msk.f32.gmra.mrb[34].mxu1 %vm1168_vm13, %v2966_v34 }
 0xa92   :  { %3342 = vmatprep.mubr.f32.mxu1 %v4367_v11 }
 0xa95   :  { %3591 = vmatmul.mubr.msk.f32.vlgmr.msra.gmra.mrb[36].mxu1 %vm1168_vm13, %v5053_v4 }
 0xacd   :  { %v2759_v18 = vpop.xlane.xlu0 %2758 }
 0xace   :  { %v2760_v55 = vadd.f32 1e-05, %v2759_v18 }
 0xad0   :  { %3971 = vrcp.f32 %v2760_v55 }
 0xad1   :  { %v1509_v44 = vpop.xlane.xlu0 %1508 }
 0xad2   :  { %v1510_v22 = vadd.f32 1e-05, %v1509_v44 }
 0xad4   :  { %3973 = vrcp.f32 %v1510_v22 }
 0xad5   :  { %v2099_v13 = vpop.xlane.xlu0 %2098 }
 0xad6   :  { %v2100_v4 = vadd.f32 1e-05, %v2099_v13 }
 0xad8   :  { %3975 = vrcp.f32 %v2100_v4 }
 0xada   :  { %v3972_v20 = vpop.eup %3971 }
 0xadb   :  { %v2762_v37 = vmul.f32 %v3972_v20, %v5073_v50  ;;  %v2763_v6 = vmul.f32 %v3972_v20, %v5079_v10 }
 0xadd   :  { %v2764_v17 = vmul.f32 %v2762_v37, %v5129_v5  ;;  %v2765_v58 = vmul.f32 %v2763_v6, %v5136_v16  ;;  %v2773_v14 = vmul.f32 %v2762_v37, %v5132_v0  ;;  %v2774_v21 = vmul.f32 %v2763_v6, %v5140_v19 }
 0xade   :  { %v3974_v23 = vpop.eup %3973 }
 0xadf   :  { %v1512_v24 = vmul.f32 %v3974_v23, %v4935_v52  ;;  %v1513_v26 = vmul.f32 %v3974_v23, %v4943_v7  ;;  %v2766_v50 = vsel %vm1130_vm0, %v2764_v17, 0.0  ;;  %v2767_v10 = vsel %vm1130_vm0, %v2765_v58, 0.0 }
 0xae0   :  { %v5154_v1 = vadd.f32 %v2767_v10, %v2766_v50  ;;  %v2775_v8 = vsel %vm1130_vm0, %v2773_v14, 0.0  ;;  %v2776_v47 = vsel %vm1130_vm0, %v2774_v21, 0.0  ;;  %v1131_v23 = vsel %vm1130_vm0, %v5108_v57, 0.0  ;;  %v5192_v10 = vld [vmem:[#allocation18] sm:$0x3] }
 0xae1   :  { %v1514_v27 = vmul.f32 %v1512_v24, %v5108_v57  ;;  %v1515_v28 = vmul.f32 %v1513_v26, %v1127_v49  ;;  %v1523_v29 = vmul.f32 %v1512_v24, %v5105_v53  ;;  %v1524_v15 = vmul.f32 %v1513_v26, %v5112_v61 }
 0xae2   :  { %v3976_v52 = vpop.eup %3975  ;;  %v5161_v48 = vadd.f32 %v2776_v47, %v2775_v8  ;;  %v1132_v24 = vsel %vm1130_vm0, %v1127_v49, 0.0  ;;  %v1156_v36 = vsel %vm1155_vm2, %v5192_v10, 0.0 }
 0xae3   :  { %v1516_v7 = vsel %vm1130_vm0, %v1514_v27, 0.0  ;;  %v1517_v56 = vsel %vm1130_vm0, %v1515_v28, 0.0  ;;  %v1525_v3 = vsel %vm1130_vm0, %v1523_v29, 0.0  ;;  %v1526_v60 = vsel %vm1130_vm0, %v1524_v15, 0.0 }
 0xae4   :  { %v1518_v30 = vadd.f32 %v1517_v56, %v1516_v7  ;;  %v1527_v31 = vadd.f32 %v1526_v60, %v1525_v3  ;;  %v2102_v32 = vmul.f32 %v3976_v52, %v4991_v51  ;;  %v2103_v33 = vmul.f32 %v3976_v52, %v4997_v54 }
 0xae5   :  { %v1133_v50 = vadd.f32 %v1132_v24, %v1131_v23 }
 0xae6   :  { %1519 = vadd.xlane.f32.xlu0 %v1518_v30  ;;  %v2104_v34 = vmul.f32 %v2102_v32, %v5108_v57  ;;  %v2105_v18 = vmul.f32 %v2103_v33, %v1127_v49  ;;  %v2112_v55 = vmul.f32 %v2102_v32, %v5105_v53  ;;  %v2113_v43 = vmul.f32 %v2103_v33, %v5112_v61  ;;  %v1152_v57 = vpop.xlane.xlu0 %1151 }
 0xae8   :  { %v2106_v44 = vsel %vm1130_vm0, %v2104_v34, 0.0  ;;  %v2107_v2 = vsel %vm1130_vm0, %v2105_v18, 0.0  ;;  %v2114_v22 = vsel %vm1130_vm0, %v2112_v55, 0.0  ;;  %v2115_v13 = vsel %vm1130_vm0, %v2113_v43, 0.0 }
 0xae9   :  { %v2108_v4 = vadd.f32 %v2107_v2, %v2106_v44  ;;  %v5176_v51 = vadd.f32 %v2115_v13, %v2114_v22 }
 0xb60   :  { %v3053_v54 = vpop.f32.mrb[32].mxu1 }
 0xb61   :  { %v3055_v20 = vpop.f32.mrb[33].mxu1 }
 0xb64   :  { %v3059_v37 = vpop.f32.mrb[34].mxu1 }
 0xb65   :  { %v3820_v6 = vpack.c.bf16 %v3059_v37, %v3053_v54  ;;  %v3061_v17 = vpop.f32.mrb[35].mxu1 }
 0xb66   :  { %v3818_v58 = vpack.c.bf16 %v3061_v17, %v3055_v20  ;;  %v2143_v17 = vld [vmem:[%s4519_s6] sm:$0xf] }
 0xb68   :  { %3819 = vmatprep.subr.bf16.mxu0 %v3818_v58  ;;  %v3344_v53 = vpop.f32.mrb[36].mxu1  ;;  %v3401_v58 = vld [vmem:[%s4519_s6] sm:$0xf]  ;;  %s3592_s6 = sld [smem:[#allocation2 + $0x80]] }
 0xb69   :  { %v3349_v61 = vsel %vm1130_vm0, %v3344_v53, -inf  ;;  %3821 = vmatpush1.bf16.msra.mxu0 %v3820_v6  ;;  %v3346_v14 = vpop.f32.mrb[37].mxu1 }
 0xb6a   :  { %v3350_v21 = vsel %vm1130_vm0, %v3346_v14, -inf  ;;  %3823 = vmatprep.subr.bf16.mxu0 %v3822_v63  ;;  %v2380_v63 = vsel %vm1130_vm0, %v5136_v16, 0.0 }
 0xb6b   :  { %v3351_v26 = vmax.f32 %v3349_v61, %v3350_v21  ;;  %v2381_v59 = vadd.f32 %v2380_v63, %v2379_v46 }
 0xb6c   :  { %3589 = vmatmul.mubr.msk.f32.vlgmr.msra.gmra.mrb[32].mxu0 %vm1168_vm13, %v5124_v35  ;;  %v1153_v35 = vadd.f32 1e-05, %v1152_v57 }
 0xb6d   :  { %3352 = vmax.xlane.f32.xlu1 %v3351_v26  ;;  %3825 = vmatpush1.bf16.msra.mxu0 %v3824_v42 }
 0xb6e   :  { %3271 = vmatprep.mubr.f32.mxu0 %v4367_v11  ;;  %v2396_v11 = vsel %vm1130_vm0, %v5132_v0, 0.0 }
 0xb6f   :  { %v2398_v42 = vadd.f32 %v2397_v9, %v2396_v11 }
 0xb71   :  { %1134 = vadd.xlane.f32.xlu1 %v1133_v50  ;;  %2399 = vadd.xlane.f32.xlu0 %v2398_v42 }
 0xb73   :  { %v1520_v43 = vpop.xlane.xlu0 %1519 }
 0xb74   :  { %3590 = vmatmul.mubr.msk.f32.vlgmr.msra.gmra.mrb[32].mxu0 %vm1168_vm13, %v5126_v39 }
 0xb75   :  { %1157 = vadd.xlane.f32.xlu1 %v1156_v36 }
 0xb79   :  { %2382 = vadd.xlane.f32.xlu1 %v2381_v59 }
 0xb7d   :  { %1528 = vadd.xlane.f32.xlu1 %v1527_v31 }
 0xb81   :  { %2109 = vadd.xlane.f32.xlu1 %v2108_v4 }
 0xbfa   :  { %v3353_v49 = vpop.xlane.xlu1 %3352 }
 0xbfb   :  { %v3354_v8 = vadd.f32 1e-05, %v3353_v49 }
 0xbfd   :  { %3977 = vrcp.f32 %v3354_v8  ;;  %v4376_v8 = vmov 839922192  }
 0xbfe   :  { %3979 = vrcp.f32 %v1153_v35  ;;  %v1135_v39 = vpop.xlane.xlu1 %1134  ;;  %v5220_v23 = vpop.xlane.xlu0 %2399 }
 0xbff   :  { %v1136_v47 = vadd.f32 1e-05, %v1135_v39  ;;  %v2149_v39 = vunpack.c.l.s4 %v4376_v8 }
 0xc01   :  { %3981 = vrcp.f32 %v1136_v47 }
 0xc02   :  { %v1158_v27 = vpop.xlane.xlu1 %1157 }
 0xc03   :  { %v1159_v28 = vrot.slane %v1158_v27, 4 }
 0xc05   :  { %v1160_v29 = vadd.f32 %v1159_v28, %v1158_v27 }
 0xc06   :  { %v2383_v15 = vpop.xlane.xlu1 %2382 }
 0xc07   :  { %v3978_v52 = vpop.eup %3977  ;;  %v1161_v7 = vrot.slane %v1160_v29, 2  ;;  %v2384_v21 = vadd.f32 1e-05, %v2383_v15  ;;  %v2136_v15 = vstv %s2135_s14 }
 0xc08   :  { %v3980_v56 = vpop.eup %3979  ;;  %v3356_v3 = vmul.f32 %v3978_v52, %v3344_v53  ;;  %v3357_v60 = vmul.f32 %v3978_v52, %v3346_v14 }
 0xc09   :  { %v1162_v30 = vadd.f32 %v1161_v7, %v1160_v29  ;;  %3983 = vrcp.f32 %v2384_v21  ;;  %v2157_v29 = vld [vmem:[%s5306_s10] sm:$0x3]  ;;  %v2150_v7 = vunpack.c.0.s8 %v2149_v39 }
 0xc0a   :  { %v1529_v31 = vpop.xlane.xlu1 %1528  ;;  %v3358_v32 = vmul.f32 %v3356_v3, %v5129_v5  ;;  %v3359_v33 = vmul.f32 %v3357_v60, %v5136_v16  ;;  %v3366_v34 = vmul.f32 %v3356_v3, %v5132_v0  ;;  %v3367_v18 = vmul.f32 %v3357_v60, %v5140_v19 }
 0xc0b   :  { %v3982_v55 = vpop.eup %3981  ;;  %v1531_v44 = vmul.f32 %v3980_v56, %v1529_v31  ;;  %v1163_v2 = vrot.slane %v1162_v30, 1  ;;  %v2166_v3 = vrot.slane %v2157_v29, %v4725_v25  ;;  %v3394_v31 = vstv %s3592_s6 }
 0xc0c   :  { %v1522_v22 = vmul.f32 %v3982_v55, %v1520_v43  ;;  %v3360_v13 = vsel %vm1130_vm0, %v3358_v32, 0.0  ;;  %v3361_v4 = vsel %vm1130_vm0, %v3359_v33, 0.0  ;;  %v3368_v54 = vsel %vm1130_vm0, %v3366_v34, 0.0  ;;  %v3593_v32 = vld [vmem:[%s5306_s10 + $0x2] sm:$0x3] }
 0xc0d   :  { %v1164_v5 = vadd.f32 %v1163_v2, %v1162_v30  ;;  %v3362_v20 = vadd.f32 %v3361_v4, %v3360_v13  ;;  %v3369_v16 = vsel %vm1130_vm0, %v3367_v18, 0.0  ;;  %v2153_v30 = vsub.s32 %v2150_v7, %v4673_v38 }
 0xc0e   :  { %v1532_v0 = vsub.f32 %v1522_v22, %v1531_v44  ;;  %v3370_v37 = vadd.f32 %v3369_v16, %v3368_v54  ;;  %v2110_v50 = vpop.xlane.xlu1 %2109  ;;  %v3395_v43 = vmul.f32 %v3394_v31, %v4963_v62  ;;  %v3421_v2 = vrot.slane %v3593_v32, %v4678_v45 }
 0xc0f   :  { %3834 = vpush %v1164_v5  ;;  %v3425_v22 = vrot.slane %v3593_v32, %v4725_v25  ;;  %v2402_v25 = vld [vmem:[#allocation18] sm:$0x3] }
 0xc10   :  { %v1533_v19 = vmul.f32 %v1532_v0, %v5192_v10 }
 0xc11   :  { %v3426_v5 = vcombine.low %v3421_v2, %v3425_v22 }
 0xc12   :  { %v1534_v6 = vsel %vm1155_vm2, %v1533_v19, 0.0  ;;  %v2401_v19 = vadd.f32 1e-05, %v5220_v23 }
 0xc13   :  { %1535 = vadd.xlane.f32.xlu0 %v1534_v6  ;;  %v3984_v9 = vpop.eup %3983 }
 0xc14   :  { %3985 = vrcp.f32 %v2401_v19 }
 0xc17   :  { %2117 = vadd.xlane.f32.xlu0 %v5176_v51  ;;  %v2111_v51 = vmul.f32 %v3982_v55, %v2110_v50  ;;  %v2170_v55 = vld [vmem:[#allocation21] sm:$0xff] }
 0xc1b   :  { %2769 = vadd.xlane.f32.xlu0 %v5154_v1 }
 0xc1f   :  { %3363 = vadd.xlane.f32.xlu0 %v3362_v20 }
 0xc35   :  { %2146 = vperm.xlu0 %3913, %v2143_v17  }
 0xc39   :  { %3404 = vperm.xlu0 %3913, %v3401_v58  }
 0xc47   :  { %v3273_v53 = vpop.f32.mrb[32].mxu0 }
 0xc48   :  { %v3275_v61 = vpop.f32.mrb[33].mxu0 }
 0xc49   :  { %v3398_v14 = vcombine.low %v3273_v53, %v3275_v61  ;;  %v3986_v53 = vpop.eup %3985 }
 0xc4b   :  { %v3400_v4 = vadd.f32 %v3398_v14, %v3395_v43 }
 0xca0   :  { %v1536_v24 = vpop.xlane.xlu0 %1535 }
 0xca1   :  { %v1537_v26 = vrot.slane %v1536_v24, 4 }
 0xca3   :  { %v1538_v36 = vadd.f32 %v1537_v26, %v1536_v24 }
 0xca4   :  { %v2118_v46 = vpop.xlane.xlu0 %2117 }
 0xca5   :  { %v1539_v1 = vrot.slane %v1538_v36, 2  ;;  %v2119_v63 = vmul.f32 %v3980_v56, %v2118_v46  ;;  %v2162_v56 = vrot.slane %v2157_v29, %v4678_v45 }
 0xca7   :  { %v2120_v59 = vsub.f32 %v2111_v51, %v2119_v63  ;;  %v1540_v11 = vadd.f32 %v1539_v1, %v1538_v36  ;;  %v2167_v33 = vcombine.low %v2162_v56, %v2166_v3 }
 0xca8   :  { %v2770_v42 = vpop.xlane.xlu0 %2769 }
 0xca9   :  { %v5222_v57 = vmul.f32 %v3984_v9, %v2770_v42  ;;  %v2121_v35 = vmul.f32 %v2120_v59, %v5192_v10  ;;  %v1541_v49 = vrot.slane %v1540_v11, 1  ;;  %v3991_v10 = vld [vmem:[#allocation14] sm:$0xff]  ;;  %v2171_v13 = vmul.f32 %v2170_v55, %v2167_v33 }
 0xcaa   :  { %v2137_v60 = vmul.f32 %v3991_v10, %v2136_v15 }
 0xcab   :  { %v2122_v47 = vsel %vm1155_vm2, %v2121_v35, 0.0  ;;  %v1542_v27 = vadd.f32 %v1541_v49, %v1540_v11 }
 0xcac   :  { %v3364_v28 = vpop.xlane.xlu0 %3363  ;;  %2123 = vadd.xlane.f32.xlu1 %v2122_v47  ;;  %v2142_v34 = vadd.f32 %v2140_v12, %v2137_v60  ;;  %v3430_v47 = vld [vmem:[#allocation21 + $0x8] sm:$0xff] }
 0xcad   :  { %v3365_v52 = vmul.f32 %v3984_v9, %v3364_v28  ;;  %3836 = vpush %v1542_v27  ;;  %v3431_v27 = vmul.f32 %v3430_v47, %v3426_v5 }
 0xcb0   :  { %2778 = vadd.xlane.f32.xlu1 %v5161_v48 }
 0xcb4   :  { %v2147_v18 = vpop.permute.xlu0 %2146  ;;  %3371 = vadd.xlane.f32.xlu1 %v3370_v37 }
 0xcb5   :  { %v2154_v44 = vrot.slane %v2147_v18, %v2153_v30 }
 0xcb7   :  { %v2156_v48 = vadd.f32 %v2154_v44, %v2142_v34 }
 0xcb8   :  { %v3405_v38 = vpop.permute.xlu0 %3404 }
 0xcb9   :  { %v2169_v54 = vmul.f32 %v2167_v33, %v2156_v48  ;;  %v3412_v20 = vrot.slane %v3405_v38, %v2153_v30 }
 0xcbb   :  { %2191 = vst [vmem:[#allocation23] sm:$0xff] %v2169_v54  ;;  %v3414_v40 = vadd.f32 %v3412_v20, %v3400_v4  ;;  %v2172_v41 = vsub.f32 %v2169_v54, %v2171_v13 }
 0xcbd   :  { %v3428_v12 = vmul.f32 %v3426_v5, %v3414_v40  ;;  %v2173_v16 = vmul.f32 %v2172_v41, %v2172_v41 }
 0xcbf   :  { %3452 = vst [vmem:[#allocation23 + $0x8] sm:$0xff] %v3428_v12  ;;  %v2175_v0 = vcombine.high %v2173_v16, %v2173_v16  ;;  %v2177_v62 = vsel %vm1016_vm10, %v2173_v16, 0.0  ;;  %v3432_v28 = vsub.f32 %v3428_v12, %v3431_v27 }
 0xcc1   :  { %v2178_v45 = vsel %vm1016_vm10, %v2175_v0, 0.0  ;;  %v3433_v29 = vmul.f32 %v3432_v28, %v3432_v28 }
 0xcc2   :  { %v2179_v37 = vadd.f32 %v2178_v45, %v2177_v62 }
 0xcc3   :  { %v3435_v7 = vcombine.high %v3433_v29, %v3433_v29  ;;  %v3437_v60 = vsel %vm1016_vm10, %v3433_v29, 0.0 }
 0xcc4   :  { %2180 = vadd.xlane.f32.xlu1 %v2179_v37 }
 0xcc5   :  { %v3438_v10 = vsel %vm1016_vm10, %v3435_v7, 0.0 }
 0xcc6   :  { %v3439_v30 = vadd.f32 %v3438_v10, %v3437_v60 }
 0xcd5   :  { %2404 = vrot.lane.b32.xlu1 %v2402_v25, %s4377_s24 }
 0xd39   :  { %v2124_v6 = vpop.xlane.xlu1 %2123 }
 0xd3a   :  { %v2125_v17 = vrot.slane %v2124_v6, 4 }
 0xd3c   :  { %v2126_v58 = vadd.f32 %v2125_v17, %v2124_v6 }
 0xd3d   :  { %v2779_v61 = vpop.xlane.xlu1 %2778 }
 0xd3e   :  { %v2127_v14 = vrot.slane %v2126_v58, 2  ;;  %v2781_v21 = vmul.f32 %v3986_v53, %v2779_v61 }
 0xd40   :  { %v2782_v24 = vsub.f32 %v5222_v57, %v2781_v21  ;;  %v2128_v26 = vadd.f32 %v2127_v14, %v2126_v58 }
 0xd41   :  { %v3372_v50 = vpop.xlane.xlu1 %3371 }
 0xd42   :  { %v3373_v36 = vmul.f32 %v3986_v53, %v3372_v50  ;;  %v2783_v46 = vmul.f32 %v2782_v24, %v2402_v25  ;;  %v2129_v51 = vrot.slane %v2128_v26, 1 }
 0xd44   :  { %v3374_v1 = vsub.f32 %v3365_v52, %v3373_v36  ;;  %2785 = vrot.lane.b32.xlu0 %v2783_v46, %s4377_s24  ;;  %v2130_v63 = vadd.f32 %v2129_v51, %v2128_v26 }
 0xd46   :  { %3838 = vpush %v2130_v63  ;;  %v3375_v23 = vmul.f32 %v3374_v1, %v2402_v25 }
 0xd48   :  { %3377 = vrot.lane.b32.xlu0 %v3375_v23, %s4377_s24 }
 0xd51   :  { %v2181_v59 = vpop.xlane.xlu1 %2180 }
 0xd52   :  { %v2182_v11 = vrot.slane %v2181_v59, 4 }
 0xd54   :  { %v2183_v9 = vadd.f32 %v2182_v11, %v2181_v59 }
 0xd55   :  { %v2405_v42 = vpop.permute.xlu1 %2404 }
 0xd56   :  { %v2184_v35 = vrot.slane %v2183_v9, 2  ;;  %v2407_v49 = vsel %vm1155_vm2, %v2405_v42, 0.0 }
 0xd57   :  { %2408 = vadd.xlane.f32.xlu1 %v2407_v49 }
 0xd58   :  { %v2185_v57 = vadd.f32 %v2184_v35, %v2183_v9 }
 0xd5a   :  { %v2186_v8 = vrot.slane %v2185_v57, 1 }
 0xd5c   :  { %v2187_v39 = vadd.f32 %v2186_v8, %v2185_v57 }
 0xd5e   :  { %3840 = vpush %v2187_v39 }
 0xdb6   :  { %v2786_v15 = vpop.permute.xlu0 %2785 }
 0xdb7   :  { %v2788_v52 = vsel %vm1155_vm2, %v2786_v15, 0.0 }
 0xdb8   :  { %2789 = vadd.xlane.f32.xlu0 %v2788_v52 }
 0xdba   :  { %v3378_v56 = vpop.permute.xlu0 %3377 }
 0xdbb   :  { %v3380_v3 = vsel %vm1155_vm2, %v3378_v56, 0.0 }
 0xdbc   :  { %3381 = vadd.xlane.f32.xlu1 %v3380_v3 }
 0xdc0   :  { %3440 = vadd.xlane.f32.xlu1 %v3439_v30 }
 0xde4   :  { %v2409_v31 = vpop.xlane.xlu1 %2408 }
 0xde5   :  { %v2410_v32 = vrot.slane %v2409_v31, 4 }
 0xde7   :  { %v2411_v33 = vadd.f32 %v2410_v32, %v2409_v31 }
 0xde9   :  { %v2412_v34 = vrot.slane %v2411_v33, 2 }
 0xdeb   :  { %v2413_v18 = vadd.f32 %v2412_v34, %v2411_v33 }
 0xded   :  { %v2414_v55 = vrot.slane %v2413_v18, 1 }
 0xdef   :  { %v2415_v43 = vadd.f32 %v2414_v55, %v2413_v18 }
 0xdf1   :  { %3842 = vpush %v2415_v43 }
 0xdf2   :  { %4245 = shalt.err (!%p4242_p8)
}
 0xdf3   :  { %s4246_s15 = scalar_lea.hbm %s4524_s29, 256 }
 0xdf4   :  { %p4247_p9 = scmp.ne.s32.totalorder %s4524_s29, %s4246_s15  ;;  %p4250_p10 = scmp.lt.u32.totalorder %s4246_s15, %s4524_s29 }
 0xdf6   :  { %p4252_p11 = pnand %p4250_p10, %p4247_p9 }
 0xdf8   :  { %4255 = shalt.err (!%p4252_p11)
}
 0xdf9   :  { %3470 = dma.vmem_to_hbm [thread:$0]  %s3465_s12, 256, %s4524_s29, [#allocation4], %s4353_s28, %s4353_s28, %s4354_s17   ;;  %vm3454_vm3 = vcmask 0  }
 0xdfa   :  { %s3835_s29 = spop %3834  ;;  %s4379_s13 = smov [#allocation24]  }
 0xdfb   :  { %s3837_s28 = spop %3836  ;;  %v1166_v17 = vstv %s3835_s29  ;;  %s3477_s25 = sshll.u32 %s4379_s13, 4  ;;  %s3478_s25 = int_to_ptr.vmem [resolvable:$true] %s3477_s25 }
 0xdfc   :  { %s3839_s17 = spop %3838  ;;  %v1167_v53 = vadd.f32 1e-05, %v1166_v17  ;;  %v1544_v24 = vstv %s3837_s28  ;;  %s4380_s22 = smov [#allocation26]  }
 0xdfd   :  { %s5254_s16 = spop %3840  ;;  %v2132_v14 = vstv %s3839_s17  ;;  %s3487_s23 = sshll.u32 %s4380_s22, 4  ;;  %s5258_s23 = int_to_ptr.vmem [resolvable:$true] %s3487_s23 }
 0xdfe   :  { %3987 = vrcp.f32 %v1167_v53  ;;  %v2189_v9 = vstv %s5254_s16  ;;  %s4256_s8 = scalar_lea.vmem %s3478_s25, 16  ;;  %s4260_s21 = scalar_lea.vmem %s3478_s25, 32 }
 0xdff   :  { %p4257_p12 = scmp.ne.s32.totalorder %s3478_s25, %s4256_s8  ;;  %p4261_p13 = scmp.lt.s32.totalorder %s3478_s25, %s3478_s25 }
 0xe00   :  { %p4262_p0 = scmp.lt.s32.totalorder %s4260_s21, %s4256_s8 }
 0xe02   :  { %p4263_p1 = por %p4262_p0, %p4261_p13 }
 0xe04   :  { %p4264_p2 = pnand %p4263_p1, %p4257_p12 }
 0xe08   :  { %v3988_v21 = vpop.eup %3987 }
 0xe09   :  { %v2133_v26 = vmul.f32 %v3988_v21, %v2132_v14  ;;  %v1546_v46 = vmul.f32 %v3988_v21, %v1544_v24 }
 0xe0b   :  { %v2134_v1 = vadd.f32 %v2133_v26, %v1546_v46 }
 0xe22   :  { %s3843_s11 = spop %3842 }
 0xe23   :  { %v2417_v58 = vstv %s3843_s11 }
 0xe24   :  { %v2418_v61 = vadd.f32 1e-05, %v2417_v58 }
 0xe26   :  { %3989 = vrcp.f32 %v2418_v61 }
 0xe30   :  { %v3990_v50 = vpop.eup %3989 }
 0xe45   :  { %v2790_v44 = vpop.xlane.xlu0 %2789 }
 0xe46   :  { %v2791_v2 = vrot.slane %v2790_v44, 4 }
 0xe48   :  { %v2792_v22 = vadd.f32 %v2791_v2, %v2790_v44 }
 0xe49   :  { %v3382_v48 = vpop.xlane.xlu1 %3381 }
 0xe4a   :  { %v2793_v13 = vrot.slane %v2792_v22, 2  ;;  %v3383_v38 = vrot.slane %v3382_v48, 4 }
 0xe4c   :  { %v2794_v4 = vadd.f32 %v2793_v13, %v2792_v22  ;;  %v3384_v54 = vadd.f32 %v3383_v38, %v3382_v48 }
 0xe4d   :  { %v3441_v5 = vpop.xlane.xlu1 %3440 }
 0xe4e   :  { %v3385_v20 = vrot.slane %v3384_v54, 2  ;;  %v3442_v40 = vrot.slane %v3441_v5, 4  ;;  %v2795_v41 = vrot.slane %v2794_v4, 1 }
 0xe50   :  { %v3443_v12 = vadd.f32 %v3442_v40, %v3441_v5  ;;  %v2796_v16 = vadd.f32 %v2795_v41, %v2794_v4  ;;  %v3386_v0 = vadd.f32 %v3385_v20, %v3384_v54 }
 0xe52   :  { %v3444_v62 = vrot.slane %v3443_v12, 2  ;;  %3844 = vpush %v2796_v16  ;;  %v3387_v45 = vrot.slane %v3386_v0, 1 }
 0xe54   :  { %v3445_v37 = vadd.f32 %v3444_v62, %v3443_v12  ;;  %v3388_v25 = vadd.f32 %v3387_v45, %v3386_v0 }
 0xe56   :  { %3846 = vpush %v3388_v25  ;;  %v3446_v19 = vrot.slane %v3445_v37, 1 }
 0xe58   :  { %v3447_v6 = vadd.f32 %v3446_v19, %v3445_v37 }
 0xe5a   :  { %3848 = vpush %v3447_v6 }
 0xe83   :  { %s3845_s9 = spop %3844 }
 0xe84   :  { %v2798_v36 = vstv %s3845_s9 }
 0xe85   :  { %v2800_v51 = vmul.f32 %v3990_v50, %v2798_v36 }
 0xe87   :  { %s3847_s0 = spop %3846  ;;  %v2801_v23 = vadd.f32 %v2800_v51, %v2134_v1 }
 0xe88   :  { %v3390_v63 = vstv %s3847_s0 }
 0xe89   :  { %v3391_v59 = vmul.f32 %v3990_v50, %v3390_v63 }
 0xe8b   :  { %s3849_s18 = spop %3848  ;;  %v3392_v11 = vadd.f32 %v3391_v59, %v2801_v23 }
 0xe8c   :  { %v3449_v42 = vstv %s3849_s18 }
 0xe8d   :  { %v3450_v35 = vadd.f32 %v3449_v42, %v2189_v9  ;;  %v3453_v49 = vmul.f32 0.25, %v3392_v11 }
 0xe8f   :  { %v3457_v57 = vmul.f32 0.00048828125, %v3450_v35  ;;  %3455 = vst.msk [vmem:[#allocation24] sm:$0x1] %vm3454_vm3, %v3453_v49 }
 0xe90   :  { %4267 = shalt.err (!%p4264_p2)
}
 0xe91   :  { %s4268_s26 = scalar_lea.hbm %s4529_s27, 16 }
 0xe92   :  { %p4269_p3 = scmp.ne.s32.totalorder %s4529_s27, %s4268_s26  ;;  %p4272_p4 = scmp.lt.u32.totalorder %s4268_s26, %s4529_s27 }
 0xe94   :  { %p4274_p5 = pnand %p4272_p4, %p4269_p3 }
 0xe96   :  { %4277 = shalt.err (!%p4274_p5)
}
 0xe97   :  { %3480 = dma.vmem_to_hbm [thread:$0]  %s3478_s25, 16, %s4529_s27, [#allocation25]   ;;  %3458 = vst.msk [vmem:[#allocation26] sm:$0x1] %vm3454_vm3, %v3457_v57 }
 0xe98   :  { %s4278_s19 = scalar_lea.vmem %s5258_s23, 16  ;;  %s4282_s5 = scalar_lea.vmem %s5258_s23, 32 }
 0xe99   :  { %p4279_p6 = scmp.ne.s32.totalorder %s5258_s23, %s4278_s19  ;;  %p4283_p7 = scmp.lt.s32.totalorder %s5258_s23, %s5258_s23 }
 0xe9a   :  { %p4284_p8 = scmp.lt.s32.totalorder %s4282_s5, %s4278_s19 }
 0xe9c   :  { %p4285_p9 = por %p4284_p8, %p4283_p7 }
 0xe9e   :  { %p4286_p10 = pnand %p4285_p9, %p4279_p6 }
 0xea0   :  { %4289 = shalt.err (!%p4286_p10)
}
 0xea1   :  { %s4290_s3 = scalar_lea.hbm %s4534_s4, 16 }
 0xea2   :  { %p4291_p11 = scmp.ne.s32.totalorder %s4534_s4, %s4290_s3  ;;  %p4294_p12 = scmp.lt.u32.totalorder %s4290_s3, %s4534_s4 }
 0xea4   :  { %p4296_p13 = pnand %p4294_p12, %p4291_p11 }
 0xea6   :  { %4299 = shalt.err (!%p4296_p13)
}
 0xea7   :  { %3490 = dma.vmem_to_hbm [thread:$0]  %s5258_s23, 16, %s4534_s4, [#allocation25]  }
 0xea8   :  { %4316 = dma.done.wait [#allocation4], 256  }
 0xea9   :  { %4317 = vsyncadd [#allocation4], 4294967040 }
 0xeaa   :  { %4318 = dma.done.wait [#allocation25], 32  }
 0xeab   :  { %4319 = vsyncadd [#allocation25], 4294967264 }
 0xeac   :  { %3500 = vsyncpa [#allocation3], 1 }
 0xead   :  { %3501 = vsyncpa [#allocation10], 1 }
 0xeae   :  { %3502 = vsyncpa [#allocation13], 1 }
 0xeaf   :  { %3503 = vsyncpa [#allocation16], 1 }
 0xeb0   :  { %3504 = vsyncpa [#allocation19], 1 }
 0xeb1   :  { %3505 = vsyncpa [#allocation22], 1 }
 0xeb2   :  { %3506 = vsyncpa [#allocation4], 1 }
 0xeb3   :  { %3507 = vsyncpa [#allocation25], 1 }
 0xeb4   :  { %3508 = vsyncpa [#allocation5], 1 }
 0xeb5   :  { %3509 = vsyncpa [#allocation6], 1 }

</bundles_post_ra>
